<compile_context>
chip_gen: v5e
topology: v5e:2x2
jax: 0.10.0
libtpu: 0.0.40
codegen_flags: <defaults>
</compile_context>

<pallas_src>
import jax
import jax.numpy as jnp
from jax.experimental import pallas as pl
from jax.experimental.pallas import tpu as pltpu


# ---------------------------------------------------------------------------
# Fused forward kernel (one grid step == BT lane-packed images)
# ---------------------------------------------------------------------------
def _policy_kernel(p1_ref, w1_ref, b1_ref,
                   sel2_ref, w2_ref, b2_ref,
                   sel3_ref, w3_ref, b3_ref,
                   sel4_ref, w4_ref, b4_ref,
                   wf1_ref, bf1_ref, wf2_ref, bf2_ref, wf3_ref, bf3_ref,
                   out_ref):
    # conv1: wrapper-built bf16 patches (256, BT*9*Cin) x block-diag weight.
    a = jnp.dot(p1_ref[...], w1_ref[...], preferred_element_type=jnp.float32)
    a = jnp.maximum(a + b1_ref[...], 0.0)                 # (256, BT*32) f32

    def conv_block(x_f32, sel_ref, w_ref, b_ref):
        """stride-2 3x3 conv + ReLU on BT lane-packed images (S_in, BT*32)."""
        xb = x_f32.astype(jnp.bfloat16)
        # In-kernel im2col: 9 tap-selection matmuls (0/1 matrices, exact).
        taps = [jnp.dot(sel_ref[p], xb, preferred_element_type=jnp.float32)
                .astype(jnp.bfloat16) for p in range(9)]
        patches = jnp.concatenate(taps, axis=1)           # (S_out, 9*BT*32)
        y = jnp.dot(patches, w_ref[...], preferred_element_type=jnp.float32)
        return jnp.maximum(y + b_ref[...], 0.0)           # (S_out, BT*32)

    a = conv_block(a, sel2_ref, w2_ref, b2_ref)           # (64, BT*32)
    a = conv_block(a, sel3_ref, w3_ref, b3_ref)           # (16, BT*32)
    a = conv_block(a, sel4_ref, w4_ref, b4_ref)           # (4,  BT*32)

    # Flatten folded into fc1: lane-concat the 4 spatial rows -> (1, 4*BT*32);
    # fc weights are block-diagonal per image, so no per-image work remains.
    f = jnp.concatenate([a[s:s + 1, :] for s in range(4)],
                        axis=1).astype(jnp.bfloat16)      # (1, 512)
    h = jnp.dot(f, wf1_ref[...], preferred_element_type=jnp.float32)
    h = jnp.maximum(h + bf1_ref[...], 0.0)                # (1, BT*fc1)
    h = jnp.dot(h.astype(jnp.bfloat16), wf2_ref[...],
                preferred_element_type=jnp.float32)
    h = jnp.maximum(h + bf2_ref[...], 0.0)                # (1, BT*fc2)
    o = jnp.dot(h.astype(jnp.bfloat16), wf3_ref[...],
                preferred_element_type=jnp.float32)
    out_ref[0] = o + bf3_ref[...]                         # (1, BT*n_actions)


def _const_spec(a):
    """Full-array block with a constant index_map -> VMEM-resident across grid."""
    nd = a.ndim
    return pl.BlockSpec(a.shape, lambda t, _nd=nd: (0,) * _nd)


# ---------------------------------------------------------------------------
# Wrapper-side glue
# ---------------------------------------------------------------------------
def _build_conv1_patches(obs, bt):
    """obs (N, C, 32, 32) with N % bt == 0 -> (N//bt * 256, 9*bt*C) bf16 patches.
    Row = tile-local output position (row-major); col = tap*(bt*C) + img*C + cin."""
    n, c, h, w = obs.shape
    xp = jnp.pad(obs, ((0, 0), (0, 0), (1, 1), (1, 1)))
    ho, wo = h // 2, w // 2
    cols = []
    for di in range(3):
        for dj in range(3):
            cols.append(xp[:, :, di:di + 2 * ho:2, dj:dj + 2 * wo:2])
    p = jnp.stack(cols, axis=1)                 # (N, 9, C, Ho, Wo)
    p = p.transpose(0, 3, 4, 1, 2)              # (N, Ho, Wo, 9, C)
    nt = n // bt
    p = p.reshape(nt, bt, ho * wo, 9, c)
    p = p.transpose(0, 2, 3, 1, 4)              # (nt, S1, 9, bt, C)
    p = p.reshape(nt * ho * wo, 9 * bt * c)
    return p.astype(jnp.bfloat16), ho * wo


def policy_network_forward(params, observation):
    obs = observation.astype(jnp.float32)       # (N, Cin, 32, 32) NCHW
    n, cin, h, w = obs.shape
    assert h == 32 and w == 32, "PolicyNetwork assumes 32x32 spatial input"

    bt = params["c2_b"].shape[1] // 32          # images lane-packed per grid step
    n_actions = params["f3_b"].shape[1] // bt
    fc1 = params["f1_b"].shape[1] // bt
    fc2 = params["f2_b"].shape[1] // bt

    n_pad = pl.cdiv(n, bt) * bt
    if n_pad != n:
        obs = jnp.pad(obs, ((0, n_pad - n), (0, 0), (0, 0), (0, 0)))
    nt = n_pad // bt

    patches, s1 = _build_conv1_patches(obs, bt)  # (nt*256, 9*bt*Cin) bf16

    inputs = (patches,
              params["c1_w"], params["c1_b"],
              params["sel2"], params["c2_w"], params["c2_b"],
              params["sel3"], params["c3_w"], params["c3_b"],
              params["sel4"], params["c4_w"], params["c4_b"],
              params["f1_w"], params["f1_b"],
              params["f2_w"], params["f2_b"],
              params["f3_w"], params["f3_b"])

    in_specs = [pl.BlockSpec((s1, 9 * bt * cin), lambda t: (t, 0))]
    in_specs += [_const_spec(a) for a in inputs[1:]]

    # Advisory cost estimate (MXU MACs per tile * grid, all HBM bytes touched).
    lanes = bt * 32
    macs = s1 * (9 * bt * cin) * lanes
    for so, si in ((64, 256), (16, 64), (4, 16)):
        macs += 9 * so * si * lanes + so * (9 * lanes) * lanes
    macs += (4 * lanes) * (bt * fc1) + (bt * fc1) * (bt * fc2) \
        + (bt * fc2) * (bt * n_actions)
    bytes_in = sum(int(a.size) * a.dtype.itemsize for a in inputs)
    bytes_out = nt * bt * n_actions * 4

    out3d = pl.pallas_call(
        _policy_kernel,
        grid=(nt,),
        out_shape=jax.ShapeDtypeStruct((nt, 1, bt * n_actions), jnp.float32),
        in_specs=in_specs,
        out_specs=pl.BlockSpec((1, 1, bt * n_actions), lambda t: (t, 0, 0)),
        compiler_params=pltpu.CompilerParams(
            dimension_semantics=("parallel",),
            vmem_limit_bytes=32 * 1024 * 1024),
        cost_estimate=pl.CostEstimate(flops=2 * macs * nt, transcendentals=0,
                                      bytes_accessed=bytes_in + bytes_out),
    )(*inputs)

    return out3d.reshape(n_pad, n_actions)[:n]


# ---------------------------------------------------------------------------
# Parameters: PyTorch-layout init + one-time packing into the kernel layout
# ---------------------------------------------------------------------------
def _make_sel(H, W, dtype=jnp.bfloat16):
    """0/1 tap-selection matrices for a 3x3 / stride-2 / pad-1 conv on (H, W)."""
    Ho, Wo = H // 2, W // 2
    t = jnp.arange(Ho * Wo)
    oh, ow = t // Wo, t % Wo
    s = jnp.arange(H * W)
    mats = []
    for di in range(3):
        for dj in range(3):
            ih = 2 * oh + di - 1
            iw = 2 * ow + dj - 1
            valid = (ih >= 0) & (ih < H) & (iw >= 0) & (iw < W)
            src = ih * W + iw
            m = (src[:, None] == s[None, :]) & valid[:, None]
            mats.append(m.astype(dtype))
    return jnp.stack(mats)                      # (9, Ho*Wo, H*W)


def init_torch_layout_params(key, input_dims, fc1_dims, fc2_dims, n_actions):
    def uniform(k, shape, fan_in):
        bound = 1.0 / jnp.sqrt(jnp.float32(fan_in))
        return jax.random.uniform(k, shape, jnp.float32, -bound, bound)

    keys = jax.random.split(key, 14)
    p = {}
    conv_chans = [(32, input_dims), (32, 32), (32, 32), (32, 32)]
    for i, (co, ci) in enumerate(conv_chans, start=1):
        fan_in = ci * 9
        p[f"conv{i}_w"] = uniform(keys[2 * (i - 1)], (co, ci, 3, 3), fan_in)
        p[f"conv{i}_b"] = uniform(keys[2 * (i - 1) + 1], (co,), fan_in)
    n_inputs = 32 * 2 * 2
    fc_dims = [(fc1_dims, n_inputs), (fc2_dims, fc1_dims), (n_actions, fc2_dims)]
    for j, (o, i_) in enumerate(fc_dims, start=1):
        p[f"fc{j}_w"] = uniform(keys[8 + 2 * (j - 1)], (o, i_), i_)
        p[f"fc{j}_b"] = uniform(keys[8 + 2 * (j - 1) + 1], (o,), i_)
    return p


def pack_params(tp, batch_tile=4):
    """One-time rearrangement into lane-packed / block-diagonal kernel layout."""
    bt = batch_tile
    eye = jnp.eye(bt, dtype=jnp.float32)
    kp = {}
    # Conv weights: (Cout, Cin, 3, 3) -> block-diag (9*bt*Cin, bt*Cout), rows
    # ordered tap-major / image-major / channel-minor (matches kernel patches).
    for i in range(1, 5):
        w = tp[f"conv{i}_w"].astype(jnp.float32)
        co, ci = w.shape[0], w.shape[1]
        w9 = jnp.transpose(w, (2, 3, 1, 0)).reshape(9, ci, co)   # [tap, cin, cout]
        wbd = jnp.einsum("tab,ij->tiajb", w9, eye).reshape(9 * bt * ci, bt * co)
        kp[f"c{i}_w"] = wbd.astype(jnp.bfloat16)
        kp[f"c{i}_b"] = jnp.tile(tp[f"conv{i}_b"].astype(jnp.float32),
                                 bt).reshape(1, bt * co)
    # fc1: torch input feature index = c*4 + s ; kernel row = s*bt*32 + i*32 + c.
    w1 = tp["fc1_w"].astype(jnp.float32)                          # (fc1, 128)
    fc1 = w1.shape[0]
    a = jnp.transpose(w1.T.reshape(32, 4, fc1), (1, 0, 2))        # [s, c, k]
    wf1 = jnp.einsum("sck,ij->sicjk", a, eye).reshape(4 * bt * 32, bt * fc1)
    kp["f1_w"] = wf1.astype(jnp.bfloat16)
    kp["f1_b"] = jnp.tile(tp["fc1_b"].astype(jnp.float32), bt).reshape(1, bt * fc1)
    fc2 = tp["fc2_w"].shape[0]
    na = tp["fc3_w"].shape[0]
    kp["f2_w"] = jnp.kron(eye, tp["fc2_w"].astype(jnp.float32).T).astype(jnp.bfloat16)
    kp["f2_b"] = jnp.tile(tp["fc2_b"].astype(jnp.float32), bt).reshape(1, bt * fc2)
    kp["f3_w"] = jnp.kron(eye, tp["fc3_w"].astype(jnp.float32).T).astype(jnp.bfloat16)
    kp["f3_b"] = jnp.tile(tp["fc3_b"].astype(jnp.float32), bt).reshape(1, bt * na)
    # In-kernel im2col selection matrices for conv2..conv4 (32x32 input chain).
    kp["sel2"] = _make_sel(16, 16)   # (9, 64, 256)
    kp["sel3"] = _make_sel(8, 8)     # (9, 16, 64)
    kp["sel4"] = _make_sel(4, 4)     # (9, 4, 16)
    return kp


# ---------------------------------------------------------------------------
# Pure-JAX reference (torch-layout params) for a correctness cross-check
# ---------------------------------------------------------------------------
def reference_forward(tp, obs):
    x = obs.astype(jnp.float32)
    for i in range(1, 5):
        x = jax.lax.conv_general_dilated(
            x, tp[f"conv{i}_w"], window_strides=(2, 2),
            padding=((1, 1), (1, 1)),
            dimension_numbers=("NCHW", "OIHW", "NCHW"))
        x = jax.nn.relu(x + tp[f"conv{i}_b"][None, :, None, None])
    x = x.reshape(x.shape[0], 32 * 2 * 2)
    x = jax.nn.relu(x @ tp["fc1_w"].T + tp["fc1_b"])
    x = jax.nn.relu(x @ tp["fc2_w"].T + tp["fc2_b"])
    return x @ tp["fc3_w"].T + tp["fc3_b"]


if __name__ == "__main__":
    # Module hyperparameters: spatial size must be 32x32 (torch view(-1, 32*2*2)
    # hard-codes it) and input_dims=1 (the calc_input_dims probe implies it).
    input_dims, fc1_dims, fc2_dims, n_actions = 1, 64, 64, 4
    batch = 6   # not a multiple of the 4-image tile: exercises padding + grid

    key = jax.random.PRNGKey(0)
    pkey, xkey = jax.random.split(key)
    torch_params = init_torch_layout_params(pkey, input_dims, fc1_dims,
                                            fc2_dims, n_actions)
    params = pack_params(torch_params, batch_tile=4)
    observation = jax.random.normal(xkey, (batch, input_dims, 32, 32),
                                    jnp.float32)

    fwd = jax.jit(policy_network_forward)
    logits = jax.block_until_ready(fwd(params, observation))
    assert logits.shape == (batch, n_actions)
    assert logits.dtype == jnp.float32

    # Cross-check vs. plain-JAX reference (weights and inputs rounded to bf16 to
    # mirror the kernel's bf16 MXU inputs; remaining delta is activation rounding).
    tp_round = {k: (v.astype(jnp.bfloat16).astype(jnp.float32)
                    if k.endswith("_w") else v)
                for k, v in torch_params.items()}
    obs_round = observation.astype(jnp.bfloat16).astype(jnp.float32)
    ref = reference_forward(tp_round, obs_round)
    err = float(jnp.max(jnp.abs(logits - ref)))
    assert err < 5e-2, f"kernel/reference mismatch: max abs err = {err}"

    print("KERNEL_OK")
</pallas_src>

<mosaic_0001>
module attributes {stable_mosaic.version = 11 : i64} {
  func.func @_policy_kernel(%arg0: i32, %arg1: memref<256x36xbf16, #tpu.memory_space<vmem>>, %arg2: memref<36x128xbf16, #tpu.memory_space<vmem>>, %arg3: memref<1x128xf32, #tpu.memory_space<vmem>>, %arg4: memref<9x64x256xbf16, #tpu.memory_space<vmem>>, %arg5: memref<1152x128xbf16, #tpu.memory_space<vmem>>, %arg6: memref<1x128xf32, #tpu.memory_space<vmem>>, %arg7: memref<9x16x64xbf16, #tpu.memory_space<vmem>>, %arg8: memref<1152x128xbf16, #tpu.memory_space<vmem>>, %arg9: memref<1x128xf32, #tpu.memory_space<vmem>>, %arg10: memref<9x4x16xbf16, #tpu.memory_space<vmem>>, %arg11: memref<1152x128xbf16, #tpu.memory_space<vmem>>, %arg12: memref<1x128xf32, #tpu.memory_space<vmem>>, %arg13: memref<512x256xbf16, #tpu.memory_space<vmem>>, %arg14: memref<1x256xf32, #tpu.memory_space<vmem>>, %arg15: memref<256x256xbf16, #tpu.memory_space<vmem>>, %arg16: memref<1x256xf32, #tpu.memory_space<vmem>>, %arg17: memref<256x16xbf16, #tpu.memory_space<vmem>>, %arg18: memref<1x16xf32, #tpu.memory_space<vmem>>, %arg19: memref<1x1x16xf32, #tpu.memory_space<vmem>>) attributes {dimension_semantics = [#tpu.dimension_semantics<parallel>], iteration_bounds = array<i64: 2>, scalar_prefetch = 0 : i64, scratch_operands = 0 : i64, tpu.core_type = #tpu.core_type<tc>, window_params = [{transform_indices = @transform_0, window_bounds = array<i64: 256, 36>}, {pipeline_mode = #tpu.pipeline_mode<synchronous>, transform_indices = @transform_1, window_bounds = array<i64: 36, 128>}, {pipeline_mode = #tpu.pipeline_mode<synchronous>, transform_indices = @transform_2, window_bounds = array<i64: 1, 128>}, {pipeline_mode = #tpu.pipeline_mode<synchronous>, transform_indices = @transform_3, window_bounds = array<i64: 9, 64, 256>}, {pipeline_mode = #tpu.pipeline_mode<synchronous>, transform_indices = @transform_4, window_bounds = array<i64: 1152, 128>}, {pipeline_mode = #tpu.pipeline_mode<synchronous>, transform_indices = @transform_5, window_bounds = array<i64: 1, 128>}, {pipeline_mode = #tpu.pipeline_mode<synchronous>, transform_indices = @transform_6, window_bounds = array<i64: 9, 16, 64>}, {pipeline_mode = #tpu.pipeline_mode<synchronous>, transform_indices = @transform_7, window_bounds = array<i64: 1152, 128>}, {pipeline_mode = #tpu.pipeline_mode<synchronous>, transform_indices = @transform_8, window_bounds = array<i64: 1, 128>}, {pipeline_mode = #tpu.pipeline_mode<synchronous>, transform_indices = @transform_9, window_bounds = array<i64: 9, 4, 16>}, {pipeline_mode = #tpu.pipeline_mode<synchronous>, transform_indices = @transform_10, window_bounds = array<i64: 1152, 128>}, {pipeline_mode = #tpu.pipeline_mode<synchronous>, transform_indices = @transform_11, window_bounds = array<i64: 1, 128>}, {pipeline_mode = #tpu.pipeline_mode<synchronous>, transform_indices = @transform_12, window_bounds = array<i64: 512, 256>}, {pipeline_mode = #tpu.pipeline_mode<synchronous>, transform_indices = @transform_13, window_bounds = array<i64: 1, 256>}, {pipeline_mode = #tpu.pipeline_mode<synchronous>, transform_indices = @transform_14, window_bounds = array<i64: 256, 256>}, {pipeline_mode = #tpu.pipeline_mode<synchronous>, transform_indices = @transform_15, window_bounds = array<i64: 1, 256>}, {pipeline_mode = #tpu.pipeline_mode<synchronous>, transform_indices = @transform_16, window_bounds = array<i64: 256, 16>}, {pipeline_mode = #tpu.pipeline_mode<synchronous>, transform_indices = @transform_17, window_bounds = array<i64: 1, 16>}, {transform_indices = @transform_18, window_bounds = array<i64: 1, 1, 16>}]} {
    %c0 = arith.constant 0 : index
    %c0_0 = arith.constant 0 : index
    %0 = vector.load %arg1[%c0, %c0_0] : memref<256x36xbf16, #tpu.memory_space<vmem>>, vector<256x36xbf16>
    %c0_1 = arith.constant 0 : index
    %c0_2 = arith.constant 0 : index
    %1 = vector.load %arg2[%c0_1, %c0_2] : memref<36x128xbf16, #tpu.memory_space<vmem>>, vector<36x128xbf16>
    %cst = arith.constant dense<0.000000e+00> : vector<256x128xf32>
    %2 = tpu.matmul %0, %1, %cst {dimension_numbers = #tpu.dot_dimension_numbers<[1], [0], [0], [1], [0, 0, 1, 1], [], []>} : vector<256x36xbf16>, vector<36x128xbf16>, vector<256x128xf32> -> vector<256x128xf32>
    %c0_3 = arith.constant 0 : index
    %c0_4 = arith.constant 0 : index
    %3 = vector.load %arg3[%c0_3, %c0_4] : memref<1x128xf32, #tpu.memory_space<vmem>>, vector<1x128xf32>
    %4 = vector.broadcast %3 : vector<1x128xf32> to vector<256x128xf32>
    %5 = arith.addf %2, %4 : vector<256x128xf32>
    %cst_5 = arith.constant 0.000000e+00 : f32
    %6 = vector.broadcast %cst_5 : f32 to vector<256x128xf32>
    %7 = arith.maximumf %5, %6 : vector<256x128xf32>
    %8 = arith.truncf %7 : vector<256x128xf32> to vector<256x128xbf16>
    %c0_6 = arith.constant 0 : index
    %c0_7 = arith.constant 0 : index
    %c0_8 = arith.constant 0 : index
    %9 = vector.load %arg4[%c0_6, %c0_7, %c0_8] : memref<9x64x256xbf16, #tpu.memory_space<vmem>>, vector<1x64x256xbf16>
    %10 = vector.shape_cast %9 : vector<1x64x256xbf16> to vector<64x256xbf16>
    %cst_9 = arith.constant dense<0.000000e+00> : vector<64x128xf32>
    %11 = tpu.matmul %10, %8, %cst_9 {dimension_numbers = #tpu.dot_dimension_numbers<[1], [0], [0], [1], [0, 0, 1, 1], [], []>} : vector<64x256xbf16>, vector<256x128xbf16>, vector<64x128xf32> -> vector<64x128xf32>
    %12 = arith.truncf %11 : vector<64x128xf32> to vector<64x128xbf16>
    %c1 = arith.constant 1 : index
    %c0_10 = arith.constant 0 : index
    %c0_11 = arith.constant 0 : index
    %13 = vector.load %arg4[%c1, %c0_10, %c0_11] : memref<9x64x256xbf16, #tpu.memory_space<vmem>>, vector<1x64x256xbf16>
    %14 = vector.shape_cast %13 : vector<1x64x256xbf16> to vector<64x256xbf16>
    %cst_12 = arith.constant dense<0.000000e+00> : vector<64x128xf32>
    %15 = tpu.matmul %14, %8, %cst_12 {dimension_numbers = #tpu.dot_dimension_numbers<[1], [0], [0], [1], [0, 0, 1, 1], [], []>} : vector<64x256xbf16>, vector<256x128xbf16>, vector<64x128xf32> -> vector<64x128xf32>
    %16 = arith.truncf %15 : vector<64x128xf32> to vector<64x128xbf16>
    %c2 = arith.constant 2 : index
    %c0_13 = arith.constant 0 : index
    %c0_14 = arith.constant 0 : index
    %17 = vector.load %arg4[%c2, %c0_13, %c0_14] : memref<9x64x256xbf16, #tpu.memory_space<vmem>>, vector<1x64x256xbf16>
    %18 = vector.shape_cast %17 : vector<1x64x256xbf16> to vector<64x256xbf16>
    %cst_15 = arith.constant dense<0.000000e+00> : vector<64x128xf32>
    %19 = tpu.matmul %18, %8, %cst_15 {dimension_numbers = #tpu.dot_dimension_numbers<[1], [0], [0], [1], [0, 0, 1, 1], [], []>} : vector<64x256xbf16>, vector<256x128xbf16>, vector<64x128xf32> -> vector<64x128xf32>
    %20 = arith.truncf %19 : vector<64x128xf32> to vector<64x128xbf16>
    %c3 = arith.constant 3 : index
    %c0_16 = arith.constant 0 : index
    %c0_17 = arith.constant 0 : index
    %21 = vector.load %arg4[%c3, %c0_16, %c0_17] : memref<9x64x256xbf16, #tpu.memory_space<vmem>>, vector<1x64x256xbf16>
    %22 = vector.shape_cast %21 : vector<1x64x256xbf16> to vector<64x256xbf16>
    %cst_18 = arith.constant dense<0.000000e+00> : vector<64x128xf32>
    %23 = tpu.matmul %22, %8, %cst_18 {dimension_numbers = #tpu.dot_dimension_numbers<[1], [0], [0], [1], [0, 0, 1, 1], [], []>} : vector<64x256xbf16>, vector<256x128xbf16>, vector<64x128xf32> -> vector<64x128xf32>
    %24 = arith.truncf %23 : vector<64x128xf32> to vector<64x128xbf16>
    %c4 = arith.constant 4 : index
    %c0_19 = arith.constant 0 : index
    %c0_20 = arith.constant 0 : index
    %25 = vector.load %arg4[%c4, %c0_19, %c0_20] : memref<9x64x256xbf16, #tpu.memory_space<vmem>>, vector<1x64x256xbf16>
    %26 = vector.shape_cast %25 : vector<1x64x256xbf16> to vector<64x256xbf16>
    %cst_21 = arith.constant dense<0.000000e+00> : vector<64x128xf32>
    %27 = tpu.matmul %26, %8, %cst_21 {dimension_numbers = #tpu.dot_dimension_numbers<[1], [0], [0], [1], [0, 0, 1, 1], [], []>} : vector<64x256xbf16>, vector<256x128xbf16>, vector<64x128xf32> -> vector<64x128xf32>
    %28 = arith.truncf %27 : vector<64x128xf32> to vector<64x128xbf16>
    %c5 = arith.constant 5 : index
    %c0_22 = arith.constant 0 : index
    %c0_23 = arith.constant 0 : index
    %29 = vector.load %arg4[%c5, %c0_22, %c0_23] : memref<9x64x256xbf16, #tpu.memory_space<vmem>>, vector<1x64x256xbf16>
    %30 = vector.shape_cast %29 : vector<1x64x256xbf16> to vector<64x256xbf16>
    %cst_24 = arith.constant dense<0.000000e+00> : vector<64x128xf32>
    %31 = tpu.matmul %30, %8, %cst_24 {dimension_numbers = #tpu.dot_dimension_numbers<[1], [0], [0], [1], [0, 0, 1, 1], [], []>} : vector<64x256xbf16>, vector<256x128xbf16>, vector<64x128xf32> -> vector<64x128xf32>
    %32 = arith.truncf %31 : vector<64x128xf32> to vector<64x128xbf16>
    %c6 = arith.constant 6 : index
    %c0_25 = arith.constant 0 : index
    %c0_26 = arith.constant 0 : index
    %33 = vector.load %arg4[%c6, %c0_25, %c0_26] : memref<9x64x256xbf16, #tpu.memory_space<vmem>>, vector<1x64x256xbf16>
    %34 = vector.shape_cast %33 : vector<1x64x256xbf16> to vector<64x256xbf16>
    %cst_27 = arith.constant dense<0.000000e+00> : vector<64x128xf32>
    %35 = tpu.matmul %34, %8, %cst_27 {dimension_numbers = #tpu.dot_dimension_numbers<[1], [0], [0], [1], [0, 0, 1, 1], [], []>} : vector<64x256xbf16>, vector<256x128xbf16>, vector<64x128xf32> -> vector<64x128xf32>
    %36 = arith.truncf %35 : vector<64x128xf32> to vector<64x128xbf16>
    %c7 = arith.constant 7 : index
    %c0_28 = arith.constant 0 : index
    %c0_29 = arith.constant 0 : index
    %37 = vector.load %arg4[%c7, %c0_28, %c0_29] : memref<9x64x256xbf16, #tpu.memory_space<vmem>>, vector<1x64x256xbf16>
    %38 = vector.shape_cast %37 : vector<1x64x256xbf16> to vector<64x256xbf16>
    %cst_30 = arith.constant dense<0.000000e+00> : vector<64x128xf32>
    %39 = tpu.matmul %38, %8, %cst_30 {dimension_numbers = #tpu.dot_dimension_numbers<[1], [0], [0], [1], [0, 0, 1, 1], [], []>} : vector<64x256xbf16>, vector<256x128xbf16>, vector<64x128xf32> -> vector<64x128xf32>
    %40 = arith.truncf %39 : vector<64x128xf32> to vector<64x128xbf16>
    %c8 = arith.constant 8 : index
    %c0_31 = arith.constant 0 : index
    %c0_32 = arith.constant 0 : index
    %41 = vector.load %arg4[%c8, %c0_31, %c0_32] : memref<9x64x256xbf16, #tpu.memory_space<vmem>>, vector<1x64x256xbf16>
    %42 = vector.shape_cast %41 : vector<1x64x256xbf16> to vector<64x256xbf16>
    %cst_33 = arith.constant dense<0.000000e+00> : vector<64x128xf32>
    %43 = tpu.matmul %42, %8, %cst_33 {dimension_numbers = #tpu.dot_dimension_numbers<[1], [0], [0], [1], [0, 0, 1, 1], [], []>} : vector<64x256xbf16>, vector<256x128xbf16>, vector<64x128xf32> -> vector<64x128xf32>
    %44 = arith.truncf %43 : vector<64x128xf32> to vector<64x128xbf16>
    %45 = tpu.concatenate %12, %16, %20, %24, %28, %32, %36, %40, %44 in 1 : vector<64x128xbf16>, vector<64x128xbf16>, vector<64x128xbf16>, vector<64x128xbf16>, vector<64x128xbf16>, vector<64x128xbf16>, vector<64x128xbf16>, vector<64x128xbf16>, vector<64x128xbf16> -> vector<64x1152xbf16>
    %c0_34 = arith.constant 0 : index
    %c0_35 = arith.constant 0 : index
    %46 = vector.load %arg5[%c0_34, %c0_35] : memref<1152x128xbf16, #tpu.memory_space<vmem>>, vector<1152x128xbf16>
    %cst_36 = arith.constant dense<0.000000e+00> : vector<64x128xf32>
    %47 = tpu.matmul %45, %46, %cst_36 {dimension_numbers = #tpu.dot_dimension_numbers<[1], [0], [0], [1], [0, 0, 1, 1], [], []>} : vector<64x1152xbf16>, vector<1152x128xbf16>, vector<64x128xf32> -> vector<64x128xf32>
    %c0_37 = arith.constant 0 : index
    %c0_38 = arith.constant 0 : index
    %48 = vector.load %arg6[%c0_37, %c0_38] : memref<1x128xf32, #tpu.memory_space<vmem>>, vector<1x128xf32>
    %49 = vector.broadcast %48 : vector<1x128xf32> to vector<64x128xf32>
    %50 = arith.addf %47, %49 : vector<64x128xf32>
    %cst_39 = arith.constant 0.000000e+00 : f32
    %51 = vector.broadcast %cst_39 : f32 to vector<64x128xf32>
    %52 = arith.maximumf %50, %51 : vector<64x128xf32>
    %53 = arith.truncf %52 : vector<64x128xf32> to vector<64x128xbf16>
    %c0_40 = arith.constant 0 : index
    %c0_41 = arith.constant 0 : index
    %c0_42 = arith.constant 0 : index
    %54 = vector.load %arg7[%c0_40, %c0_41, %c0_42] : memref<9x16x64xbf16, #tpu.memory_space<vmem>>, vector<1x16x64xbf16>
    %55 = vector.shape_cast %54 : vector<1x16x64xbf16> to vector<16x64xbf16>
    %cst_43 = arith.constant dense<0.000000e+00> : vector<16x128xf32>
    %56 = tpu.matmul %55, %53, %cst_43 {dimension_numbers = #tpu.dot_dimension_numbers<[1], [0], [0], [1], [0, 0, 1, 1], [], []>} : vector<16x64xbf16>, vector<64x128xbf16>, vector<16x128xf32> -> vector<16x128xf32>
    %57 = arith.truncf %56 : vector<16x128xf32> to vector<16x128xbf16>
    %c1_44 = arith.constant 1 : index
    %c0_45 = arith.constant 0 : index
    %c0_46 = arith.constant 0 : index
    %58 = vector.load %arg7[%c1_44, %c0_45, %c0_46] : memref<9x16x64xbf16, #tpu.memory_space<vmem>>, vector<1x16x64xbf16>
    %59 = vector.shape_cast %58 : vector<1x16x64xbf16> to vector<16x64xbf16>
    %cst_47 = arith.constant dense<0.000000e+00> : vector<16x128xf32>
    %60 = tpu.matmul %59, %53, %cst_47 {dimension_numbers = #tpu.dot_dimension_numbers<[1], [0], [0], [1], [0, 0, 1, 1], [], []>} : vector<16x64xbf16>, vector<64x128xbf16>, vector<16x128xf32> -> vector<16x128xf32>
    %61 = arith.truncf %60 : vector<16x128xf32> to vector<16x128xbf16>
    %c2_48 = arith.constant 2 : index
    %c0_49 = arith.constant 0 : index
    %c0_50 = arith.constant 0 : index
    %62 = vector.load %arg7[%c2_48, %c0_49, %c0_50] : memref<9x16x64xbf16, #tpu.memory_space<vmem>>, vector<1x16x64xbf16>
    %63 = vector.shape_cast %62 : vector<1x16x64xbf16> to vector<16x64xbf16>
    %cst_51 = arith.constant dense<0.000000e+00> : vector<16x128xf32>
    %64 = tpu.matmul %63, %53, %cst_51 {dimension_numbers = #tpu.dot_dimension_numbers<[1], [0], [0], [1], [0, 0, 1, 1], [], []>} : vector<16x64xbf16>, vector<64x128xbf16>, vector<16x128xf32> -> vector<16x128xf32>
    %65 = arith.truncf %64 : vector<16x128xf32> to vector<16x128xbf16>
    %c3_52 = arith.constant 3 : index
    %c0_53 = arith.constant 0 : index
    %c0_54 = arith.constant 0 : index
    %66 = vector.load %arg7[%c3_52, %c0_53, %c0_54] : memref<9x16x64xbf16, #tpu.memory_space<vmem>>, vector<1x16x64xbf16>
    %67 = vector.shape_cast %66 : vector<1x16x64xbf16> to vector<16x64xbf16>
    %cst_55 = arith.constant dense<0.000000e+00> : vector<16x128xf32>
    %68 = tpu.matmul %67, %53, %cst_55 {dimension_numbers = #tpu.dot_dimension_numbers<[1], [0], [0], [1], [0, 0, 1, 1], [], []>} : vector<16x64xbf16>, vector<64x128xbf16>, vector<16x128xf32> -> vector<16x128xf32>
    %69 = arith.truncf %68 : vector<16x128xf32> to vector<16x128xbf16>
    %c4_56 = arith.constant 4 : index
    %c0_57 = arith.constant 0 : index
    %c0_58 = arith.constant 0 : index
    %70 = vector.load %arg7[%c4_56, %c0_57, %c0_58] : memref<9x16x64xbf16, #tpu.memory_space<vmem>>, vector<1x16x64xbf16>
    %71 = vector.shape_cast %70 : vector<1x16x64xbf16> to vector<16x64xbf16>
    %cst_59 = arith.constant dense<0.000000e+00> : vector<16x128xf32>
    %72 = tpu.matmul %71, %53, %cst_59 {dimension_numbers = #tpu.dot_dimension_numbers<[1], [0], [0], [1], [0, 0, 1, 1], [], []>} : vector<16x64xbf16>, vector<64x128xbf16>, vector<16x128xf32> -> vector<16x128xf32>
    %73 = arith.truncf %72 : vector<16x128xf32> to vector<16x128xbf16>
    %c5_60 = arith.constant 5 : index
    %c0_61 = arith.constant 0 : index
    %c0_62 = arith.constant 0 : index
    %74 = vector.load %arg7[%c5_60, %c0_61, %c0_62] : memref<9x16x64xbf16, #tpu.memory_space<vmem>>, vector<1x16x64xbf16>
    %75 = vector.shape_cast %74 : vector<1x16x64xbf16> to vector<16x64xbf16>
    %cst_63 = arith.constant dense<0.000000e+00> : vector<16x128xf32>
    %76 = tpu.matmul %75, %53, %cst_63 {dimension_numbers = #tpu.dot_dimension_numbers<[1], [0], [0], [1], [0, 0, 1, 1], [], []>} : vector<16x64xbf16>, vector<64x128xbf16>, vector<16x128xf32> -> vector<16x128xf32>
    %77 = arith.truncf %76 : vector<16x128xf32> to vector<16x128xbf16>
    %c6_64 = arith.constant 6 : index
    %c0_65 = arith.constant 0 : index
    %c0_66 = arith.constant 0 : index
    %78 = vector.load %arg7[%c6_64, %c0_65, %c0_66] : memref<9x16x64xbf16, #tpu.memory_space<vmem>>, vector<1x16x64xbf16>
    %79 = vector.shape_cast %78 : vector<1x16x64xbf16> to vector<16x64xbf16>
    %cst_67 = arith.constant dense<0.000000e+00> : vector<16x128xf32>
    %80 = tpu.matmul %79, %53, %cst_67 {dimension_numbers = #tpu.dot_dimension_numbers<[1], [0], [0], [1], [0, 0, 1, 1], [], []>} : vector<16x64xbf16>, vector<64x128xbf16>, vector<16x128xf32> -> vector<16x128xf32>
    %81 = arith.truncf %80 : vector<16x128xf32> to vector<16x128xbf16>
    %c7_68 = arith.constant 7 : index
    %c0_69 = arith.constant 0 : index
    %c0_70 = arith.constant 0 : index
    %82 = vector.load %arg7[%c7_68, %c0_69, %c0_70] : memref<9x16x64xbf16, #tpu.memory_space<vmem>>, vector<1x16x64xbf16>
    %83 = vector.shape_cast %82 : vector<1x16x64xbf16> to vector<16x64xbf16>
    %cst_71 = arith.constant dense<0.000000e+00> : vector<16x128xf32>
    %84 = tpu.matmul %83, %53, %cst_71 {dimension_numbers = #tpu.dot_dimension_numbers<[1], [0], [0], [1], [0, 0, 1, 1], [], []>} : vector<16x64xbf16>, vector<64x128xbf16>, vector<16x128xf32> -> vector<16x128xf32>
    %85 = arith.truncf %84 : vector<16x128xf32> to vector<16x128xbf16>
    %c8_72 = arith.constant 8 : index
    %c0_73 = arith.constant 0 : index
    %c0_74 = arith.constant 0 : index
    %86 = vector.load %arg7[%c8_72, %c0_73, %c0_74] : memref<9x16x64xbf16, #tpu.memory_space<vmem>>, vector<1x16x64xbf16>
    %87 = vector.shape_cast %86 : vector<1x16x64xbf16> to vector<16x64xbf16>
    %cst_75 = arith.constant dense<0.000000e+00> : vector<16x128xf32>
    %88 = tpu.matmul %87, %53, %cst_75 {dimension_numbers = #tpu.dot_dimension_numbers<[1], [0], [0], [1], [0, 0, 1, 1], [], []>} : vector<16x64xbf16>, vector<64x128xbf16>, vector<16x128xf32> -> vector<16x128xf32>
    %89 = arith.truncf %88 : vector<16x128xf32> to vector<16x128xbf16>
    %90 = tpu.concatenate %57, %61, %65, %69, %73, %77, %81, %85, %89 in 1 : vector<16x128xbf16>, vector<16x128xbf16>, vector<16x128xbf16>, vector<16x128xbf16>, vector<16x128xbf16>, vector<16x128xbf16>, vector<16x128xbf16>, vector<16x128xbf16>, vector<16x128xbf16> -> vector<16x1152xbf16>
    %c0_76 = arith.constant 0 : index
    %c0_77 = arith.constant 0 : index
    %91 = vector.load %arg8[%c0_76, %c0_77] : memref<1152x128xbf16, #tpu.memory_space<vmem>>, vector<1152x128xbf16>
    %cst_78 = arith.constant dense<0.000000e+00> : vector<16x128xf32>
    %92 = tpu.matmul %90, %91, %cst_78 {dimension_numbers = #tpu.dot_dimension_numbers<[1], [0], [0], [1], [0, 0, 1, 1], [], []>} : vector<16x1152xbf16>, vector<1152x128xbf16>, vector<16x128xf32> -> vector<16x128xf32>
    %c0_79 = arith.constant 0 : index
    %c0_80 = arith.constant 0 : index
    %93 = vector.load %arg9[%c0_79, %c0_80] : memref<1x128xf32, #tpu.memory_space<vmem>>, vector<1x128xf32>
    %94 = vector.broadcast %93 : vector<1x128xf32> to vector<16x128xf32>
    %95 = arith.addf %92, %94 : vector<16x128xf32>
    %cst_81 = arith.constant 0.000000e+00 : f32
    %96 = vector.broadcast %cst_81 : f32 to vector<16x128xf32>
    %97 = arith.maximumf %95, %96 : vector<16x128xf32>
    %98 = arith.truncf %97 : vector<16x128xf32> to vector<16x128xbf16>
    %c0_82 = arith.constant 0 : index
    %c0_83 = arith.constant 0 : index
    %c0_84 = arith.constant 0 : index
    %99 = vector.load %arg10[%c0_82, %c0_83, %c0_84] : memref<9x4x16xbf16, #tpu.memory_space<vmem>>, vector<1x4x16xbf16>
    %100 = vector.shape_cast %99 : vector<1x4x16xbf16> to vector<4x16xbf16>
    %cst_85 = arith.constant dense<0.000000e+00> : vector<4x128xf32>
    %101 = tpu.matmul %100, %98, %cst_85 {dimension_numbers = #tpu.dot_dimension_numbers<[1], [0], [0], [1], [0, 0, 1, 1], [], []>} : vector<4x16xbf16>, vector<16x128xbf16>, vector<4x128xf32> -> vector<4x128xf32>
    %102 = arith.truncf %101 : vector<4x128xf32> to vector<4x128xbf16>
    %c1_86 = arith.constant 1 : index
    %c0_87 = arith.constant 0 : index
    %c0_88 = arith.constant 0 : index
    %103 = vector.load %arg10[%c1_86, %c0_87, %c0_88] : memref<9x4x16xbf16, #tpu.memory_space<vmem>>, vector<1x4x16xbf16>
    %104 = vector.shape_cast %103 : vector<1x4x16xbf16> to vector<4x16xbf16>
    %cst_89 = arith.constant dense<0.000000e+00> : vector<4x128xf32>
    %105 = tpu.matmul %104, %98, %cst_89 {dimension_numbers = #tpu.dot_dimension_numbers<[1], [0], [0], [1], [0, 0, 1, 1], [], []>} : vector<4x16xbf16>, vector<16x128xbf16>, vector<4x128xf32> -> vector<4x128xf32>
    %106 = arith.truncf %105 : vector<4x128xf32> to vector<4x128xbf16>
    %c2_90 = arith.constant 2 : index
    %c0_91 = arith.constant 0 : index
    %c0_92 = arith.constant 0 : index
    %107 = vector.load %arg10[%c2_90, %c0_91, %c0_92] : memref<9x4x16xbf16, #tpu.memory_space<vmem>>, vector<1x4x16xbf16>
    %108 = vector.shape_cast %107 : vector<1x4x16xbf16> to vector<4x16xbf16>
    %cst_93 = arith.constant dense<0.000000e+00> : vector<4x128xf32>
    %109 = tpu.matmul %108, %98, %cst_93 {dimension_numbers = #tpu.dot_dimension_numbers<[1], [0], [0], [1], [0, 0, 1, 1], [], []>} : vector<4x16xbf16>, vector<16x128xbf16>, vector<4x128xf32> -> vector<4x128xf32>
    %110 = arith.truncf %109 : vector<4x128xf32> to vector<4x128xbf16>
    %c3_94 = arith.constant 3 : index
    %c0_95 = arith.constant 0 : index
    %c0_96 = arith.constant 0 : index
    %111 = vector.load %arg10[%c3_94, %c0_95, %c0_96] : memref<9x4x16xbf16, #tpu.memory_space<vmem>>, vector<1x4x16xbf16>
    %112 = vector.shape_cast %111 : vector<1x4x16xbf16> to vector<4x16xbf16>
    %cst_97 = arith.constant dense<0.000000e+00> : vector<4x128xf32>
    %113 = tpu.matmul %112, %98, %cst_97 {dimension_numbers = #tpu.dot_dimension_numbers<[1], [0], [0], [1], [0, 0, 1, 1], [], []>} : vector<4x16xbf16>, vector<16x128xbf16>, vector<4x128xf32> -> vector<4x128xf32>
    %114 = arith.truncf %113 : vector<4x128xf32> to vector<4x128xbf16>
    %c4_98 = arith.constant 4 : index
    %c0_99 = arith.constant 0 : index
    %c0_100 = arith.constant 0 : index
    %115 = vector.load %arg10[%c4_98, %c0_99, %c0_100] : memref<9x4x16xbf16, #tpu.memory_space<vmem>>, vector<1x4x16xbf16>
    %116 = vector.shape_cast %115 : vector<1x4x16xbf16> to vector<4x16xbf16>
    %cst_101 = arith.constant dense<0.000000e+00> : vector<4x128xf32>
    %117 = tpu.matmul %116, %98, %cst_101 {dimension_numbers = #tpu.dot_dimension_numbers<[1], [0], [0], [1], [0, 0, 1, 1], [], []>} : vector<4x16xbf16>, vector<16x128xbf16>, vector<4x128xf32> -> vector<4x128xf32>
    %118 = arith.truncf %117 : vector<4x128xf32> to vector<4x128xbf16>
    %c5_102 = arith.constant 5 : index
    %c0_103 = arith.constant 0 : index
    %c0_104 = arith.constant 0 : index
    %119 = vector.load %arg10[%c5_102, %c0_103, %c0_104] : memref<9x4x16xbf16, #tpu.memory_space<vmem>>, vector<1x4x16xbf16>
    %120 = vector.shape_cast %119 : vector<1x4x16xbf16> to vector<4x16xbf16>
    %cst_105 = arith.constant dense<0.000000e+00> : vector<4x128xf32>
    %121 = tpu.matmul %120, %98, %cst_105 {dimension_numbers = #tpu.dot_dimension_numbers<[1], [0], [0], [1], [0, 0, 1, 1], [], []>} : vector<4x16xbf16>, vector<16x128xbf16>, vector<4x128xf32> -> vector<4x128xf32>
    %122 = arith.truncf %121 : vector<4x128xf32> to vector<4x128xbf16>
    %c6_106 = arith.constant 6 : index
    %c0_107 = arith.constant 0 : index
    %c0_108 = arith.constant 0 : index
    %123 = vector.load %arg10[%c6_106, %c0_107, %c0_108] : memref<9x4x16xbf16, #tpu.memory_space<vmem>>, vector<1x4x16xbf16>
    %124 = vector.shape_cast %123 : vector<1x4x16xbf16> to vector<4x16xbf16>
    %cst_109 = arith.constant dense<0.000000e+00> : vector<4x128xf32>
    %125 = tpu.matmul %124, %98, %cst_109 {dimension_numbers = #tpu.dot_dimension_numbers<[1], [0], [0], [1], [0, 0, 1, 1], [], []>} : vector<4x16xbf16>, vector<16x128xbf16>, vector<4x128xf32> -> vector<4x128xf32>
    %126 = arith.truncf %125 : vector<4x128xf32> to vector<4x128xbf16>
    %c7_110 = arith.constant 7 : index
    %c0_111 = arith.constant 0 : index
    %c0_112 = arith.constant 0 : index
    %127 = vector.load %arg10[%c7_110, %c0_111, %c0_112] : memref<9x4x16xbf16, #tpu.memory_space<vmem>>, vector<1x4x16xbf16>
    %128 = vector.shape_cast %127 : vector<1x4x16xbf16> to vector<4x16xbf16>
    %cst_113 = arith.constant dense<0.000000e+00> : vector<4x128xf32>
    %129 = tpu.matmul %128, %98, %cst_113 {dimension_numbers = #tpu.dot_dimension_numbers<[1], [0], [0], [1], [0, 0, 1, 1], [], []>} : vector<4x16xbf16>, vector<16x128xbf16>, vector<4x128xf32> -> vector<4x128xf32>
    %130 = arith.truncf %129 : vector<4x128xf32> to vector<4x128xbf16>
    %c8_114 = arith.constant 8 : index
    %c0_115 = arith.constant 0 : index
    %c0_116 = arith.constant 0 : index
    %131 = vector.load %arg10[%c8_114, %c0_115, %c0_116] : memref<9x4x16xbf16, #tpu.memory_space<vmem>>, vector<1x4x16xbf16>
    %132 = vector.shape_cast %131 : vector<1x4x16xbf16> to vector<4x16xbf16>
    %cst_117 = arith.constant dense<0.000000e+00> : vector<4x128xf32>
    %133 = tpu.matmul %132, %98, %cst_117 {dimension_numbers = #tpu.dot_dimension_numbers<[1], [0], [0], [1], [0, 0, 1, 1], [], []>} : vector<4x16xbf16>, vector<16x128xbf16>, vector<4x128xf32> -> vector<4x128xf32>
    %134 = arith.truncf %133 : vector<4x128xf32> to vector<4x128xbf16>
    %135 = tpu.concatenate %102, %106, %110, %114, %118, %122, %126, %130, %134 in 1 : vector<4x128xbf16>, vector<4x128xbf16>, vector<4x128xbf16>, vector<4x128xbf16>, vector<4x128xbf16>, vector<4x128xbf16>, vector<4x128xbf16>, vector<4x128xbf16>, vector<4x128xbf16> -> vector<4x1152xbf16>
    %c0_118 = arith.constant 0 : index
    %c0_119 = arith.constant 0 : index
    %136 = vector.load %arg11[%c0_118, %c0_119] : memref<1152x128xbf16, #tpu.memory_space<vmem>>, vector<1152x128xbf16>
    %cst_120 = arith.constant dense<0.000000e+00> : vector<4x128xf32>
    %137 = tpu.matmul %135, %136, %cst_120 {dimension_numbers = #tpu.dot_dimension_numbers<[1], [0], [0], [1], [0, 0, 1, 1], [], []>} : vector<4x1152xbf16>, vector<1152x128xbf16>, vector<4x128xf32> -> vector<4x128xf32>
    %c0_121 = arith.constant 0 : index
    %c0_122 = arith.constant 0 : index
    %138 = vector.load %arg12[%c0_121, %c0_122] : memref<1x128xf32, #tpu.memory_space<vmem>>, vector<1x128xf32>
    %139 = vector.broadcast %138 : vector<1x128xf32> to vector<4x128xf32>
    %140 = arith.addf %137, %139 : vector<4x128xf32>
    %cst_123 = arith.constant 0.000000e+00 : f32
    %141 = vector.broadcast %cst_123 : f32 to vector<4x128xf32>
    %142 = arith.maximumf %140, %141 : vector<4x128xf32>
    %143 = vector.extract_strided_slice %142 {offsets = [0, 0], sizes = [1, 128], strides = [1, 1]} : vector<4x128xf32> to vector<1x128xf32>
    %144 = vector.extract_strided_slice %142 {offsets = [1, 0], sizes = [1, 128], strides = [1, 1]} : vector<4x128xf32> to vector<1x128xf32>
    %145 = vector.extract_strided_slice %142 {offsets = [2, 0], sizes = [1, 128], strides = [1, 1]} : vector<4x128xf32> to vector<1x128xf32>
    %146 = vector.extract_strided_slice %142 {offsets = [3, 0], sizes = [1, 128], strides = [1, 1]} : vector<4x128xf32> to vector<1x128xf32>
    %147 = tpu.concatenate %143, %144, %145, %146 in 1 : vector<1x128xf32>, vector<1x128xf32>, vector<1x128xf32>, vector<1x128xf32> -> vector<1x512xf32>
    %148 = arith.truncf %147 : vector<1x512xf32> to vector<1x512xbf16>
    %c0_124 = arith.constant 0 : index
    %c0_125 = arith.constant 0 : index
    %149 = vector.load %arg13[%c0_124, %c0_125] : memref<512x256xbf16, #tpu.memory_space<vmem>>, vector<512x256xbf16>
    %cst_126 = arith.constant dense<0.000000e+00> : vector<1x256xf32>
    %150 = tpu.matmul %148, %149, %cst_126 {dimension_numbers = #tpu.dot_dimension_numbers<[1], [0], [0], [1], [0, 0, 1, 1], [], []>} : vector<1x512xbf16>, vector<512x256xbf16>, vector<1x256xf32> -> vector<1x256xf32>
    %c0_127 = arith.constant 0 : index
    %c0_128 = arith.constant 0 : index
    %151 = vector.load %arg14[%c0_127, %c0_128] : memref<1x256xf32, #tpu.memory_space<vmem>>, vector<1x256xf32>
    %152 = arith.addf %150, %151 : vector<1x256xf32>
    %cst_129 = arith.constant 0.000000e+00 : f32
    %153 = vector.broadcast %cst_129 : f32 to vector<1x256xf32>
    %154 = arith.maximumf %152, %153 : vector<1x256xf32>
    %155 = arith.truncf %154 : vector<1x256xf32> to vector<1x256xbf16>
    %c0_130 = arith.constant 0 : index
    %c0_131 = arith.constant 0 : index
    %156 = vector.load %arg15[%c0_130, %c0_131] : memref<256x256xbf16, #tpu.memory_space<vmem>>, vector<256x256xbf16>
    %cst_132 = arith.constant dense<0.000000e+00> : vector<1x256xf32>
    %157 = tpu.matmul %155, %156, %cst_132 {dimension_numbers = #tpu.dot_dimension_numbers<[1], [0], [0], [1], [0, 0, 1, 1], [], []>} : vector<1x256xbf16>, vector<256x256xbf16>, vector<1x256xf32> -> vector<1x256xf32>
    %c0_133 = arith.constant 0 : index
    %c0_134 = arith.constant 0 : index
    %158 = vector.load %arg16[%c0_133, %c0_134] : memref<1x256xf32, #tpu.memory_space<vmem>>, vector<1x256xf32>
    %159 = arith.addf %157, %158 : vector<1x256xf32>
    %cst_135 = arith.constant 0.000000e+00 : f32
    %160 = vector.broadcast %cst_135 : f32 to vector<1x256xf32>
    %161 = arith.maximumf %159, %160 : vector<1x256xf32>
    %162 = arith.truncf %161 : vector<1x256xf32> to vector<1x256xbf16>
    %c0_136 = arith.constant 0 : index
    %c0_137 = arith.constant 0 : index
    %163 = vector.load %arg17[%c0_136, %c0_137] : memref<256x16xbf16, #tpu.memory_space<vmem>>, vector<256x16xbf16>
    %cst_138 = arith.constant dense<0.000000e+00> : vector<1x16xf32>
    %164 = tpu.matmul %162, %163, %cst_138 {dimension_numbers = #tpu.dot_dimension_numbers<[1], [0], [0], [1], [0, 0, 1, 1], [], []>} : vector<1x256xbf16>, vector<256x16xbf16>, vector<1x16xf32> -> vector<1x16xf32>
    %c0_139 = arith.constant 0 : index
    %c0_140 = arith.constant 0 : index
    %165 = vector.load %arg18[%c0_139, %c0_140] : memref<1x16xf32, #tpu.memory_space<vmem>>, vector<1x16xf32>
    %166 = arith.addf %164, %165 : vector<1x16xf32>
    %c0_141 = arith.constant 0 : index
    %c0_142 = arith.constant 0 : index
    %c0_143 = arith.constant 0 : index
    %167 = vector.load %arg19[%c0_141, %c0_142, %c0_143] : memref<1x1x16xf32, #tpu.memory_space<vmem>>, vector<1x1x16xf32>
    %168 = vector.shape_cast %167 : vector<1x1x16xf32> to vector<1x16xf32>
    %169 = vector.shape_cast %166 : vector<1x16xf32> to vector<1x1x16xf32>
    tpu.vector_store %arg19[%c0_141, %c0_142, %c0_143], %169 {strides = array<i32>} : memref<1x1x16xf32, #tpu.memory_space<vmem>>, vector<1x1x16xf32>,
    return
  }
  func.func @transform_0(%arg0: i32) -> (i32, i32) {
    %c0_i32 = arith.constant 0 : i32
    %c0_i32_0 = arith.constant 0 : i32
    return %arg0, %c0_i32 : i32, i32
  }
  func.func @transform_1(%arg0: i32) -> (i32, i32) {
    %c0_i32 = arith.constant 0 : i32
    %c0_i32_0 = arith.constant 0 : i32
    %c0_i32_1 = arith.constant 0 : i32
    return %c0_i32, %c0_i32_0 : i32, i32
  }
  func.func @transform_2(%arg0: i32) -> (i32, i32) {
    %c0_i32 = arith.constant 0 : i32
    %c0_i32_0 = arith.constant 0 : i32
    %c0_i32_1 = arith.constant 0 : i32
    return %c0_i32, %c0_i32_0 : i32, i32
  }
  func.func @transform_3(%arg0: i32) -> (i32, i32, i32) {
    %c0_i32 = arith.constant 0 : i32
    %c0_i32_0 = arith.constant 0 : i32
    %c0_i32_1 = arith.constant 0 : i32
    %c0_i32_2 = arith.constant 0 : i32
    return %c0_i32, %c0_i32_0, %c0_i32_1 : i32, i32, i32
  }
  func.func @transform_4(%arg0: i32) -> (i32, i32) {
    %c0_i32 = arith.constant 0 : i32
    %c0_i32_0 = arith.constant 0 : i32
    %c0_i32_1 = arith.constant 0 : i32
    return %c0_i32, %c0_i32_0 : i32, i32
  }
  func.func @transform_5(%arg0: i32) -> (i32, i32) {
    %c0_i32 = arith.constant 0 : i32
    %c0_i32_0 = arith.constant 0 : i32
    %c0_i32_1 = arith.constant 0 : i32
    return %c0_i32, %c0_i32_0 : i32, i32
  }
  func.func @transform_6(%arg0: i32) -> (i32, i32, i32) {
    %c0_i32 = arith.constant 0 : i32
    %c0_i32_0 = arith.constant 0 : i32
    %c0_i32_1 = arith.constant 0 : i32
    %c0_i32_2 = arith.constant 0 : i32
    return %c0_i32, %c0_i32_0, %c0_i32_1 : i32, i32, i32
  }
  func.func @transform_7(%arg0: i32) -> (i32, i32) {
    %c0_i32 = arith.constant 0 : i32
    %c0_i32_0 = arith.constant 0 : i32
    %c0_i32_1 = arith.constant 0 : i32
    return %c0_i32, %c0_i32_0 : i32, i32
  }
  func.func @transform_8(%arg0: i32) -> (i32, i32) {
    %c0_i32 = arith.constant 0 : i32
    %c0_i32_0 = arith.constant 0 : i32
    %c0_i32_1 = arith.constant 0 : i32
    return %c0_i32, %c0_i32_0 : i32, i32
  }
  func.func @transform_9(%arg0: i32) -> (i32, i32, i32) {
    %c0_i32 = arith.constant 0 : i32
    %c0_i32_0 = arith.constant 0 : i32
    %c0_i32_1 = arith.constant 0 : i32
    %c0_i32_2 = arith.constant 0 : i32
    return %c0_i32, %c0_i32_0, %c0_i32_1 : i32, i32, i32
  }
  func.func @transform_10(%arg0: i32) -> (i32, i32) {
    %c0_i32 = arith.constant 0 : i32
    %c0_i32_0 = arith.constant 0 : i32
    %c0_i32_1 = arith.constant 0 : i32
    return %c0_i32, %c0_i32_0 : i32, i32
  }
  func.func @transform_11(%arg0: i32) -> (i32, i32) {
    %c0_i32 = arith.constant 0 : i32
    %c0_i32_0 = arith.constant 0 : i32
    %c0_i32_1 = arith.constant 0 : i32
    return %c0_i32, %c0_i32_0 : i32, i32
  }
  func.func @transform_12(%arg0: i32) -> (i32, i32) {
    %c0_i32 = arith.constant 0 : i32
    %c0_i32_0 = arith.constant 0 : i32
    %c0_i32_1 = arith.constant 0 : i32
    return %c0_i32, %c0_i32_0 : i32, i32
  }
  func.func @transform_13(%arg0: i32) -> (i32, i32) {
    %c0_i32 = arith.constant 0 : i32
    %c0_i32_0 = arith.constant 0 : i32
    %c0_i32_1 = arith.constant 0 : i32
    return %c0_i32, %c0_i32_0 : i32, i32
  }
  func.func @transform_14(%arg0: i32) -> (i32, i32) {
    %c0_i32 = arith.constant 0 : i32
    %c0_i32_0 = arith.constant 0 : i32
    %c0_i32_1 = arith.constant 0 : i32
    return %c0_i32, %c0_i32_0 : i32, i32
  }
  func.func @transform_15(%arg0: i32) -> (i32, i32) {
    %c0_i32 = arith.constant 0 : i32
    %c0_i32_0 = arith.constant 0 : i32
    %c0_i32_1 = arith.constant 0 : i32
    return %c0_i32, %c0_i32_0 : i32, i32
  }
  func.func @transform_16(%arg0: i32) -> (i32, i32) {
    %c0_i32 = arith.constant 0 : i32
    %c0_i32_0 = arith.constant 0 : i32
    %c0_i32_1 = arith.constant 0 : i32
    return %c0_i32, %c0_i32_0 : i32, i32
  }
  func.func @transform_17(%arg0: i32) -> (i32, i32) {
    %c0_i32 = arith.constant 0 : i32
    %c0_i32_0 = arith.constant 0 : i32
    %c0_i32_1 = arith.constant 0 : i32
    return %c0_i32, %c0_i32_0 : i32, i32
  }
  func.func @transform_18(%arg0: i32) -> (i32, i32, i32) {
    %c0_i32 = arith.constant 0 : i32
    %c0_i32_0 = arith.constant 0 : i32
    %c0_i32_1 = arith.constant 0 : i32
    return %arg0, %c0_i32, %c0_i32_0 : i32, i32, i32
  }
}

</mosaic_0001>

<bundles_post_ra>
// kernel: policy_network_forward.1
= control target key start
LH: loop header
LB: loop body
LE: loop exit
PB: predicated region body
PF: predicated region fallthrough
CT: control target
= control target key end

     0   :  { %s8227_s27 = smov 0   ;;  %s10770_s0 = inlined_call_operand.vmem [shape: bf16[512,36], index: 0, kind: input, shape index: {}]   ;;  %s10771_s1 = inlined_call_operand.vmem [shape: bf16[36,128], index: 1, kind: input, shape index: {}]   ;;  %s10772_s2 = inlined_call_operand.vmem [shape: f32[1,128], index: 2, kind: input, shape index: {}]   ;;  %s10773_s3 = inlined_call_operand.vmem [shape: bf16[9,64,256], index: 3, kind: input, shape index: {}]   ;;  %s10774_s4 = inlined_call_operand.vmem [shape: bf16[1152,128], index: 4, kind: input, shape index: {}]   ;;  %s10775_s5 = inlined_call_operand.vmem [shape: f32[1,128], index: 5, kind: input, shape index: {}]   ;;  %s10776_s6 = inlined_call_operand.vmem [shape: bf16[9,16,64], index: 6, kind: input, shape index: {}]   ;;  %s10777_s7 = inlined_call_operand.vmem [shape: bf16[1152,128], index: 7, kind: input, shape index: {}]   ;;  %s10778_s8 = inlined_call_operand.vmem [shape: f32[1,128], index: 8, kind: input, shape index: {}]   ;;  %s10779_s9 = inlined_call_operand.vmem [shape: bf16[9,4,16], index: 9, kind: input, shape index: {}]   ;;  %s10780_s10 = inlined_call_operand.vmem [shape: bf16[1152,128], index: 10, kind: input, shape index: {}]   ;;  %s10781_s11 = inlined_call_operand.vmem [shape: f32[1,128], index: 11, kind: input, shape index: {}]   ;;  %s10782_s12 = inlined_call_operand.vmem [shape: bf16[512,256], index: 12, kind: input, shape index: {}]   ;;  %s10783_s13 = inlined_call_operand.vmem [shape: f32[1,256], index: 13, kind: input, shape index: {}]   ;;  %s10784_s14 = inlined_call_operand.vmem [shape: bf16[256,256], index: 14, kind: input, shape index: {}]   ;;  %s10785_s15 = inlined_call_operand.vmem [shape: f32[1,256], index: 15, kind: input, shape index: {}]   ;;  %s10786_s16 = inlined_call_operand.vmem [shape: bf16[256,16], index: 16, kind: input, shape index: {}]   ;;  %s10787_s17 = inlined_call_operand.vmem [shape: f32[1,16], index: 17, kind: input, shape index: {}]   ;;  %s10788_s18 = inlined_call_operand.vmem [shape: f32[2,1,16], index: 18, kind: output, shape index: {}]  }
   0x1   :  { %10790 = sst [smem:[#allocation2_spill]] %s10770_s0 }
   0x2   :  { %10791 = sst [smem:[#allocation3_spill]] %s10771_s1 }
   0x3   :  { %10792 = sst [smem:[#allocation4_spill]] %s10772_s2 }
   0x4 LB: > { %s8233_s28 = sadd.s32 4294967295, %s8130_s27   ;;  %p5850_p0 = scmp.ge.s32.totalorder %s8130_s27, 1  ;;  %s8130_s27 = sphi %s8227_s27, %s28_s27  }
   0x5   : > { %p513_p1 = scmp.lt.s32.totalorder %s8130_s27, 3 }
   0x7   : > { %p514_p2 = pnand %p5850_p0, %p513_p1 }
   0x8   : > { %s10793_s0 = sld [smem:[#allocation3_spill]] (!%p514_p2)  ;;  %s5851_s19 = sshll.u32 (!%p514_p2), %s8233_s28, 5 }
   0x9   : > { %517 = sbr.rel (%p514_p2) target bundleno = 2198 (0x896), region = 92  ;;  %p566_p3 = scmp.lt.s32.totalorder (!%p514_p2), %s5851_s19, 63 }
   0xa   : > { %s10794_s25 = sld [smem:[#allocation2_spill]] (!%p514_p2)  ;;  %p571_p4 = scmp.lt.s32.totalorder (!%p514_p2), %s8233_s28, 1 }
   0xe   : > { %v611_v0 = vld [vmem:[%s10793_s0 + $0x10] sm:$0x3]  ;;  %vm760_vm0 = vcmask 1041408   ;;  %s10797_s19 = smov (!%p566_p3, %s5851_s19), 63  ;;  %v7702_v4 = vld [vmem:[%s10793_s0 + $0x8] sm:$0xff]  ;;  %v7701_v5 = vld [vmem:[%s10793_s0] sm:$0xff] }
   0xf   : > { %v705_v1 = vunpack.c.l.b16 %v611_v0  ;;  %s5852_s21 = sshll.u32 %s10797_s19, 2  ;;  %vm711_vm1 = vcmask 293888   ;;  %s10795_s19 = sld [smem:[#allocation4_spill]]  ;;  %vm3011_vm2 = vcmask 523264   ;;  %vm4011_vm3 = vcmask 130048  }
  0x10   : > { %s8250_s26 = scalar_lea.vmem %s10794_s25, %s5852_s21  ;;  %s10799_s28 = smov (!%p571_p4, %s8233_s28), 1  ;;  %vm5797_vm4 = vcmask 122880  }
  0x11   : > { %v708_v2 = vpack.c.b16 %v705_v1, %v705_v1  ;;  %v7685_v6 = vld [vmem:[%s8250_s26] sm:$0xff]  ;;  %v7686_v7 = vld [vmem:[%s8250_s26 + $0x8] sm:$0xff]  ;;  %v7687_v8 = vld [vmem:[%s8250_s26 + $0x10] sm:$0xff]  ;;  %s573_s30 = scalar_lea.vmem %s10788_s18, %s10799_s28 }
  0x12   : > { %v7688_v9 = vld [vmem:[%s8250_s26 + $0x18] sm:$0xff]  ;;  %v7689_v10 = vld [vmem:[%s8250_s26 + $0x20] sm:$0xff]  ;;  %v7690_v11 = vld [vmem:[%s8250_s26 + $0x28] sm:$0xff] }
  0x13   : > { %v762_v3 = vsel %vm760_vm0, %v708_v2, 0  ;;  %v7691_v12 = vld [vmem:[%s8250_s26 + $0x30] sm:$0xff]  ;;  %v7692_v13 = vld [vmem:[%s8250_s26 + $0x38] sm:$0xff]  ;;  %v7693_v14 = vld [vmem:[%s8250_s26 + $0x40] sm:$0xff] }
  0x14   : > { %769 = vmatpush.bf16.msra.mxu0 %v762_v3  ;;  %v7694_v23 = vld [vmem:[%s8250_s26 + $0x48] sm:$0xff]  ;;  %v7695_v31 = vld [vmem:[%s8250_s26 + $0x50] sm:$0xff]  ;;  %v7696_v39 = vld [vmem:[%s8250_s26 + $0x58] sm:$0xff] }
  0x15   : > { %v8272_v16 = vld [vmem:[%s10795_s19] ss:$0 sm:$0xff]  ;;  %v7698_v50 = vld [vmem:[%s8250_s26 + $0x68] sm:$0xff]  ;;  %v7699_v53 = vld [vmem:[%s8250_s26 + $0x70] sm:$0xff] }
  0x16   : > { %v7697_v47 = vld [vmem:[%s8250_s26 + $0x60] sm:$0xff]  ;;  %v7700_v56 = vld [vmem:[%s8250_s26 + $0x78] sm:$0xff] }
  0x18   : > { %770 = vmatpush.bf16.msra.mxu0 %v7702_v4 }
  0x1c   : > { %771 = vmatpush.bf16.msra.mxu0 %v7701_v5 }
  0x1f   : > { %5925 = vmatmul.msk.bf16.vlgmr.msra.gmra.mxu0 %vm711_vm1, %v7685_v6 }
  0x2f   : > { %5926 = vmatmul.msk.bf16.gmra.mxu0 %vm711_vm1, %v7686_v7 }
  0x3f   : > { %5927 = vmatmul.msk.bf16.gmra.mxu0 %vm711_vm1, %v7687_v8 }
  0x4f   : > { %5928 = vmatmul.msk.bf16.gmra.mxu0 %vm711_vm1, %v7688_v9 }
  0x5f   : > { %5929 = vmatmul.msk.bf16.gmra.mxu0 %vm711_vm1, %v7689_v10 }
  0x6f   : > { %5930 = vmatmul.msk.bf16.gmra.mxu0 %vm711_vm1, %v7690_v11 }
  0x7f   : > { %5931 = vmatmul.msk.bf16.gmra.mxu0 %vm711_vm1, %v7691_v12 }
  0x8f   : > { %5932 = vmatmul.msk.bf16.gmra.mxu0 %vm711_vm1, %v7692_v13 }
  0x9c   : > { %v773_v15 = vpop.f32.mrf.mxu0 }
  0x9d   : > { %v774_v17 = vadd.f32 %v8272_v16, %v773_v15 }
  0x9f   : > { %5933 = vmatmul.msk.bf16.gmra.mxu0 %vm711_vm1, %v7693_v14  ;;  %v853_v20 = vmax.f32 %v774_v17, 0.0 }
  0xa4   : > { %v775_v18 = vpop.f32.mrf.mxu0 }
  0xa5   : > { %v776_v19 = vadd.f32 %v8272_v16, %v775_v18 }
  0xa7   : > { %v854_v21 = vmax.f32 %v776_v19, 0.0 }
  0xa9   : > { %v8277_v22 = vpack.c.bf16 %v854_v21, %v853_v20 }
  0xac   : > { %v778_v24 = vpop.f32.mrf.mxu0 }
  0xad   : > { %v779_v25 = vadd.f32 %v8272_v16, %v778_v24 }
  0xaf   : > { %5934 = vmatmul.msk.bf16.gmra.mxu0 %vm711_vm1, %v7694_v23  ;;  %v855_v28 = vmax.f32 %v779_v25, 0.0  ;;  %v5943_v25 = vld [vmem:[%s10773_s3] sm:$0xf] }
  0xb4   : > { %v780_v26 = vpop.f32.mrf.mxu0 }
  0xb5   : > { %v781_v27 = vadd.f32 %v8272_v16, %v780_v26  ;;  %v7704_v26 = vld [vmem:[%s10773_s3 + $0x4] sm:$0xf0] }
  0xb7   : > { %v856_v29 = vmax.f32 %v781_v27, 0.0  ;;  %v5983_v27 = vld [vmem:[%s10773_s3 + $0x40] sm:$0xf] }
  0xb9   : > { %v8283_v30 = vpack.c.bf16 %v856_v29, %v855_v28  ;;  %v5944_v28 = vor.u32 %v7704_v26, %v5943_v25  ;;  %v7712_v29 = vld [vmem:[%s10773_s3 + $0x44] sm:$0xf0] }
  0xbc   : > { %v783_v32 = vpop.f32.mrf.mxu0 }
  0xbd   : > { %v784_v33 = vadd.f32 %v8272_v16, %v783_v32 }
  0xbf   : > { %5935 = vmatmul.msk.bf16.gmra.mxu0 %vm711_vm1, %v7695_v31  ;;  %v857_v36 = vmax.f32 %v784_v33, 0.0  ;;  %v5984_v31 = vor.u32 %v7712_v29, %v5983_v27 }
  0xc4   : > { %v785_v34 = vpop.f32.mrf.mxu0 }
  0xc5   : > { %v786_v35 = vadd.f32 %v8272_v16, %v785_v34  ;;  %v5951_v34 = vld [vmem:[%s10773_s3 + $0x10] sm:$0xf] }
  0xc7   : > { %v858_v37 = vmax.f32 %v786_v35, 0.0  ;;  %v7706_v35 = vld [vmem:[%s10773_s3 + $0x14] sm:$0xf0] }
  0xc9   : > { %v8289_v38 = vpack.c.bf16 %v858_v37, %v857_v36  ;;  %v5991_v36 = vld [vmem:[%s10773_s3 + $0x50] sm:$0xf]  ;;  %v5952_v37 = vor.u32 %v7706_v35, %v5951_v34 }
  0xcc   : > { %v788_v40 = vpop.f32.mrf.mxu0 }
  0xcd   : > { %v789_v41 = vadd.f32 %v8272_v16, %v788_v40 }
  0xcf   : > { %5936 = vmatmul.msk.bf16.gmra.mxu0 %vm711_vm1, %v7696_v39  ;;  %v859_v44 = vmax.f32 %v789_v41, 0.0  ;;  %v7714_v39 = vld [vmem:[%s10773_s3 + $0x54] sm:$0xf0] }
  0xd0   : > { %v5992_v40 = vor.u32 %v7714_v39, %v5991_v36 }
  0xd4   : > { %v790_v42 = vpop.f32.mrf.mxu0 }
  0xd5   : > { %v791_v43 = vadd.f32 %v8272_v16, %v790_v42 }
  0xd7   : > { %v860_v45 = vmax.f32 %v791_v43, 0.0  ;;  %v5959_v43 = vld [vmem:[%s10773_s3 + $0x20] sm:$0xf] }
  0xd9   : > { %v8295_v46 = vpack.c.bf16 %v860_v45, %v859_v44  ;;  %v7708_v44 = vld [vmem:[%s10773_s3 + $0x24] sm:$0xf0]  ;;  %v5999_v45 = vld [vmem:[%s10773_s3 + $0x60] sm:$0xf] }
  0xdc   : > { %v793_v48 = vpop.f32.mrf.mxu0 }
  0xdd   : > { %v794_v10 = vadd.f32 %v8272_v16, %v793_v48  ;;  %v7716_v48 = vld [vmem:[%s10773_s3 + $0x64] sm:$0xf0] }
  0xdf   : > { %5937 = vmatmul.msk.bf16.gmra.mxu0 %vm711_vm1, %v7697_v47  ;;  %v861_v14 = vmax.f32 %v794_v10, 0.0  ;;  %v5960_v47 = vor.u32 %v7708_v44, %v5959_v43 }
  0xe4   : > { %v795_v49 = vpop.f32.mrf.mxu0 }
  0xe5   : > { %v796_v7 = vadd.f32 %v8272_v16, %v795_v49  ;;  %v6000_v49 = vor.u32 %v7716_v48, %v5999_v45  ;;  %v5985_v45 = vld [vmem:[%s10773_s3 + $0x48] sm:$0xf0] }
  0xe6   : > { %v6025_v48 = vld [vmem:[%s10773_s3 + $0x88] sm:$0xf0] }
  0xe7   : > { %v862_v12 = vmax.f32 %v796_v7, 0.0 }
  0xe9   : > { %v8332_v17 = vpack.c.bf16 %v862_v12, %v861_v14 }
  0xec   : > { %v798_v51 = vpop.f32.mrf.mxu0 }
  0xed   : > { %v799_v4 = vadd.f32 %v8272_v16, %v798_v51 }
  0xef   : > { %5938 = vmatmul.msk.bf16.gmra.mxu0 %vm711_vm1, %v7698_v50  ;;  %v863_v11 = vmax.f32 %v799_v4, 0.0 }
  0xf4   : > { %v800_v52 = vpop.f32.mrf.mxu0 }
  0xf5   : > { %v801_v1 = vadd.f32 %v8272_v16, %v800_v52  ;;  %v5967_v52 = vld [vmem:[%s10773_s3 + $0x30] sm:$0xf] }
  0xf7   : > { %v864_v8 = vmax.f32 %v801_v1, 0.0 }
  0xf9   : > { %v8325_v13 = vpack.c.bf16 %v864_v8, %v863_v11 }
  0xfc   : > { %v803_v54 = vpop.f32.mrf.mxu0 }
  0xfd   : > { %v804_v62 = vadd.f32 %v8272_v16, %v803_v54  ;;  %v6007_v54 = vld [vmem:[%s10773_s3 + $0x70] sm:$0xf] }
  0xff   : > { %5939 = vmatmul.msk.bf16.gmra.mxu0 %vm711_vm1, %v7699_v53  ;;  %v865_v5 = vmax.f32 %v804_v62, 0.0  ;;  %v7710_v53 = vld [vmem:[%s10773_s3 + $0x34] sm:$0xf0] }
 0x104   : > { %v805_v55 = vpop.f32.mrf.mxu0 }
 0x105   : > { %v806_v60 = vadd.f32 %v8272_v16, %v805_v55  ;;  %v5968_v55 = vor.u32 %v7710_v53, %v5967_v52  ;;  %v7705_v53 = vld [vmem:[%s10773_s3 + $0x14] sm:$0xf] }
 0x107   : > { %v866_v2 = vmax.f32 %v806_v60, 0.0 }
 0x109   : > { %v8319_v9 = vpack.c.bf16 %v866_v2, %v865_v5 }
 0x10c   : > { %v808_v57 = vpop.f32.mrf.mxu0 }
 0x10d   : > { %v809_v58 = vadd.f32 %v8272_v16, %v808_v57 }
 0x10f   : > { %5940 = vmatmul.msk.bf16.gmra.mxu0 %vm711_vm1, %v7700_v56  ;;  %v867_v63 = vmax.f32 %v809_v58, 0.0  ;;  %v7718_v56 = vld [vmem:[%s10773_s3 + $0x74] sm:$0xf0] }
 0x110   : > { %v6008_v57 = vor.u32 %v7718_v56, %v6007_v54  ;;  %v5953_v54 = vld [vmem:[%s10773_s3 + $0x18] sm:$0xf0] }
 0x111   : > { %v5993_v56 = vld [vmem:[%s10773_s3 + $0x58] sm:$0xf0] }
 0x114   : > { %v810_v59 = vpop.f32.mrf.mxu0 }
 0x115   : > { %v811_v61 = vadd.f32 %v8272_v16, %v810_v59 }
 0x117   : > { %v868_v0 = vmax.f32 %v811_v61, 0.0 }
 0x119   : > { %v8310_v3 = vpack.c.bf16 %v868_v0, %v867_v63 }
 0x11b   : > { %949 = vmatpush.bf16.msra.mxu1 %v8310_v3  ;;  %1064 = vmatpush.bf16.msra.mxu3 %v8310_v3 }
 0x11c   : > { %1639 = vmatpush.bf16.msrb.mxu0 %v8310_v3  ;;  %v8316_v6 = vpop.f32.mrf.mxu0 }
 0x11f   : > { %950 = vmatpush.bf16.msra.mxu1 %v8319_v9  ;;  %1065 = vmatpush.bf16.msra.mxu3 %v8319_v9 }
 0x120   : > { %1640 = vmatpush.bf16.msrb.mxu0 %v8319_v9 }
 0x123   : > { %951 = vmatpush.bf16.msra.mxu1 %v8325_v13  ;;  %1066 = vmatpush.bf16.msra.mxu3 %v8325_v13 }
 0x124   : > { %1641 = vmatpush.bf16.msrb.mxu0 %v8325_v13  ;;  %v8330_v15 = vpop.f32.mrf.mxu0 }
 0x127   : > { %952 = vmatpush.bf16.msra.mxu1 %v8332_v17  ;;  %1067 = vmatpush.bf16.msra.mxu3 %v8332_v17 }
 0x128   : > { %1642 = vmatpush.bf16.msrb.mxu0 %v8332_v17 }
 0x12b   : > { %953 = vmatpush.bf16.msra.mxu1 %v8295_v46  ;;  %1068 = vmatpush.bf16.msra.mxu3 %v8295_v46 }
 0x12c   : > { %1643 = vmatpush.bf16.msrb.mxu0 %v8295_v46  ;;  %v8340_v18 = vpop.f32.mrf.mxu0 }
 0x12f   : > { %954 = vmatpush.bf16.msra.mxu1 %v8289_v38  ;;  %1069 = vmatpush.bf16.msra.mxu3 %v8289_v38 }
 0x130   : > { %1644 = vmatpush.bf16.msrb.mxu0 %v8289_v38 }
 0x133   : > { %955 = vmatpush.bf16.msra.mxu1 %v8283_v30  ;;  %1070 = vmatpush.bf16.msra.mxu3 %v8283_v30 }
 0x134   : > { %1645 = vmatpush.bf16.msrb.mxu0 %v8283_v30  ;;  %v8348_v19 = vpop.f32.mrf.mxu0 }
 0x137   : > { %956 = vmatpush.bf16.msra.mxu1 %v8277_v22  ;;  %1071 = vmatpush.bf16.msra.mxu3 %v8277_v22 }
 0x138   : > { %1646 = vmatpush.bf16.msrb.mxu0 %v8277_v22 }
 0x13a   : > { %957 = vmatmul.bf16.vlgmr.msra.gmra.mxu1 %v5944_v28  ;;  %1072 = vmatmul.bf16.vlgmr.msra.gmra.mxu3 %v5984_v31 }
 0x13c   : > { %1869 = vmatpush.bf16.msra.mxu0 %v8310_v3  ;;  %v8354_v20 = vpop.f32.mrf.mxu0 }
 0x140   : > { %1870 = vmatpush.bf16.msra.mxu0 %v8319_v9 }
 0x144   : > { %1871 = vmatpush.bf16.msra.mxu0 %v8325_v13  ;;  %v8358_v21 = vpop.f32.mrf.mxu0 }
 0x148   : > { %1872 = vmatpush.bf16.msra.mxu0 %v8332_v17 }
 0x14a   : > { %962 = vmatmul.bf16.gmra.mxu1 %v5952_v37  ;;  %1077 = vmatmul.bf16.gmra.mxu3 %v5992_v40 }
 0x14c   : > { %1873 = vmatpush.bf16.msra.mxu0 %v8295_v46  ;;  %v8362_v23 = vpop.f32.mrf.mxu0 }
 0x14d   : > { %v829_v29 = vadd.f32 %v8272_v16, %v8362_v23  ;;  %v821_v23 = vadd.f32 %v8272_v16, %v8348_v19  ;;  %v814_v19 = vadd.f32 %v8272_v16, %v8316_v6  ;;  %v7711_v6 = vld [vmem:[%s10773_s3 + $0x44] sm:$0xf] }
 0x14f   : > { %v875_v35 = vmax.f32 %v829_v29, 0.0  ;;  %v872_v40 = vmax.f32 %v821_v23, 0.0  ;;  %v869_v44 = vmax.f32 %v814_v19, 0.0  ;;  %v6049_v29 = vld [vmem:[%s10773_s3 + $0xb8] sm:$0xf0] }
 0x150   : > { %1874 = vmatpush.bf16.msra.mxu0 %v8289_v38  ;;  %v6183_v23 = vld [vmem:[%s10773_s3 + $0x180] sm:$0xf] }
 0x151   : > { %v6063_v19 = vld [vmem:[%s10773_s3 + $0xc0] sm:$0xf] }
 0x154   : > { %1875 = vmatpush.bf16.msra.mxu0 %v8283_v30  ;;  %v8366_v24 = vpop.f32.mrf.mxu0 }
 0x155   : > { %v831_v26 = vadd.f32 %v8272_v16, %v8366_v24  ;;  %v824_v24 = vadd.f32 %v8272_v16, %v8354_v20  ;;  %v816_v20 = vadd.f32 %v8272_v16, %v8330_v15  ;;  %v7703_v15 = vld [vmem:[%s10773_s3 + $0x4] sm:$0xf] }
 0x157   : > { %v873_v39 = vmax.f32 %v824_v24, 0.0 }
 0x158   : > { %1876 = vmatpush.bf16.msra.mxu0 %v8277_v22 }
 0x15a   : > { %967 = vmatmul.bf16.gmra.mxu1 %v5960_v47  ;;  %1082 = vmatmul.bf16.gmra.mxu3 %v6000_v49  ;;  %v7719_v47 = vld [vmem:[%s10773_s3 + $0x84] sm:$0xf] }
 0x15b   : > { %v6028_v52 = vor.u32 %v7719_v47, %v6025_v48  ;;  %v6191_v48 = vld [vmem:[%s10773_s3 + $0x190] sm:$0xf] }
 0x15c   : > { %v833_v32 = vpop.f32.mrf.mxu0 }
 0x15d   : > { %v834_v14 = vadd.f32 %v8272_v16, %v833_v32  ;;  %v826_v32 = vadd.f32 %v8272_v16, %v8358_v21  ;;  %v819_v21 = vadd.f32 %v8272_v16, %v8340_v18  ;;  %v870_v18 = vmax.f32 %v816_v20, 0.0  ;;  %v6023_v20 = vld [vmem:[%s10773_s3 + $0x80] sm:$0xf] }
 0x15f   : > { %v877_v31 = vmax.f32 %v834_v14, 0.0  ;;  %v874_v36 = vmax.f32 %v826_v32, 0.0  ;;  %v8494_v49 = vpack.c.bf16 %v870_v18, %v869_v44  ;;  %v5969_v14 = vld [vmem:[%s10773_s3 + $0x38] sm:$0xf0]  ;;  %v6103_v18 = vld [vmem:[%s10773_s3 + $0x100] sm:$0xf] }
 0x160   : > { %v7736_v44 = vld [vmem:[%s10773_s3 + $0x104] sm:$0xf0] }
 0x164   : > { %v835_v33 = vpop.f32.mrf.mxu0 }
 0x165   : > { %v836_v10 = vadd.f32 %v8272_v16, %v835_v33  ;;  %v876_v33 = vmax.f32 %v831_v26, 0.0  ;;  %v6009_v26 = vld [vmem:[%s10773_s3 + $0x78] sm:$0xf0] }
 0x167   : > { %v878_v27 = vmax.f32 %v836_v10, 0.0  ;;  %v8455_v37 = vpack.c.bf16 %v876_v33, %v875_v35 }
 0x169   : > { %v8446_v34 = vpack.c.bf16 %v878_v27, %v877_v31  ;;  %v7725_v27 = vld [vmem:[%s10773_s3 + $0xb4] sm:$0xf] }
 0x16a   : > { %972 = vmatmul.bf16.gmra.mxu1 %v5968_v55  ;;  %1087 = vmatmul.bf16.gmra.mxu3 %v6008_v57  ;;  %v7713_v55 = vld [vmem:[%s10773_s3 + $0x54] sm:$0xf]  ;;  %v6052_v24 = vor.u32 %v7725_v27, %v6049_v29 }
 0x16b   : > { %v7721_v57 = vld [vmem:[%s10773_s3 + $0x94] sm:$0xf] }
 0x16c   : > { %v838_v41 = vpop.f32.mrf.mxu0 }
 0x16d   : > { %v839_v7 = vadd.f32 %v8272_v16, %v838_v41  ;;  %v8464_v41 = vpack.c.bf16 %v874_v36, %v873_v39  ;;  %v7752_v36 = vld [vmem:[%s10773_s3 + $0x184] sm:$0xf0] }
 0x16f   : > { %v879_v25 = vmax.f32 %v839_v7, 0.0 }
 0x174   : > { %v840_v42 = vpop.f32.mrf.mxu0 }
 0x175   : > { %v841_v2 = vadd.f32 %v8272_v16, %v840_v42  ;;  %v871_v42 = vmax.f32 %v819_v21, 0.0  ;;  %v6184_v21 = vor.u32 %v7752_v36, %v6183_v23  ;;  %v7758_v23 = vld [vmem:[%s10773_s3 + $0x1b4] sm:$0xf0] }
 0x177   : > { %v880_v11 = vmax.f32 %v841_v2, 0.0  ;;  %v8471_v43 = vpack.c.bf16 %v872_v40, %v871_v42  ;;  %v7723_v2 = vld [vmem:[%s10773_s3 + $0xa4] sm:$0xf]  ;;  %1647 = vmatmul.bf16.vlgmr.msrb.gmra.mxu0 %v6184_v21  ;;  %v7720_v40 = vld [vmem:[%s10773_s3 + $0x84] sm:$0xf0] }
 0x178   : > { %v7728_v42 = vld [vmem:[%s10773_s3 + $0xc4] sm:$0xf0] }
 0x179   : > { %v8437_v28 = vpack.c.bf16 %v880_v11, %v879_v25  ;;  %v7709_v11 = vld [vmem:[%s10773_s3 + $0x34] sm:$0xf] }
 0x17a   : > { %v7717_v25 = vld [vmem:[%s10773_s3 + $0x74] sm:$0xf]  ;;  %v5972_v31 = vor.u32 %v7709_v11, %v5969_v14  ;;  %v7732_v11 = vld [vmem:[%s10773_s3 + $0xe4] sm:$0xf0]  ;;  %v6119_v14 = vld [vmem:[%s10773_s3 + $0x120] sm:$0xf] }
 0x17b   : > { %v6012_v33 = vor.u32 %v7717_v25, %v6009_v26  ;;  %v7740_v25 = vld [vmem:[%s10773_s3 + $0x124] sm:$0xf0] }
 0x17c   : > { %v843_v50 = vpop.f32.mrf.mxu0 }
 0x17d   : > { %v844_v63 = vadd.f32 %v8272_v16, %v843_v50 }
 0x17f   : > { %v881_v8 = vmax.f32 %v844_v63, 0.0  ;;  %v5961_v63 = vld [vmem:[%s10773_s3 + $0x28] sm:$0xf0] }
 0x184   : > { %v845_v51 = vpop.f32.mrf.mxu0 }
 0x185   : > { %v846_v61 = vadd.f32 %v8272_v16, %v845_v51  ;;  %v5988_v51 = vor.u32 %v7711_v6, %v5985_v45  ;;  %v6104_v6 = vor.u32 %v7736_v44, %v6103_v18  ;;  %v7734_v18 = vld [vmem:[%s10773_s3 + $0xf4] sm:$0xf0]  ;;  %v6127_v44 = vld [vmem:[%s10773_s3 + $0x130] sm:$0xf] }
 0x187   : > { %v882_v4 = vmax.f32 %v846_v61, 0.0 }
 0x189   : > { %v8429_v12 = vpack.c.bf16 %v882_v4, %v881_v8  ;;  %v6041_v4 = vld [vmem:[%s10773_s3 + $0xa8] sm:$0xf0] }
 0x18a   : > { %v6044_v10 = vor.u32 %v7723_v2, %v6041_v4 }
 0x18c   : > { %v848_v58 = vpop.f32.mrf.mxu0 }
 0x18d   : > { %v849_v59 = vadd.f32 %v8272_v16, %v848_v58  ;;  %v6033_v58 = vld [vmem:[%s10773_s3 + $0x98] sm:$0xf0] }
 0x18e   : > { %v6036_v61 = vor.u32 %v7721_v57, %v6033_v58  ;;  %v6111_v57 = vld [vmem:[%s10773_s3 + $0x110] sm:$0xf]  ;;  %v7738_v58 = vld [vmem:[%s10773_s3 + $0x114] sm:$0xf0] }
 0x18f   : > { %v883_v0 = vmax.f32 %v849_v59, 0.0  ;;  %v5956_v59 = vor.u32 %v7705_v53, %v5953_v54  ;;  %v6031_v53 = vld [vmem:[%s10773_s3 + $0x90] sm:$0xf]  ;;  %v7722_v54 = vld [vmem:[%s10773_s3 + $0x94] sm:$0xf0] }
 0x194   : > { %v850_v60 = vpop.f32.mrf.mxu0 }
 0x195   : > { %v851_v62 = vadd.f32 %v8272_v16, %v850_v60  ;;  %v5945_v16 = vld [vmem:[%s10773_s3 + $0x8] sm:$0xf0]  ;;  %v5996_v60 = vor.u32 %v7713_v55, %v5993_v56  ;;  %v6071_v55 = vld [vmem:[%s10773_s3 + $0xd0] sm:$0xf]  ;;  %v7730_v56 = vld [vmem:[%s10773_s3 + $0xd4] sm:$0xf0] }
 0x196   : > { %v5948_v50 = vor.u32 %v7703_v15, %v5945_v16  ;;  %v6024_v15 = vor.u32 %v7720_v40, %v6023_v20  ;;  %v6064_v16 = vor.u32 %v7728_v42, %v6063_v19  ;;  %v6047_v40 = vld [vmem:[%s10773_s3 + $0xb0] sm:$0xf]  ;;  %v7726_v19 = vld [vmem:[%s10773_s3 + $0xb4] sm:$0xf0] }
 0x197   : > { %v884_v1 = vmax.f32 %v851_v62, 0.0  ;;  %v7707_v62 = vld [vmem:[%s10773_s3 + $0x24] sm:$0xf]  ;;  %v6087_v42 = vld [vmem:[%s10773_s3 + $0xf0] sm:$0xf] }
 0x198   : > { %v5964_v7 = vor.u32 %v7707_v62, %v5961_v63  ;;  %v6112_v62 = vor.u32 %v7738_v58, %v6111_v57  ;;  %v7727_v57 = vld [vmem:[%s10773_s3 + $0xc4] sm:$0xf]  ;;  %v6065_v58 = vld [vmem:[%s10773_s3 + $0xc8] sm:$0xf0] }
 0x199   : > { %v8422_v5 = vpack.c.bf16 %v884_v1, %v883_v0  ;;  %v7715_v0 = vld [vmem:[%s10773_s3 + $0x64] sm:$0xf]  ;;  %v6001_v1 = vld [vmem:[%s10773_s3 + $0x68] sm:$0xf0] }
 0x19a   : > { %v6004_v8 = vor.u32 %v7715_v0, %v6001_v1  ;;  %v6199_v0 = vld [vmem:[%s10773_s3 + $0x1a0] sm:$0xf]  ;;  %v7756_v1 = vld [vmem:[%s10773_s3 + $0x1a4] sm:$0xf0] }
 0x19b   : > { %978 = vmatpush.bf16.msra.mxu2 %v8422_v5  ;;  %1093 = vmatpush.bf16.msrb.mxu1 %v8422_v5  ;;  %v6200_v4 = vor.u32 %v7756_v1, %v6199_v0  ;;  %v6145_v0 = vld [vmem:[%s10773_s3 + $0x148] sm:$0xf0] }
 0x19c   : > { %1208 = vmatpush.bf16.msrb.mxu3 %v8422_v5 }
 0x19f   : > { %979 = vmatpush.bf16.msra.mxu2 %v8429_v12  ;;  %1094 = vmatpush.bf16.msrb.mxu1 %v8429_v12 }
 0x1a0   : > { %1209 = vmatpush.bf16.msrb.mxu3 %v8429_v12 }
 0x1a3   : > { %980 = vmatpush.bf16.msra.mxu2 %v8437_v28  ;;  %1095 = vmatpush.bf16.msrb.mxu1 %v8437_v28 }
 0x1a4   : > { %1210 = vmatpush.bf16.msrb.mxu3 %v8437_v28 }
 0x1a7   : > { %981 = vmatpush.bf16.msra.mxu2 %v8446_v34  ;;  %1096 = vmatpush.bf16.msrb.mxu1 %v8446_v34 }
 0x1a8   : > { %1211 = vmatpush.bf16.msrb.mxu3 %v8446_v34 }
 0x1ab   : > { %982 = vmatpush.bf16.msra.mxu2 %v8455_v37  ;;  %1097 = vmatpush.bf16.msrb.mxu1 %v8455_v37 }
 0x1ac   : > { %1212 = vmatpush.bf16.msrb.mxu3 %v8455_v37 }
 0x1af   : > { %983 = vmatpush.bf16.msra.mxu2 %v8464_v41  ;;  %1098 = vmatpush.bf16.msrb.mxu1 %v8464_v41 }
 0x1b0   : > { %1213 = vmatpush.bf16.msrb.mxu3 %v8464_v41 }
 0x1b3   : > { %984 = vmatpush.bf16.msra.mxu2 %v8471_v43  ;;  %1099 = vmatpush.bf16.msrb.mxu1 %v8471_v43 }
 0x1b4   : > { %1214 = vmatpush.bf16.msrb.mxu3 %v8471_v43 }
 0x1b7   : > { %985 = vmatpush.bf16.msra.mxu2 %v8494_v49  ;;  %1100 = vmatpush.bf16.msrb.mxu1 %v8494_v49  ;;  %v8592_v32 = vpop.f32.mrf.mxu1 }
 0x1b8   : > { %1215 = vmatpush.bf16.msrb.mxu3 %v8494_v49 }
 0x1ba   : > { %986 = vmatmul.bf16.vlgmr.msra.gmra.mxu2 %v5948_v50  ;;  %1101 = vmatmul.bf16.vlgmr.msrb.gmra.mxu1 %v5988_v51  ;;  %v7754_v50 = vld [vmem:[%s10773_s3 + $0x194] sm:$0xf0] }
 0x1bb   : > { %1179 = vmatpush.bf16.msrb.mxu2 %v8310_v3  ;;  %1294 = vmatpush.bf16.msra.mxu1 %v8310_v3  ;;  %v6192_v51 = vor.u32 %v7754_v50, %v6191_v48 }
 0x1bc   : > { %1409 = vmatpush.bf16.msra.mxu3 %v8310_v3 }
 0x1bd   : > { %1216 = vmatmul.bf16.vlgmr.msrb.gmra.mxu3 %v6028_v52  ;;  %v8599_v35 = vpop.f32.mrf.mxu3  ;;  %1652 = vmatmul.bf16.gmra.mxu0 %v6192_v51 }
 0x1bf   : > { %1180 = vmatpush.bf16.msrb.mxu2 %v8319_v9  ;;  %1295 = vmatpush.bf16.msra.mxu1 %v8319_v9  ;;  %v8608_v39 = vpop.f32.mrf.mxu1 }
 0x1c0   : > { %1410 = vmatpush.bf16.msra.mxu3 %v8319_v9 }
 0x1c3   : > { %1181 = vmatpush.bf16.msrb.mxu2 %v8325_v13  ;;  %1296 = vmatpush.bf16.msra.mxu1 %v8325_v13 }
 0x1c4   : > { %1411 = vmatpush.bf16.msra.mxu3 %v8325_v13 }
 0x1c5   : > { %v8631_v45 = vpop.f32.mrf.mxu3 }
 0x1c7   : > { %1182 = vmatpush.bf16.msrb.mxu2 %v8332_v17  ;;  %1297 = vmatpush.bf16.msra.mxu1 %v8332_v17  ;;  %v8633_v47 = vpop.f32.mrf.mxu1 }
 0x1c8   : > { %1412 = vmatpush.bf16.msra.mxu3 %v8332_v17 }
 0x1ca   : > { %991 = vmatmul.bf16.gmra.mxu2 %v5956_v59  ;;  %1106 = vmatmul.bf16.gmra.mxu1 %v5996_v60  ;;  %v6032_v60 = vor.u32 %v7722_v54, %v6031_v53  ;;  %v6263_v53 = vld [vmem:[%s10773_s3 + $0x200] sm:$0xf]  ;;  %v7768_v54 = vld [vmem:[%s10773_s3 + $0x204] sm:$0xf0] }
 0x1cb   : > { %1183 = vmatpush.bf16.msrb.mxu2 %v8295_v46  ;;  %1298 = vmatpush.bf16.msra.mxu1 %v8295_v46 }
 0x1cc   : > { %1413 = vmatpush.bf16.msra.mxu3 %v8295_v46 }
 0x1cd   : > { %1221 = vmatmul.bf16.gmra.mxu3 %v6036_v61  ;;  %v8647_v52 = vpop.f32.mrf.mxu3  ;;  %v6072_v61 = vor.u32 %v7730_v56, %v6071_v55  ;;  %1657 = vmatmul.bf16.gmra.mxu0 %v6200_v4  ;;  %v6264_v55 = vor.u32 %v7768_v54, %v6263_v53  ;;  %v6068_v4 = vor.u32 %v7727_v57, %v6065_v58 }
 0x1cf   : > { %1184 = vmatpush.bf16.msrb.mxu2 %v8289_v38  ;;  %1299 = vmatpush.bf16.msra.mxu1 %v8289_v38  ;;  %v8669_v59 = vpop.f32.mrf.mxu1 }
 0x1d0   : > { %1414 = vmatpush.bf16.msra.mxu3 %v8289_v38 }
 0x1d3   : > { %1185 = vmatpush.bf16.msrb.mxu2 %v8283_v30  ;;  %1300 = vmatpush.bf16.msra.mxu1 %v8283_v30 }
 0x1d4   : > { %1415 = vmatpush.bf16.msra.mxu3 %v8283_v30 }
 0x1d5   : > { %v8675_v63 = vpop.f32.mrf.mxu3 }
 0x1d7   : > { %1186 = vmatpush.bf16.msrb.mxu2 %v8277_v22  ;;  %1301 = vmatpush.bf16.msra.mxu1 %v8277_v22  ;;  %v8686_v2 = vpop.f32.mrf.mxu1 }
 0x1d8   : > { %1416 = vmatpush.bf16.msra.mxu3 %v8277_v22 }
 0x1da   : > { %996 = vmatmul.bf16.gmra.mxu2 %v5964_v7  ;;  %1111 = vmatmul.bf16.gmra.mxu1 %v6004_v8  ;;  %v6039_v7 = vld [vmem:[%s10773_s3 + $0xa0] sm:$0xf]  ;;  %v7724_v8 = vld [vmem:[%s10773_s3 + $0xa4] sm:$0xf0] }
 0x1db   : > { %1323 = vmatpush.bf16.msra.mxu2 %v8422_v5  ;;  %1438 = vmatpush.bf16.msrb.mxu1 %v8422_v5  ;;  %v6040_v27 = vor.u32 %v7724_v8, %v6039_v7 }
 0x1dc   : > { %1553 = vmatpush.bf16.msrb.mxu3 %v8422_v5 }
 0x1dd   : > { %1226 = vmatmul.bf16.gmra.mxu3 %v6044_v10  ;;  %v6079_v10 = vld [vmem:[%s10773_s3 + $0xe0] sm:$0xf]  ;;  %v8712_v26 = vpop.f32.mrf.mxu3 }
 0x1de   : > { %v6080_v29 = vor.u32 %v7732_v11, %v6079_v10 }
 0x1df   : > { %1324 = vmatpush.bf16.msra.mxu2 %v8429_v12  ;;  %1439 = vmatpush.bf16.msrb.mxu1 %v8429_v12 }
 0x1e0   : > { %1554 = vmatpush.bf16.msrb.mxu3 %v8429_v12 }
 0x1e3   : > { %1325 = vmatpush.bf16.msra.mxu2 %v8437_v28  ;;  %1440 = vmatpush.bf16.msrb.mxu1 %v8437_v28 }
 0x1e4   : > { %1555 = vmatpush.bf16.msrb.mxu3 %v8437_v28 }
 0x1e5   : > { %v8725_v36 = vpop.f32.mrf.mxu3 }
 0x1e7   : > { %1326 = vmatpush.bf16.msra.mxu2 %v8446_v34  ;;  %1441 = vmatpush.bf16.msrb.mxu1 %v8446_v34 }
 0x1e8   : > { %1556 = vmatpush.bf16.msrb.mxu3 %v8446_v34 }
 0x1ea   : > { %1001 = vmatmul.bf16.gmra.mxu2 %v5972_v31  ;;  %1116 = vmatmul.bf16.gmra.mxu1 %v6012_v33  ;;  %v6120_v31 = vor.u32 %v7740_v25, %v6119_v14  ;;  %v8716_v33 = vpop.f32.mrf.mxu1 }
 0x1eb   : > { %1327 = vmatpush.bf16.msra.mxu2 %v8455_v37  ;;  %1442 = vmatpush.bf16.msrb.mxu1 %v8455_v37 }
 0x1ec   : > { %1557 = vmatpush.bf16.msrb.mxu3 %v8455_v37 }
 0x1ed   : > { %1231 = vmatmul.bf16.gmra.mxu3 %v6052_v24  ;;  %v6207_v24 = vld [vmem:[%s10773_s3 + $0x1b0] sm:$0xf]  ;;  %v8747_v50 = vpop.f32.mrf.mxu3 }
 0x1ee   : > { %v6208_v21 = vor.u32 %v7758_v23, %v6207_v24 }
 0x1ef   : > { %1328 = vmatpush.bf16.msra.mxu2 %v8464_v41  ;;  %1443 = vmatpush.bf16.msrb.mxu1 %v8464_v41 }
 0x1f0   : > { %1558 = vmatpush.bf16.msrb.mxu3 %v8464_v41  ;;  %1662 = vmatmul.bf16.gmra.mxu0 %v6208_v21 }
 0x1f2   : > { %v8727_v20 = vpop.f32.mrf.mxu1 }
 0x1f3   : > { %1329 = vmatpush.bf16.msra.mxu2 %v8471_v43  ;;  %1444 = vmatpush.bf16.msrb.mxu1 %v8471_v43 }
 0x1f4   : > { %1559 = vmatpush.bf16.msrb.mxu3 %v8471_v43 }
 0x1f5   : > { %v8757_v56 = vpop.f32.mrf.mxu3 }
 0x1f7   : > { %1330 = vmatpush.bf16.msra.mxu2 %v8494_v49  ;;  %1445 = vmatpush.bf16.msrb.mxu1 %v8494_v49 }
 0x1f8   : > { %1560 = vmatpush.bf16.msrb.mxu3 %v8494_v49 }
 0x1fa   : > { %1187 = vmatmul.bf16.vlgmr.msrb.gmra.mxu2 %v6024_v15  ;;  %1302 = vmatmul.bf16.vlgmr.msra.gmra.mxu1 %v6064_v16  ;;  %v7742_v15 = vld [vmem:[%s10773_s3 + $0x134] sm:$0xf0]  ;;  %v6048_v16 = vor.u32 %v7726_v19, %v6047_v40  ;;  %v8749_v51 = vpop.f32.mrf.mxu1  ;;  %v7729_v40 = vld [vmem:[%s10773_s3 + $0xd4] sm:$0xf] }
 0x1fb   : > { %1524 = vmatpush.bf16.msrb.mxu2 %v8310_v3  ;;  %1668 = vmatpush.bf16.msra.mxu1 %v8422_v5  ;;  %v6128_v48 = vor.u32 %v7742_v15, %v6127_v44  ;;  %v7745_v19 = vld [vmem:[%s10773_s3 + $0x154] sm:$0xf] }
 0x1fd   : > { %1417 = vmatmul.bf16.vlgmr.msra.gmra.mxu3 %v6104_v6  ;;  %v6088_v6 = vor.u32 %v7734_v18, %v6087_v42  ;;  %v6153_v42 = vld [vmem:[%s10773_s3 + $0x158] sm:$0xf0] }
 0x1fe   : > { %1783 = vmatpush.bf16.msra.mxu3 %v8422_v5  ;;  %v6156_v53 = vor.u32 %v7745_v19, %v6153_v42 }
 0x1ff   : > { %1525 = vmatpush.bf16.msrb.mxu2 %v8319_v9  ;;  %1669 = vmatpush.bf16.msra.mxu1 %v8429_v12 }
 0x200   : > { %1877 = vmatmul.bf16.vlgmr.msra.gmra.mxu0 %v6264_v55 }
 0x202   : > { %1784 = vmatpush.bf16.msra.mxu3 %v8429_v12 }
 0x203   : > { %1526 = vmatpush.bf16.msrb.mxu2 %v8325_v13  ;;  %1670 = vmatpush.bf16.msra.mxu1 %v8437_v28 }
 0x206   : > { %1785 = vmatpush.bf16.msra.mxu3 %v8437_v28 }
 0x207   : > { %1527 = vmatpush.bf16.msrb.mxu2 %v8332_v17  ;;  %1671 = vmatpush.bf16.msra.mxu1 %v8446_v34 }
 0x20a   : > { %1786 = vmatpush.bf16.msra.mxu3 %v8446_v34  ;;  %1192 = vmatmul.bf16.gmra.mxu2 %v6032_v60  ;;  %v7735_v60 = vld [vmem:[%s10773_s3 + $0x104] sm:$0xf] }
 0x20b   : > { %1307 = vmatmul.bf16.gmra.mxu1 %v6072_v61  ;;  %1528 = vmatpush.bf16.msrb.mxu2 %v8295_v46  ;;  %v6105_v61 = vld [vmem:[%s10773_s3 + $0x108] sm:$0xf0] }
 0x20c   : > { %1672 = vmatpush.bf16.msra.mxu1 %v8455_v37  ;;  %v6108_v7 = vor.u32 %v7735_v60, %v6105_v61  ;;  %v7772_v60 = vld [vmem:[%s10773_s3 + $0x224] sm:$0xf0] }
 0x20d   : > { %1422 = vmatmul.bf16.gmra.mxu3 %v6112_v62  ;;  %v7743_v62 = vld [vmem:[%s10773_s3 + $0x144] sm:$0xf] }
 0x20e   : > { %1787 = vmatpush.bf16.msra.mxu3 %v8455_v37  ;;  %v6148_v8 = vor.u32 %v7743_v62, %v6145_v0  ;;  %v7731_v62 = vld [vmem:[%s10773_s3 + $0xe4] sm:$0xf]  ;;  %v6081_v0 = vld [vmem:[%s10773_s3 + $0xe8] sm:$0xf0] }
 0x20f   : > { %1529 = vmatpush.bf16.msrb.mxu2 %v8289_v38 }
 0x210   : > { %1673 = vmatpush.bf16.msra.mxu1 %v8464_v41 }
 0x212   : > { %1788 = vmatpush.bf16.msra.mxu3 %v8464_v41 }
 0x213   : > { %1530 = vmatpush.bf16.msrb.mxu2 %v8283_v30 }
 0x214   : > { %1674 = vmatpush.bf16.msra.mxu1 %v8471_v43 }
 0x216   : > { %1789 = vmatpush.bf16.msra.mxu3 %v8471_v43 }
 0x217   : > { %1531 = vmatpush.bf16.msrb.mxu2 %v8277_v22 }
 0x218   : > { %1675 = vmatpush.bf16.msra.mxu1 %v8494_v49 }
 0x21a   : > { %1790 = vmatpush.bf16.msra.mxu3 %v8494_v49  ;;  %1197 = vmatmul.bf16.gmra.mxu2 %v6040_v27 }
 0x21b   : > { %1312 = vmatmul.bf16.gmra.mxu1 %v6080_v29  ;;  %v6271_v29 = vld [vmem:[%s10773_s3 + $0x210] sm:$0xf] }
 0x21d   : > { %1427 = vmatmul.bf16.gmra.mxu3 %v6120_v31 }
 0x22a   : > { %1202 = vmatmul.bf16.gmra.mxu2 %v6048_v16 }
 0x22b   : > { %1317 = vmatmul.bf16.gmra.mxu1 %v6088_v6 }
 0x22d   : > { %1432 = vmatmul.bf16.gmra.mxu3 %v6128_v48 }
 0x237   : > { %v1102_v1 = vpop.f32.mrf.mxu1 }
 0x238   : > { %v1103_v10 = vadd.f32 %v1102_v1, %v8599_v35  ;;  %v7770_v35 = vld [vmem:[%s10773_s3 + $0x214] sm:$0xf0]  ;;  %v7747_v1 = vld [vmem:[%s10773_s3 + $0x164] sm:$0xf] }
 0x239   : > { %v6272_v24 = vor.u32 %v7770_v35, %v6271_v29 }
 0x23a   : > { %1331 = vmatmul.bf16.vlgmr.msra.gmra.mxu2 %v6068_v4  ;;  %v1122_v14 = vpack.c.bf16 %v1103_v10, %v1103_v10  ;;  %v6161_v4 = vld [vmem:[%s10773_s3 + $0x168] sm:$0xf0] }
 0x23b   : > { %1446 = vmatmul.bf16.vlgmr.msrb.gmra.mxu1 %v6108_v7  ;;  %1754 = vmatpush.bf16.msra.mxu2 %v8310_v3  ;;  %v7797_v7 = vld [vmem:[%s10774_s4 + $0xb0] sm:$0xff]  ;;  %v6164_v35 = vor.u32 %v7747_v1, %v6161_v4  ;;  %v7792_v4 = vld [vmem:[%s10774_s4 + $0x88] sm:$0xff] }
 0x23c   : > { %1898 = vmatpush.bf16.msrb.mxu1 %v8422_v5  ;;  %v8791_v3 = vunpack.c.l.b16 %v1122_v14  ;;  %1882 = vmatmul.bf16.gmra.mxu0 %v6272_v24 }
 0x23d   : > { %1561 = vmatmul.bf16.vlgmr.msrb.gmra.mxu3 %v6148_v8  ;;  %v987_v11 = vpop.f32.mrf.mxu2 }
 0x23e   : > { %v988_v5 = vadd.f32 %v987_v11, %v8592_v32  ;;  %v6113_v32 = vld [vmem:[%s10773_s3 + $0x118] sm:$0xf0] }
 0x23f   : > { %v1104_v27 = vpop.f32.mrf.mxu1  ;;  %1755 = vmatpush.bf16.msra.mxu2 %v8319_v9  ;;  %v7737_v9 = vld [vmem:[%s10773_s3 + $0x114] sm:$0xf] }
 0x240   : > { %v8780_v25 = vpop.f32.mrf.mxu3  ;;  %v1105_v31 = vadd.f32 %v1104_v27, %v8631_v45  ;;  %1899 = vmatpush.bf16.msrb.mxu1 %v8429_v12  ;;  %v6073_v45 = vld [vmem:[%s10773_s3 + $0xd8] sm:$0xf0]  ;;  %v1007_v18 = vpack.c.bf16 %v988_v5, %v988_v5  ;;  %v6116_v48 = vor.u32 %v7737_v9, %v6113_v32  ;;  %v7774_v9 = vld [vmem:[%s10773_s3 + $0x234] sm:$0xf0] }
 0x241   : > { %v6076_v16 = vor.u32 %v7729_v40, %v6073_v45  ;;  %v6287_v45 = vld [vmem:[%s10773_s3 + $0x230] sm:$0xf] }
 0x242   : > { %v1123_v23 = vpack.c.bf16 %v1105_v31, %v1105_v31  ;;  %v8823_v54 = vunpack.c.l.b16 %v1007_v18  ;;  %v6288_v19 = vor.u32 %v7774_v9, %v6287_v45  ;;  %v7794_v18 = vld [vmem:[%s10774_s4 + $0x98] sm:$0xff] }
 0x243   : > { %1756 = vmatpush.bf16.msra.mxu2 %v8325_v13 }
 0x244   : > { %v8794_v21 = vunpack.c.l.b16 %v1123_v23  ;;  %1900 = vmatpush.bf16.msrb.mxu1 %v8437_v28 }
 0x245   : > { %v989_v12 = vpop.f32.mrf.mxu2 }
 0x246   : > { %v1975_v44 = vpack.c.b16 %v8794_v21, %v8791_v3  ;;  %v990_v13 = vadd.f32 %v989_v12, %v8608_v39  ;;  %v7781_v3 = vld [vmem:[%s10774_s4 + $0x30] sm:$0xff] }
 0x247   : > { %v1107_v15 = vpop.f32.mrf.mxu1  ;;  %1757 = vmatpush.bf16.msra.mxu2 %v8332_v17  ;;  %v7805_v21 = vld [vmem:[%s10774_s4 + $0xf0] sm:$0xff] }
 0x248   : > { %v8819_v28 = vpop.f32.mrf.mxu3  ;;  %v1008_v6 = vpack.c.bf16 %v990_v13, %v990_v13  ;;  %1901 = vmatpush.bf16.msrb.mxu1 %v8446_v34  ;;  %v6279_v34 = vld [vmem:[%s10773_s3 + $0x220] sm:$0xf]  ;;  %v1108_v14 = vadd.f32 %v1107_v15, %v8647_v52  ;;  %v7733_v15 = vld [vmem:[%s10773_s3 + $0xf4] sm:$0xf] }
 0x249   : > { %v6280_v61 = vor.u32 %v7772_v60, %v6279_v34 }
 0x24a   : > { %v8825_v55 = vunpack.c.l.b16 %v1008_v6  ;;  %1336 = vmatmul.bf16.gmra.mxu2 %v6076_v16  ;;  %v1124_v52 = vpack.c.bf16 %v1108_v14, %v1108_v14  ;;  %v6089_v16 = vld [vmem:[%s10773_s3 + $0xf8] sm:$0xf0]  ;;  %v7741_v6 = vld [vmem:[%s10773_s3 + $0x134] sm:$0xf] }
 0x24b   : > { %1451 = vmatmul.bf16.gmra.mxu1 %v6116_v48  ;;  %1758 = vmatpush.bf16.msra.mxu2 %v8295_v46  ;;  %v7798_v46 = vld [vmem:[%s10774_s4 + $0xb8] sm:$0xff] }
 0x24c   : > { %v1951_v57 = vpack.c.b16 %v8825_v55, %v8823_v54  ;;  %1902 = vmatpush.bf16.msrb.mxu1 %v8455_v37  ;;  %1887 = vmatmul.bf16.gmra.mxu0 %v6280_v61  ;;  %v8895_v12 = vunpack.c.l.b16 %v1124_v52  ;;  %v6129_v48 = vld [vmem:[%s10773_s3 + $0x138] sm:$0xf0]  ;;  %v7744_v52 = vld [vmem:[%s10773_s3 + $0x144] sm:$0xf0] }
 0x24d   : > { %1566 = vmatmul.bf16.gmra.mxu3 %v6156_v53  ;;  %v992_v39 = vpop.f32.mrf.mxu2  ;;  %2789 = vmatpush.bf16.msrb.mxu0 %v7798_v46  ;;  %v7749_v53 = vld [vmem:[%s10773_s3 + $0x174] sm:$0xf] }
 0x24e   : > { %v993_v37 = vadd.f32 %v992_v39, %v8633_v47  ;;  %v6169_v39 = vld [vmem:[%s10773_s3 + $0x178] sm:$0xf0] }
 0x24f   : > { %v1109_v17 = vpop.f32.mrf.mxu1  ;;  %1759 = vmatpush.bf16.msra.mxu2 %v8289_v38  ;;  %v7739_v38 = vld [vmem:[%s10773_s3 + $0x124] sm:$0xf] }
 0x250   : > { %v8831_v58 = vpop.f32.mrf.mxu3  ;;  %1903 = vmatpush.bf16.msrb.mxu1 %v8464_v41  ;;  %v6121_v41 = vld [vmem:[%s10773_s3 + $0x128] sm:$0xf0]  ;;  %v1009_v8 = vpack.c.bf16 %v993_v37, %v993_v37  ;;  %v1110_v27 = vadd.f32 %v1109_v17, %v8675_v63  ;;  %v7793_v17 = vld [vmem:[%s10774_s4 + $0x90] sm:$0xff]  ;;  %v6092_v37 = vor.u32 %v7733_v15, %v6089_v16 }
 0x251   : > { %2790 = vmatpush.bf16.msrb.mxu0 %v7797_v7 }
 0x252   : > { %v8878_v24 = vunpack.c.l.b16 %v1009_v8  ;;  %v1125_v23 = vpack.c.bf16 %v1110_v27, %v1110_v27 }
 0x253   : > { %1760 = vmatpush.bf16.msra.mxu2 %v8283_v30  ;;  %v6084_v30 = vor.u32 %v7731_v62, %v6081_v0 }
 0x254   : > { %1904 = vmatpush.bf16.msrb.mxu1 %v8471_v43  ;;  %v6124_v43 = vor.u32 %v7739_v38, %v6121_v41  ;;  %v8897_v32 = vunpack.c.l.b16 %v1125_v23  ;;  %v6132_v38 = vor.u32 %v7741_v6, %v6129_v48  ;;  %v6172_v41 = vor.u32 %v7749_v53, %v6169_v39  ;;  %v7751_v23 = vld [vmem:[%s10773_s3 + $0x184] sm:$0xf] }
 0x255   : > { %v994_v47 = vpop.f32.mrf.mxu2 }
 0x256   : > { %v995_v10 = vadd.f32 %v994_v47, %v8669_v59  ;;  %v7796_v59 = vld [vmem:[%s10774_s4 + $0xa8] sm:$0xff] }
 0x257   : > { %1761 = vmatpush.bf16.msra.mxu2 %v8277_v22  ;;  %v1112_v31 = vpop.f32.mrf.mxu1  ;;  %2791 = vmatpush.bf16.msrb.mxu0 %v7796_v59  ;;  %v7795_v22 = vld [vmem:[%s10774_s4 + $0xa0] sm:$0xff] }
 0x258   : > { %v8869_v11 = vpop.f32.mrf.mxu3  ;;  %v1010_v29 = vpack.c.bf16 %v995_v10, %v995_v10  ;;  %1905 = vmatpush.bf16.msrb.mxu1 %v8494_v49  ;;  %v1113_v62 = vadd.f32 %v1112_v31, %v8712_v26  ;;  %v7791_v26 = vld [vmem:[%s10774_s4 + $0x80] sm:$0xff] }
 0x259   : > { %v6143_v59 = vld [vmem:[%s10773_s3 + $0x140] sm:$0xf] }
 0x25a   : > { %v8880_v5 = vunpack.c.l.b16 %v1010_v29  ;;  %1341 = vmatmul.bf16.gmra.mxu2 %v6084_v30 }
 0x25b   : > { %1456 = vmatmul.bf16.gmra.mxu1 %v6124_v43  ;;  %2792 = vmatpush.bf16.msrb.mxu0 %v7795_v22 }
 0x25c   : > { %v1952_v63 = vpack.c.b16 %v8880_v5, %v8878_v24  ;;  %1892 = vmatmul.bf16.gmra.mxu0 %v6288_v19 }
 0x25d   : > { %1571 = vmatmul.bf16.gmra.mxu3 %v6164_v35  ;;  %v997_v49 = vpop.f32.mrf.mxu2 }
 0x25e   : > { %v998_v13 = vadd.f32 %v997_v49, %v8686_v2  ;;  %v1976_v2 = vpack.c.b16 %v8897_v32, %v8895_v12  ;;  %v6225_v49 = vld [vmem:[%s10773_s3 + $0x1c8] sm:$0xf0]  ;;  %v7777_v12 = vld [vmem:[%s10774_s4 + $0x10] sm:$0xff] }
 0x25f   : > { %v1114_v42 = vpop.f32.mrf.mxu1  ;;  %2793 = vmatpush.bf16.msrb.mxu0 %v7794_v18  ;;  %v7801_v32 = vld [vmem:[%s10774_s4 + $0xd0] sm:$0xff] }
 0x260   : > { %v8887_v40 = vpop.f32.mrf.mxu3  ;;  %v1011_v60 = vpack.c.bf16 %v998_v13, %v998_v13  ;;  %v1115_v0 = vadd.f32 %v1114_v42, %v8725_v36  ;;  %v6144_v42 = vor.u32 %v7744_v52, %v6143_v59 }
 0x262   : > { %v8934_v7 = vunpack.c.l.b16 %v1011_v60  ;;  %v1127_v10 = vpack.c.bf16 %v1115_v0, %v1115_v0  ;;  %v7789_v0 = vld [vmem:[%s10774_s4 + $0x70] sm:$0xff] }
 0x263   : > { %2794 = vmatpush.bf16.msrb.mxu0 %v7793_v17 }
 0x264   : > { %v8947_v27 = vunpack.c.l.b16 %v1127_v10  ;;  %v6193_v10 = vld [vmem:[%s10773_s3 + $0x198] sm:$0xf0] }
 0x265   : > { %v999_v34 = vpop.f32.mrf.mxu2 }
 0x266   : > { %v1000_v61 = vadd.f32 %v999_v34, %v8716_v33  ;;  %v1126_v33 = vpack.c.bf16 %v1113_v62, %v1113_v62 }
 0x267   : > { %v1117_v1 = vpop.f32.mrf.mxu1  ;;  %2795 = vmatpush.bf16.msrb.mxu0 %v7792_v4  ;;  %v7746_v4 = vld [vmem:[%s10773_s3 + $0x154] sm:$0xf0] }
 0x268   : > { %v8927_v46 = vpop.f32.mrf.mxu3  ;;  %v1012_v47 = vpack.c.bf16 %v1000_v61, %v1000_v61  ;;  %v8945_v14 = vunpack.c.l.b16 %v1126_v33  ;;  %v1118_v18 = vadd.f32 %v1117_v1, %v8747_v50  ;;  %v7790_v50 = vld [vmem:[%s10774_s4 + $0x78] sm:$0xff]  ;;  %v6151_v1 = vld [vmem:[%s10773_s3 + $0x150] sm:$0xf]  ;;  %v7753_v33 = vld [vmem:[%s10773_s3 + $0x194] sm:$0xf] }
 0x269   : > { %2760 = vmatpush.bf16.msrb.mxu3 %v7790_v50  ;;  %v6152_v59 = vor.u32 %v7746_v4, %v6151_v1  ;;  %v6196_v52 = vor.u32 %v7753_v33, %v6193_v10  ;;  %v7748_v50 = vld [vmem:[%s10773_s3 + $0x164] sm:$0xf0] }
 0x26a   : > { %v8936_v8 = vunpack.c.l.b16 %v1012_v47  ;;  %1346 = vmatmul.bf16.gmra.mxu2 %v6092_v37  ;;  %v1977_v22 = vpack.c.b16 %v8947_v27, %v8945_v14  ;;  %v1128_v17 = vpack.c.bf16 %v1118_v18, %v1118_v18  ;;  %v7788_v47 = vld [vmem:[%s10774_s4 + $0x68] sm:$0xff]  ;;  %v7818_v14 = vld [vmem:[%s10774_s4 + $0x158] sm:$0xff] }
 0x26b   : > { %1461 = vmatmul.bf16.gmra.mxu1 %v6132_v38  ;;  %2796 = vmatpush.bf16.msrb.mxu0 %v7791_v26  ;;  %v7761_v26 = vld [vmem:[%s10773_s3 + $0x1d4] sm:$0xf] }
 0x26c   : > { %v1953_v36 = vpack.c.b16 %v8936_v8, %v8934_v7  ;;  %v8986_v61 = vunpack.c.l.b16 %v1128_v17  ;;  %v7784_v17 = vld [vmem:[%s10774_s4 + $0x48] sm:$0xff]  ;;  %v7834_v8 = vld [vmem:[%s10774_s4 + $0x1d8] sm:$0xff] }
 0x26d   : > { %1576 = vmatmul.bf16.gmra.mxu3 %v6172_v41  ;;  %v1002_v30 = vpop.f32.mrf.mxu2 }
 0x26e   : > { %v1003_v31 = vadd.f32 %v1002_v30, %v8727_v20  ;;  %v7759_v20 = vld [vmem:[%s10773_s3 + $0x1c4] sm:$0xf]  ;;  %2761 = vmatpush.bf16.msrb.mxu3 %v7789_v0  ;;  %v6233_v30 = vld [vmem:[%s10773_s3 + $0x1d8] sm:$0xf0] }
 0x26f   : > { %v1119_v29 = vpop.f32.mrf.mxu1  ;;  %v6228_v16 = vor.u32 %v7759_v20, %v6225_v49  ;;  %v7787_v49 = vld [vmem:[%s10774_s4 + $0x60] sm:$0xff] }
 0x270   : > { %v8943_v43 = vpop.f32.mrf.mxu3  ;;  %v1120_v35 = vadd.f32 %v1119_v29, %v8757_v56  ;;  %v6185_v56 = vld [vmem:[%s10773_s3 + $0x188] sm:$0xf0]  ;;  %v1013_v9 = vpack.c.bf16 %v1003_v31, %v1003_v31  ;;  %v7763_v0 = vld [vmem:[%s10773_s3 + $0x1e4] sm:$0xf] }
 0x271   : > { %v6188_v15 = vor.u32 %v7751_v23, %v6185_v56  ;;  %v6236_v23 = vor.u32 %v7761_v26, %v6233_v30 }
 0x272   : > { %v8977_v53 = vunpack.c.l.b16 %v1013_v9  ;;  %v1129_v34 = vpack.c.bf16 %v1120_v35, %v1120_v35  ;;  %2762 = vmatpush.bf16.msrb.mxu3 %v7788_v47 }
 0x274   : > { %v8988_v37 = vunpack.c.l.b16 %v1129_v34  ;;  %v6159_v34 = vld [vmem:[%s10773_s3 + $0x160] sm:$0xf] }
 0x275   : > { %v1004_v45 = vpop.f32.mrf.mxu2  ;;  %v6160_v10 = vor.u32 %v7748_v50, %v6159_v34 }
 0x276   : > { %v1005_v19 = vadd.f32 %v1004_v45, %v8749_v51  ;;  %2763 = vmatpush.bf16.msrb.mxu3 %v7787_v49 }
 0x277   : > { %v8975_v48 = vpop.f32.mrf.mxu1 }
 0x278   : > { %v8973_v13 = vpop.f32.mrf.mxu3  ;;  %v1014_v6 = vpack.c.bf16 %v1005_v19, %v1005_v19 }
 0x27a   : > { %v8979_v39 = vunpack.c.l.b16 %v1014_v6  ;;  %1532 = vmatmul.bf16.vlgmr.msrb.gmra.mxu2 %v6144_v42  ;;  %v7786_v42 = vld [vmem:[%s10774_s4 + $0x58] sm:$0xff] }
 0x27b   : > { %1676 = vmatmul.bf16.vlgmr.msra.gmra.mxu1 %v6188_v15  ;;  %2764 = vmatpush.bf16.msrb.mxu3 %v7786_v42  ;;  %v7757_v42 = vld [vmem:[%s10773_s3 + $0x1b4] sm:$0xf] }
 0x27c   : > { %v1954_v51 = vpack.c.b16 %v8979_v39, %v8977_v53 }
 0x27d   : > { %1791 = vmatmul.bf16.vlgmr.msra.gmra.mxu3 %v6228_v16  ;;  %v1188_v60 = vpop.f32.mrf.mxu2  ;;  %v7785_v16 = vld [vmem:[%s10774_s4 + $0x50] sm:$0xff] }
 0x27e   : > { %v1218_v41 = vadd.f32 %v8780_v25, %v1188_v60  ;;  %v1978_v25 = vpack.c.b16 %v8988_v37, %v8986_v61  ;;  %v7755_v60 = vld [vmem:[%s10773_s3 + $0x1a4] sm:$0xf] }
 0x27f   : > { %v8990_v62 = vpop.f32.mrf.mxu1  ;;  %2765 = vmatpush.bf16.msrb.mxu3 %v7785_v16  ;;  %v6249_v16 = vld [vmem:[%s10773_s3 + $0x1f8] sm:$0xf0] }
 0x280   : > { %v8995_v38 = vpop.f32.mrf.mxu3  ;;  %v1237_v35 = vpack.c.bf16 %v1218_v41, %v1218_v41  ;;  %v6241_v41 = vld [vmem:[%s10773_s3 + $0x1e8] sm:$0xf0] }
 0x281   : > { %v6244_v30 = vor.u32 %v7763_v0, %v6241_v41 }
 0x282   : > { %v1991_v45 = vunpack.c.l.b16 %v1237_v35 }
 0x283   : > { %2766 = vmatpush.bf16.msrb.mxu3 %v7784_v17 }
 0x285   : > { %v1190_v29 = vpop.f32.mrf.mxu2 }
 0x286   : > { %v1220_v31 = vadd.f32 %v8819_v28, %v1190_v29 }
 0x288   : > { %v1238_v56 = vpack.c.bf16 %v1220_v31, %v1220_v31  ;;  %v9022_v20 = vpop.f32.mrf.mxu1  ;;  %v9027_v19 = vpop.f32.mrf.mxu3  ;;  %v7783_v31 = vld [vmem:[%s10774_s4 + $0x40] sm:$0xff] }
 0x289   : > { %2767 = vmatpush.bf16.msrb.mxu3 %v7783_v31  ;;  %v6223_v31 = vld [vmem:[%s10773_s3 + $0x1c0] sm:$0xf] }
 0x28a   : > { %v1992_v9 = vunpack.c.l.b16 %v1238_v56  ;;  %1537 = vmatmul.bf16.gmra.mxu2 %v6152_v59 }
 0x28b   : > { %1681 = vmatmul.bf16.gmra.mxu1 %v6196_v52 }
 0x28c   : > { %v1999_v28 = vpack.c.b16 %v1992_v9, %v1991_v45  ;;  %v6167_v9 = vld [vmem:[%s10773_s3 + $0x170] sm:$0xf] }
 0x28d   : > { %1796 = vmatmul.bf16.gmra.mxu3 %v6236_v23  ;;  %v1193_v18 = vpop.f32.mrf.mxu2 }
 0x28e   : > { %2797 = vmatmul.bf16.vlgmr.msrb.gmra.mxu0 %v1999_v28  ;;  %v1223_v6 = vadd.f32 %v8831_v58, %v1193_v18  ;;  %v6201_v58 = vld [vmem:[%s10773_s3 + $0x1a8] sm:$0xf0]  ;;  %v7750_v28 = vld [vmem:[%s10773_s3 + $0x174] sm:$0xf0]  ;;  %v6209_v18 = vld [vmem:[%s10773_s3 + $0x1b8] sm:$0xf0] }
 0x28f   : > { %v6204_v26 = vor.u32 %v7755_v60, %v6201_v58  ;;  %v6168_v50 = vor.u32 %v7750_v28, %v6167_v9  ;;  %v6212_v60 = vor.u32 %v7757_v42, %v6209_v18 }
 0x290   : > { %v9032_v15 = vpop.f32.mrf.mxu1  ;;  %v9059_v47 = vpop.f32.mrf.mxu3  ;;  %v1239_v4 = vpack.c.bf16 %v1223_v6, %v1223_v6 }
 0x292   : > { %v1993_v59 = vunpack.c.l.b16 %v1239_v4 }
 0x295   : > { %v1195_v1 = vpop.f32.mrf.mxu2 }
 0x296   : > { %v1225_v33 = vadd.f32 %v8869_v11, %v1195_v1 }
 0x298   : > { %v1240_v29 = vpack.c.bf16 %v1225_v33, %v1225_v33  ;;  %v9062_v35 = vpop.f32.mrf.mxu1  ;;  %v9067_v11 = vpop.f32.mrf.mxu3 }
 0x29a   : > { %v1994_v52 = vunpack.c.l.b16 %v1240_v29  ;;  %1542 = vmatmul.bf16.gmra.mxu2 %v6160_v10 }
 0x29b   : > { %1686 = vmatmul.bf16.gmra.mxu1 %v6204_v26 }
 0x29c   : > { %v2000_v23 = vpack.c.b16 %v1994_v52, %v1993_v59  ;;  %v7760_v59 = vld [vmem:[%s10773_s3 + $0x1c4] sm:$0xf0]  ;;  %v7767_v52 = vld [vmem:[%s10773_s3 + $0x204] sm:$0xf] }
 0x29d   : > { %1801 = vmatmul.bf16.gmra.mxu3 %v6244_v30  ;;  %v1198_v56 = vpop.f32.mrf.mxu2  ;;  %v6224_v9 = vor.u32 %v7760_v59, %v6223_v31  ;;  %v7804_v31 = vld [vmem:[%s10774_s4 + $0xe8] sm:$0xff] }
 0x29e   : > { %2802 = vmatmul.bf16.gmra.mxu0 %v2000_v23  ;;  %v1228_v45 = vadd.f32 %v8887_v40, %v1198_v56  ;;  %v7765_v40 = vld [vmem:[%s10773_s3 + $0x1f4] sm:$0xf]  ;;  %v6265_v23 = vld [vmem:[%s10773_s3 + $0x208] sm:$0xf0] }
 0x29f   : > { %v6252_v58 = vor.u32 %v7765_v40, %v6249_v16  ;;  %v6268_v28 = vor.u32 %v7767_v52, %v6265_v23 }
 0x2a0   : > { %v9069_v49 = vpop.f32.mrf.mxu1  ;;  %v1241_v17 = vpack.c.bf16 %v1228_v45, %v1228_v45  ;;  %v9093_v1 = vpop.f32.mrf.mxu3 }
 0x2a2   : > { %v1995_v4 = vunpack.c.l.b16 %v1241_v17 }
 0x2a5   : > { %v1200_v6 = vpop.f32.mrf.mxu2 }
 0x2a6   : > { %v1230_v34 = vadd.f32 %v8927_v46, %v1200_v6 }
 0x2a8   : > { %v1242_v0 = vpack.c.bf16 %v1230_v34, %v1230_v34  ;;  %v9091_v41 = vpop.f32.mrf.mxu1  ;;  %v9098_v29 = vpop.f32.mrf.mxu3  ;;  %v7782_v34 = vld [vmem:[%s10774_s4 + $0x38] sm:$0xff] }
 0x2a9   : > { %2731 = vmatpush.bf16.msrb.mxu2 %v7782_v34 }
 0x2aa   : > { %v1996_v33 = vunpack.c.l.b16 %v1242_v0  ;;  %1547 = vmatmul.bf16.gmra.mxu2 %v6168_v50 }
 0x2ab   : > { %1691 = vmatmul.bf16.gmra.mxu1 %v6212_v60 }
 0x2ac   : > { %v2001_v10 = vpack.c.b16 %v1996_v33, %v1995_v4 }
 0x2ad   : > { %1806 = vmatmul.bf16.gmra.mxu3 %v6252_v58  ;;  %v1203_v26 = vpop.f32.mrf.mxu2  ;;  %2732 = vmatpush.bf16.msrb.mxu2 %v7781_v3 }
 0x2ae   : > { %2807 = vmatmul.bf16.gmra.mxu0 %v2001_v10  ;;  %v1233_v46 = vadd.f32 %v8943_v43, %v1203_v26  ;;  %v6231_v10 = vld [vmem:[%s10773_s3 + $0x1d0] sm:$0xf]  ;;  %v7762_v26 = vld [vmem:[%s10773_s3 + $0x1d4] sm:$0xf0] }
 0x2b0   : > { %v9095_v30 = vpop.f32.mrf.mxu1  ;;  %v1243_v43 = vpack.c.bf16 %v1233_v46, %v1233_v46  ;;  %v9123_v50 = vpop.f32.mrf.mxu3  ;;  %v7769_v46 = vld [vmem:[%s10773_s3 + $0x214] sm:$0xf] }
 0x2b2   : > { %v1997_v16 = vunpack.c.l.b16 %v1243_v43  ;;  %v6232_v43 = vor.u32 %v7762_v26, %v6231_v10  ;;  %v7771_v10 = vld [vmem:[%s10773_s3 + $0x224] sm:$0xf]  ;;  %v7800_v26 = vld [vmem:[%s10774_s4 + $0xc8] sm:$0xff] }
 0x2b5   : > { %v1205_v56 = vpop.f32.mrf.mxu2 }
 0x2b6   : > { %v1235_v45 = vadd.f32 %v8973_v13, %v1205_v56  ;;  %v7806_v13 = vld [vmem:[%s10774_s4 + $0xf8] sm:$0xff] }
 0x2b7   : > { %2818 = vmatpush.bf16.msra.mxu1 %v7806_v13  ;;  %v7778_v13 = vld [vmem:[%s10774_s4 + $0x18] sm:$0xff] }
 0x2b8   : > { %v1244_v42 = vpack.c.bf16 %v1235_v45, %v1235_v45  ;;  %v1447_v18 = vpop.f32.mrf.mxu1  ;;  %v9156_v45 = vpop.f32.mrf.mxu3 }
 0x2b9   : > { %v1448_v40 = vadd.f32 %v1447_v18, %v8995_v38 }
 0x2ba   : > { %v1998_v6 = vunpack.c.l.b16 %v1244_v42  ;;  %1762 = vmatmul.bf16.vlgmr.msra.gmra.mxu2 %v6224_v9 }
 0x2bb   : > { %1906 = vmatmul.bf16.vlgmr.msrb.gmra.mxu1 %v6268_v28  ;;  %v1467_v60 = vpack.c.bf16 %v1448_v40, %v1448_v40  ;;  %v7779_v40 = vld [vmem:[%s10774_s4 + $0x20] sm:$0xff] }
 0x2bc   : > { %v2002_v17 = vpack.c.b16 %v1998_v6, %v1997_v16  ;;  %2819 = vmatpush.bf16.msra.mxu1 %v7805_v21  ;;  %v7803_v16 = vld [vmem:[%s10774_s4 + $0xe0] sm:$0xff] }
 0x2bd   : > { %2768 = vmatmul.bf16.vlgmr.msrb.gmra.mxu3 %v1975_v44  ;;  %v1332_v38 = vpop.f32.mrf.mxu2  ;;  %v9133_v4 = vunpack.c.l.b16 %v1467_v60 }
 0x2be   : > { %2812 = vmatmul.bf16.gmra.mxu0 %v2002_v17  ;;  %v1333_v0 = vadd.f32 %v1332_v38, %v8975_v48  ;;  %v6273_v48 = vld [vmem:[%s10773_s3 + $0x218] sm:$0xf0] }
 0x2bf   : > { %v6276_v28 = vor.u32 %v7769_v46, %v6273_v48  ;;  %v7821_v46 = vld [vmem:[%s10774_s4 + $0x170] sm:$0xff] }
 0x2c0   : > { %v1449_v58 = vpop.f32.mrf.mxu1  ;;  %v1352_v23 = vpack.c.bf16 %v1333_v0, %v1333_v0  ;;  %2820 = vmatpush.bf16.msra.mxu1 %v7804_v31  ;;  %v9198_v0 = vpop.f32.mrf.mxu0 }
 0x2c1   : > { %v1450_v44 = vadd.f32 %v1449_v58, %v9027_v19  ;;  %v7780_v19 = vld [vmem:[%s10774_s4 + $0x28] sm:$0xff]  ;;  %v9191_v58 = vpop.f32.mrf.mxu3 }
 0x2c2   : > { %2733 = vmatpush.bf16.msrb.mxu2 %v7780_v19  ;;  %v9167_v6 = vunpack.c.l.b16 %v1352_v23 }
 0x2c3   : > { %v1468_v33 = vpack.c.bf16 %v1450_v44, %v1450_v44  ;;  %v6239_v44 = vld [vmem:[%s10773_s3 + $0x1e0] sm:$0xf] }
 0x2c4   : > { %2821 = vmatpush.bf16.msra.mxu1 %v7803_v16 }
 0x2c5   : > { %v9153_v59 = vunpack.c.l.b16 %v1468_v33  ;;  %v1334_v52 = vpop.f32.mrf.mxu2  ;;  %v7764_v33 = vld [vmem:[%s10773_s3 + $0x1e4] sm:$0xf0] }
 0x2c6   : > { %v1335_v56 = vadd.f32 %v1334_v52, %v8990_v62  ;;  %2734 = vmatpush.bf16.msrb.mxu2 %v7779_v40  ;;  %v6240_v52 = vor.u32 %v7764_v33, %v6239_v44  ;;  %v7766_v44 = vld [vmem:[%s10773_s3 + $0x1f4] sm:$0xf0] }
 0x2c7   : > { %v2047_v9 = vpack.c.b16 %v9153_v59, %v9133_v4  ;;  %v7844_v59 = vld [vmem:[%s10774_s4 + $0x228] sm:$0xff] }
 0x2c8   : > { %v1353_v42 = vpack.c.bf16 %v1335_v56, %v1335_v56  ;;  %v1452_v18 = vpop.f32.mrf.mxu1 }
 0x2c9   : > { %v1453_v62 = vadd.f32 %v1452_v18, %v9059_v47  ;;  %v7802_v47 = vld [vmem:[%s10774_s4 + $0xd8] sm:$0xff]  ;;  %v7820_v18 = vld [vmem:[%s10774_s4 + $0x168] sm:$0xff] }
 0x2ca   : > { %v9169_v17 = vunpack.c.l.b16 %v1353_v42  ;;  %1767 = vmatmul.bf16.gmra.mxu2 %v6232_v43  ;;  %2822 = vmatpush.bf16.msra.mxu1 %v7802_v47  ;;  %v7799_v42 = vld [vmem:[%s10774_s4 + $0xc0] sm:$0xff] }
 0x2cb   : > { %1911 = vmatmul.bf16.gmra.mxu1 %v6276_v28  ;;  %2735 = vmatpush.bf16.msrb.mxu2 %v7778_v13  ;;  %v7775_v28 = vld [vmem:[%s10774_s4] sm:$0xff]  ;;  %v9233_v13 = vpop.f32.mrf.mxu3  ;;  %v1469_v47 = vpack.c.bf16 %v1453_v62, %v1453_v62 }
 0x2cc   : > { %v2023_v34 = vpack.c.b16 %v9169_v17, %v9167_v6 }
 0x2cd   : > { %2773 = vmatmul.bf16.gmra.mxu3 %v1976_v2  ;;  %v1337_v38 = vpop.f32.mrf.mxu2  ;;  %v7822_v2 = vld [vmem:[%s10774_s4 + $0x178] sm:$0xff]  ;;  %v9245_v62 = vunpack.c.l.b16 %v1469_v47  ;;  %v7815_v47 = vld [vmem:[%s10774_s4 + $0x140] sm:$0xff] }
 0x2ce   : > { %v1338_v21 = vadd.f32 %v1337_v38, %v9022_v20  ;;  %2876 = vmatpush.bf16.msra.mxu3 %v7822_v2  ;;  %2823 = vmatpush.bf16.msra.mxu1 %v7801_v32  ;;  %v7776_v20 = vld [vmem:[%s10774_s4 + $0x8] sm:$0xff] }
 0x2cf   : > { %2736 = vmatpush.bf16.msrb.mxu2 %v7777_v12  ;;  %v9243_v12 = vpop.f32.mrf.mxu0 }
 0x2d0   : > { %v1454_v60 = vpop.f32.mrf.mxu1  ;;  %v1354_v19 = vpack.c.bf16 %v1338_v21, %v1338_v21  ;;  %v6247_v21 = vld [vmem:[%s10773_s3 + $0x1f0] sm:$0xf] }
 0x2d1   : > { %v1455_v3 = vadd.f32 %v1454_v60, %v9067_v11  ;;  %v6281_v11 = vld [vmem:[%s10773_s3 + $0x228] sm:$0xf0] }
 0x2d2   : > { %2877 = vmatpush.bf16.msra.mxu3 %v7821_v46  ;;  %v6284_v23 = vor.u32 %v7771_v10, %v6281_v11  ;;  %2824 = vmatpush.bf16.msra.mxu1 %v7800_v26  ;;  %v9229_v40 = vunpack.c.l.b16 %v1354_v19  ;;  %v7773_v10 = vld [vmem:[%s10773_s3 + $0x234] sm:$0xf] }
 0x2d3   : > { %2737 = vmatpush.bf16.msrb.mxu2 %v7776_v20  ;;  %v1470_v38 = vpack.c.bf16 %v1455_v3, %v1455_v3  ;;  %v9271_v11 = vpop.f32.mrf.mxu3 }
 0x2d5   : > { %v1339_v48 = vpop.f32.mrf.mxu2  ;;  %v9247_v2 = vunpack.c.l.b16 %v1470_v38 }
 0x2d6   : > { %v1340_v31 = vadd.f32 %v1339_v48, %v9032_v15  ;;  %2878 = vmatpush.bf16.msra.mxu3 %v7820_v18  ;;  %2825 = vmatpush.bf16.msra.mxu1 %v7799_v42  ;;  %v6248_v48 = vor.u32 %v7766_v44, %v6247_v21  ;;  %v7828_v21 = vld [vmem:[%s10774_s4 + $0x1a8] sm:$0xff] }
 0x2d7   : > { %2738 = vmatpush.bf16.msrb.mxu2 %v7775_v28  ;;  %v2048_v33 = vpack.c.b16 %v9247_v2, %v9245_v62  ;;  %v9274_v19 = vpop.f32.mrf.mxu0  ;;  %v7840_v62 = vld [vmem:[%s10774_s4 + $0x208] sm:$0xff] }
 0x2d8   : > { %v1355_v56 = vpack.c.bf16 %v1340_v31, %v1340_v31  ;;  %v1457_v43 = vpop.f32.mrf.mxu1 }
 0x2d9   : > { %v1458_v15 = vadd.f32 %v1457_v43, %v9093_v1  ;;  %v7819_v1 = vld [vmem:[%s10774_s4 + $0x160] sm:$0xff] }
 0x2da   : > { %v9231_v16 = vunpack.c.l.b16 %v1355_v56  ;;  %1772 = vmatmul.bf16.gmra.mxu2 %v6240_v52  ;;  %2879 = vmatpush.bf16.msra.mxu3 %v7819_v1  ;;  %v7816_v56 = vld [vmem:[%s10774_s4 + $0x148] sm:$0xff] }
 0x2db   : > { %1916 = vmatmul.bf16.gmra.mxu1 %v6284_v23 }
 0x2dc   : > { %v2024_v60 = vpack.c.b16 %v9231_v16, %v9229_v40  ;;  %v7838_v40 = vld [vmem:[%s10774_s4 + $0x1f8] sm:$0xff] }
 0x2dd   : > { %2778 = vmatmul.bf16.gmra.mxu3 %v1977_v22  ;;  %v1342_v32 = vpop.f32.mrf.mxu2  ;;  %2934 = vmatpush.bf16.msrb.mxu1 %v7838_v40 }
 0x2de   : > { %v1343_v22 = vadd.f32 %v1342_v32, %v9062_v35  ;;  %2880 = vmatpush.bf16.msra.mxu3 %v7818_v14  ;;  %v6289_v35 = vld [vmem:[%s10773_s3 + $0x238] sm:$0xf0] }
 0x2df   : > { %v6292_v31 = vor.u32 %v7773_v10, %v6289_v35 }
 0x2e0   : > { %v1459_v3 = vpop.f32.mrf.mxu1  ;;  %v1356_v26 = vpack.c.bf16 %v1343_v22, %v1343_v22 }
 0x2e1   : > { %v1460_v27 = vadd.f32 %v1459_v3, %v9098_v29  ;;  %v7817_v29 = vld [vmem:[%s10774_s4 + $0x150] sm:$0xff]  ;;  %v9304_v3 = vpop.f32.mrf.mxu0 }
 0x2e2   : > { %2881 = vmatpush.bf16.msra.mxu3 %v7817_v29  ;;  %v9280_v28 = vunpack.c.l.b16 %v1356_v26 }
 0x2e3   : > { %v1472_v18 = vpack.c.bf16 %v1460_v27, %v1460_v27 }
 0x2e5   : > { %v1344_v20 = vpop.f32.mrf.mxu2  ;;  %v9299_v61 = vunpack.c.l.b16 %v1472_v18 }
 0x2e6   : > { %v1345_v46 = vadd.f32 %v1344_v20, %v9069_v49  ;;  %2882 = vmatpush.bf16.msra.mxu3 %v7816_v56  ;;  %v1471_v49 = vpack.c.bf16 %v1458_v15, %v1458_v15  ;;  %v9295_v15 = vpop.f32.mrf.mxu3 }
 0x2e8   : > { %v1357_v52 = vpack.c.bf16 %v1345_v46, %v1345_v46  ;;  %v1462_v23 = vpop.f32.mrf.mxu1  ;;  %v9297_v32 = vunpack.c.l.b16 %v1471_v49 }
 0x2e9   : > { %v1463_v43 = vadd.f32 %v1462_v23, %v9123_v50  ;;  %v7830_v50 = vld [vmem:[%s10774_s4 + $0x1b8] sm:$0xff] }
 0x2ea   : > { %v9282_v42 = vunpack.c.l.b16 %v1357_v52  ;;  %1777 = vmatmul.bf16.gmra.mxu2 %v6248_v48  ;;  %2883 = vmatpush.bf16.msra.mxu3 %v7815_v47  ;;  %v2049_v22 = vpack.c.b16 %v9299_v61, %v9297_v32  ;;  %v9326_v48 = vpop.f32.mrf.mxu0  ;;  %v7814_v52 = vld [vmem:[%s10774_s4 + $0x138] sm:$0xff] }
 0x2eb   : > { %1921 = vmatmul.bf16.gmra.mxu1 %v6292_v31  ;;  %2905 = vmatpush.bf16.msra.mxu0 %v7830_v50  ;;  %v7826_v23 = vld [vmem:[%s10774_s4 + $0x198] sm:$0xff] }
 0x2ec   : > { %v2025_v38 = vpack.c.b16 %v9282_v42, %v9280_v28  ;;  %2847 = vmatpush.bf16.msra.mxu2 %v7814_v52  ;;  %v7810_v52 = vld [vmem:[%s10774_s4 + $0x118] sm:$0xff] }
 0x2ed   : > { %2783 = vmatmul.bf16.gmra.mxu3 %v1978_v25  ;;  %v1347_v1 = vpop.f32.mrf.mxu2  ;;  %v7829_v25 = vld [vmem:[%s10774_s4 + $0x1b0] sm:$0xff] }
 0x2ee   : > { %v1348_v27 = vadd.f32 %v1347_v1, %v9091_v41  ;;  %v9317_v41 = vpop.f32.mrf.mxu3 }
 0x2ef   : > { %2906 = vmatpush.bf16.msra.mxu0 %v7829_v25  ;;  %v7824_v25 = vld [vmem:[%s10774_s4 + $0x188] sm:$0xff] }
 0x2f0   : > { %v1464_v37 = vpop.f32.mrf.mxu1  ;;  %v1358_v10 = vpack.c.bf16 %v1348_v27, %v1348_v27 }
 0x2f1   : > { %v1465_v14 = vadd.f32 %v1464_v37, %v9156_v45  ;;  %v7827_v45 = vld [vmem:[%s10774_s4 + $0x1a0] sm:$0xff]  ;;  %v7812_v37 = vld [vmem:[%s10774_s4 + $0x128] sm:$0xff] }
 0x2f2   : > { %v9319_v26 = vunpack.c.l.b16 %v1358_v10 }
 0x2f3   : > { %2907 = vmatpush.bf16.msra.mxu0 %v7828_v21  ;;  %v1474_v31 = vpack.c.bf16 %v1465_v14, %v1465_v14  ;;  %v9362_v14 = vpop.f32.mrf.mxu0 }
 0x2f5   : > { %v1349_v44 = vpop.f32.mrf.mxu2  ;;  %v9342_v6 = vunpack.c.l.b16 %v1474_v31 }
 0x2f6   : > { %v1350_v35 = vadd.f32 %v1349_v44, %v9095_v30  ;;  %v1473_v30 = vpack.c.bf16 %v1463_v43, %v1463_v43  ;;  %v7825_v43 = vld [vmem:[%s10774_s4 + $0x190] sm:$0xff]  ;;  %v9352_v47 = vpop.f32.mrf.mxu3 }
 0x2f7   : > { %2908 = vmatpush.bf16.msra.mxu0 %v7827_v45 }
 0x2f8   : > { %v1359_v29 = vpack.c.bf16 %v1350_v35, %v1350_v35  ;;  %v1677_v20 = vpop.f32.mrf.mxu1  ;;  %v9340_v56 = vunpack.c.l.b16 %v1473_v30 }
 0x2f9   : > { %v1678_v55 = vadd.f32 %v1677_v20, %v9198_v0  ;;  %v7823_v20 = vld [vmem:[%s10774_s4 + $0x180] sm:$0xff] }
 0x2fa   : > { %v9321_v46 = vunpack.c.l.b16 %v1359_v29  ;;  %2739 = vmatmul.bf16.vlgmr.msrb.gmra.mxu2 %v1951_v57  ;;  %v2050_v1 = vpack.c.b16 %v9342_v6, %v9340_v56  ;;  %v7811_v29 = vld [vmem:[%s10774_s4 + $0x120] sm:$0xff] }
 0x2fb   : > { %2826 = vmatmul.bf16.vlgmr.msra.gmra.mxu1 %v2023_v34  ;;  %2909 = vmatpush.bf16.msra.mxu0 %v7826_v23  ;;  %v7813_v34 = vld [vmem:[%s10774_s4 + $0x130] sm:$0xff]  ;;  %v1697_v49 = vpack.c.bf16 %v1678_v55, %v1678_v55 }
 0x2fc   : > { %v2026_v54 = vpack.c.b16 %v9321_v46, %v9319_v26  ;;  %2848 = vmatpush.bf16.msra.mxu2 %v7813_v34 }
 0x2fd   : > { %v1533_v57 = vpop.f32.mrf.mxu2 }
 0x2fe   : > { %v1563_v0 = vadd.f32 %v9191_v58, %v1533_v57  ;;  %v9380_v23 = vpop.f32.mrf.mxu3  ;;  %v9382_v57 = vpop.f32.mrf.mxu0 }
 0x2ff   : > { %2910 = vmatpush.bf16.msra.mxu0 %v7825_v43  ;;  %v7837_v43 = vld [vmem:[%s10774_s4 + $0x1f0] sm:$0xff] }
 0x300   : > { %v1679_v17 = vpop.f32.mrf.mxu1  ;;  %v1582_v21 = vpack.c.bf16 %v1563_v0, %v1563_v0  ;;  %2849 = vmatpush.bf16.msra.mxu2 %v7812_v37  ;;  %2935 = vmatpush.bf16.msrb.mxu1 %v7837_v43 }
 0x301   : > { %v1680_v18 = vadd.f32 %v1679_v17, %v9243_v12  ;;  %v2087_v12 = vunpack.c.l.b16 %v1697_v49 }
 0x302   : > { %v2063_v30 = vunpack.c.l.b16 %v1582_v21 }
 0x303   : > { %v1698_v50 = vpack.c.bf16 %v1680_v18, %v1680_v18  ;;  %2911 = vmatpush.bf16.msra.mxu0 %v7824_v25 }
 0x304   : > { %2850 = vmatpush.bf16.msra.mxu2 %v7811_v29 }
 0x305   : > { %v2088_v58 = vunpack.c.l.b16 %v1698_v50  ;;  %v1535_v27 = vpop.f32.mrf.mxu2 }
 0x306   : > { %v1565_v44 = vadd.f32 %v9233_v13, %v1535_v27  ;;  %v1665_v27 = vpop.f32.mrf.mxu0 }
 0x307   : > { %v2095_v45 = vpack.c.b16 %v2088_v58, %v2087_v12  ;;  %2912 = vmatpush.bf16.msra.mxu0 %v7823_v20  ;;  %v7807_v12 = vld [vmem:[%s10774_s4 + $0x100] sm:$0xff]  ;;  %v7836_v58 = vld [vmem:[%s10774_s4 + $0x1e8] sm:$0xff] }
 0x308   : > { %v1583_v10 = vpack.c.bf16 %v1565_v44, %v1565_v44  ;;  %v1682_v35 = vpop.f32.mrf.mxu1  ;;  %2851 = vmatpush.bf16.msra.mxu2 %v7810_v52  ;;  %2936 = vmatpush.bf16.msrb.mxu1 %v7836_v58 }
 0x309   : > { %v1683_v24 = vadd.f32 %v1682_v35, %v9274_v19  ;;  %v7808_v19 = vld [vmem:[%s10774_s4 + $0x108] sm:$0xff]  ;;  %v7835_v35 = vld [vmem:[%s10774_s4 + $0x1e0] sm:$0xff] }
 0x30a   : > { %v2064_v31 = vunpack.c.l.b16 %v1583_v10  ;;  %2744 = vmatmul.bf16.gmra.mxu2 %v1952_v63  ;;  %2913 = vmatmul.bf16.vlgmr.msra.gmra.mxu0 %v2095_v45  ;;  %v7809_v63 = vld [vmem:[%s10774_s4 + $0x110] sm:$0xff] }
 0x30b   : > { %2831 = vmatmul.bf16.gmra.mxu1 %v2024_v60  ;;  %v1699_v17 = vpack.c.bf16 %v1683_v24, %v1683_v24 }
 0x30c   : > { %v2071_v13 = vpack.c.b16 %v2064_v31, %v2063_v30  ;;  %2852 = vmatpush.bf16.msra.mxu2 %v7809_v63  ;;  %2937 = vmatpush.bf16.msrb.mxu1 %v7835_v35  ;;  %v7833_v31 = vld [vmem:[%s10774_s4 + $0x1d0] sm:$0xff] }
 0x30d   : > { %v1538_v55 = vpop.f32.mrf.mxu2 }
 0x30e   : > { %2884 = vmatmul.bf16.vlgmr.msra.gmra.mxu3 %v2071_v13  ;;  %v1568_v60 = vadd.f32 %v9271_v11, %v1538_v55  ;;  %v2089_v11 = vunpack.c.l.b16 %v1699_v17  ;;  %v7831_v17 = vld [vmem:[%s10774_s4 + $0x1c0] sm:$0xff] }
 0x310   : > { %v1684_v5 = vpop.f32.mrf.mxu1  ;;  %v1584_v18 = vpack.c.bf16 %v1568_v60, %v1568_v60  ;;  %2853 = vmatpush.bf16.msra.mxu2 %v7808_v19  ;;  %2938 = vmatpush.bf16.msrb.mxu1 %v7834_v8 }
 0x311   : > { %v1685_v16 = vadd.f32 %v1684_v5, %v9304_v3  ;;  %v9400_v3 = vpop.f32.mrf.mxu3 }
 0x312   : > { %v2065_v21 = vunpack.c.l.b16 %v1584_v18 }
 0x313   : > { %v1700_v34 = vpack.c.bf16 %v1685_v16, %v1685_v16 }
 0x314   : > { %2854 = vmatpush.bf16.msra.mxu2 %v7807_v12  ;;  %2939 = vmatpush.bf16.msrb.mxu1 %v7833_v31 }
 0x315   : > { %v1540_v49 = vpop.f32.mrf.mxu2  ;;  %v2090_v50 = vunpack.c.l.b16 %v1700_v34 }
 0x316   : > { %v1570_v0 = vadd.f32 %v9295_v15, %v1540_v49 }
 0x317   : > { %v2096_v15 = vpack.c.b16 %v2090_v50, %v2089_v11 }
 0x318   : > { %v1585_v37 = vpack.c.bf16 %v1570_v0, %v1570_v0  ;;  %v1687_v25 = vpop.f32.mrf.mxu1 }
 0x319   : > { %v1688_v20 = vadd.f32 %v1687_v25, %v9326_v48 }
 0x31a   : > { %v2066_v44 = vunpack.c.l.b16 %v1585_v37  ;;  %2749 = vmatmul.bf16.gmra.mxu2 %v1953_v36  ;;  %2918 = vmatmul.bf16.gmra.mxu0 %v2096_v15  ;;  %v1792_v36 = vpop.f32.mrf.mxu3 }
 0x31b   : > { %2836 = vmatmul.bf16.gmra.mxu1 %v2025_v38  ;;  %v9423_v38 = vpop.f32.mrf.mxu0  ;;  %v1701_v45 = vpack.c.bf16 %v1688_v20, %v1688_v20 }
 0x31c   : > { %v2072_v10 = vpack.c.b16 %v2066_v44, %v2065_v21  ;;  %v7846_v21 = vld [vmem:[%s10774_s4 + $0x238] sm:$0xff] }
 0x31d   : > { %v1543_v29 = vpop.f32.mrf.mxu2  ;;  %v2091_v55 = vunpack.c.l.b16 %v1701_v45  ;;  %2963 = vmatpush.bf16.msrb.mxu2 %v7846_v21 }
 0x31e   : > { %2889 = vmatmul.bf16.gmra.mxu3 %v2072_v10  ;;  %v1573_v42 = vadd.f32 %v9317_v41, %v1543_v29  ;;  %v7832_v41 = vld [vmem:[%s10774_s4 + $0x1c8] sm:$0xff]  ;;  %v7845_v10 = vld [vmem:[%s10774_s4 + $0x230] sm:$0xff] }
 0x31f   : > { %2940 = vmatpush.bf16.msrb.mxu1 %v7832_v41 }
 0x320   : > { %v1689_v7 = vpop.f32.mrf.mxu1  ;;  %v1586_v13 = vpack.c.bf16 %v1573_v42, %v1573_v42 }
 0x321   : > { %v1690_v28 = vadd.f32 %v1689_v7, %v9362_v14  ;;  %2964 = vmatpush.bf16.msrb.mxu2 %v7845_v10 }
 0x322   : > { %v2067_v63 = vunpack.c.l.b16 %v1586_v13  ;;  %v1794_v16 = vpop.f32.mrf.mxu3 }
 0x323   : > { %v1702_v30 = vpack.c.bf16 %v1690_v28, %v1690_v28  ;;  %v9441_v34 = vpop.f32.mrf.mxu0  ;;  %2941 = vmatpush.bf16.msrb.mxu1 %v7831_v17  ;;  %v7843_v28 = vld [vmem:[%s10774_s4 + $0x220] sm:$0xff] }
 0x325   : > { %v1545_v48 = vpop.f32.mrf.mxu2  ;;  %v2092_v24 = vunpack.c.l.b16 %v1702_v30  ;;  %2965 = vmatpush.bf16.msrb.mxu2 %v7844_v59 }
 0x326   : > { %v1575_v52 = vadd.f32 %v9352_v47, %v1545_v48  ;;  %v7842_v48 = vld [vmem:[%s10774_s4 + $0x218] sm:$0xff] }
 0x327   : > { %v2097_v47 = vpack.c.b16 %v2092_v24, %v2091_v55  ;;  %v7841_v55 = vld [vmem:[%s10774_s4 + $0x210] sm:$0xff] }
 0x328   : > { %v1587_v5 = vpack.c.bf16 %v1575_v52, %v1575_v52  ;;  %v1692_v14 = vpop.f32.mrf.mxu1 }
 0x329   : > { %v1693_v53 = vadd.f32 %v1692_v14, %v9382_v57  ;;  %2966 = vmatpush.bf16.msrb.mxu2 %v7843_v28 }
 0x32a   : > { %v2068_v40 = vunpack.c.l.b16 %v1587_v5  ;;  %2754 = vmatmul.bf16.gmra.mxu2 %v1954_v51  ;;  %2923 = vmatmul.bf16.gmra.mxu0 %v2097_v47 }
 0x32b   : > { %2841 = vmatmul.bf16.gmra.mxu1 %v2026_v54  ;;  %v1703_v26 = vpack.c.bf16 %v1693_v53, %v1693_v53  ;;  %v1797_v54 = vpop.f32.mrf.mxu3  ;;  %v9446_v11 = vpop.f32.mrf.mxu0 }
 0x32c   : > { %v2073_v60 = vpack.c.b16 %v2068_v40, %v2067_v63 }
 0x32d   : > { %v1548_v19 = vpop.f32.mrf.mxu2  ;;  %v2093_v50 = vunpack.c.l.b16 %v1703_v26  ;;  %2967 = vmatpush.bf16.msrb.mxu2 %v7842_v48 }
 0x32e   : > { %2894 = vmatmul.bf16.gmra.mxu3 %v2073_v60  ;;  %v1578_v43 = vadd.f32 %v9380_v23, %v1548_v19 }
 0x330   : > { %v1694_v39 = vpop.f32.mrf.mxu1  ;;  %v1588_v18 = vpack.c.bf16 %v1578_v43, %v1578_v43 }
 0x331   : > { %v1695_v51 = vadd.f32 %v1694_v39, %v1665_v27  ;;  %2968 = vmatpush.bf16.msrb.mxu2 %v7841_v55 }
 0x332   : > { %v2069_v58 = vunpack.c.l.b16 %v1588_v18 }
 0x333   : > { %v1704_v46 = vpack.c.bf16 %v1695_v51, %v1695_v51  ;;  %v1799_v44 = vpop.f32.mrf.mxu3  ;;  %v9459_v35 = vpop.f32.mrf.mxu0 }
 0x335   : > { %v1550_v49 = vpop.f32.mrf.mxu2  ;;  %v2094_v37 = vunpack.c.l.b16 %v1704_v46  ;;  %2969 = vmatpush.bf16.msrb.mxu2 %v7840_v62 }
 0x336   : > { %v1580_v0 = vadd.f32 %v9400_v3, %v1550_v49 }
 0x337   : > { %v2098_v23 = vpack.c.b16 %v2094_v37, %v2093_v50 }
 0x338   : > { %v1589_v25 = vpack.c.bf16 %v1580_v0, %v1580_v0  ;;  %v9448_v12 = vpop.f32.mrf.mxu1 }
 0x33a   : > { %v2070_v57 = vunpack.c.l.b16 %v1589_v25  ;;  %2855 = vmatmul.bf16.vlgmr.msra.gmra.mxu2 %v2047_v9  ;;  %2928 = vmatmul.bf16.gmra.mxu0 %v2098_v23 }
 0x33b   : > { %v1802_v42 = vpop.f32.mrf.mxu3 }
 0x33c   : > { %v2074_v27 = vpack.c.b16 %v2070_v57, %v2069_v58 }
 0x33d   : > { %v1763_v3 = vpop.f32.mrf.mxu2 }
 0x33e   : > { %2899 = vmatmul.bf16.gmra.mxu3 %v2074_v27  ;;  %v1793_v4 = vadd.f32 %v1792_v36, %v1763_v3  ;;  %v9472_v36 = vpop.f32.mrf.mxu0 }
 0x340   : > { %v1909_v15 = vpop.f32.mrf.mxu1  ;;  %v1812_v29 = vpack.c.bf16 %v1793_v4, %v1793_v4 }
 0x341   : > { %v1910_v37 = vadd.f32 %v1909_v15, %v9441_v34  ;;  %v9508_v34 = vld [vmem:[%s10775_s5] ss:$0 sm:$0xff] }
 0x342   : > { %v2111_v45 = vunpack.c.l.b16 %v1812_v29 }
 0x343   : > { %v1804_v5 = vpop.f32.mrf.mxu3  ;;  %v1928_v23 = vpack.c.bf16 %v1910_v37, %v1910_v37 }
 0x345   : > { %v1765_v9 = vpop.f32.mrf.mxu2  ;;  %v2136_v4 = vunpack.c.l.b16 %v1928_v23 }
 0x346   : > { %v1795_v20 = vadd.f32 %v1794_v16, %v1765_v9  ;;  %v9483_v2 = vpop.f32.mrf.mxu0  ;;  %v7839_v16 = vld [vmem:[%s10774_s4 + $0x200] sm:$0xff] }
 0x347   : > { %2970 = vmatpush.bf16.msrb.mxu2 %v7839_v16 }
 0x348   : > { %v1813_v7 = vpack.c.bf16 %v1795_v20, %v1795_v20  ;;  %v9464_v8 = vpop.f32.mrf.mxu1 }
 0x349   : > { %v1913_v20 = vadd.f32 %v9464_v8, %v9446_v11 }
 0x34a   : > { %v2112_v30 = vunpack.c.l.b16 %v1813_v7  ;;  %2860 = vmatmul.bf16.gmra.mxu2 %v2048_v33 }
 0x34b   : > { %v1807_v19 = vpop.f32.mrf.mxu3 }
 0x34c   : > { %v2119_v31 = vpack.c.b16 %v2112_v30, %v2111_v45 }
 0x34d   : > { %v1768_v13 = vpop.f32.mrf.mxu2 }
 0x34e   : > { %2942 = vmatmul.bf16.vlgmr.msrb.gmra.mxu1 %v2119_v31  ;;  %v1798_v24 = vadd.f32 %v1797_v54, %v1768_v13  ;;  %v9493_v39 = vpop.f32.mrf.mxu0  ;;  %v1929_v31 = vpack.c.bf16 %v1913_v20, %v1913_v20 }
 0x350   : > { %v1914_v52 = vpop.f32.mrf.mxu1  ;;  %v1814_v14 = vpack.c.bf16 %v1798_v24, %v1798_v24 }
 0x351   : > { %v1915_v7 = vadd.f32 %v1914_v52, %v9459_v35 }
 0x352   : > { %v2113_v47 = vunpack.c.l.b16 %v1814_v14 }
 0x353   : > { %v1809_v49 = vpop.f32.mrf.mxu3  ;;  %v1930_v48 = vpack.c.bf16 %v1915_v7, %v1915_v7 }
 0x355   : > { %v1770_v33 = vpop.f32.mrf.mxu2  ;;  %v2138_v62 = vunpack.c.l.b16 %v1930_v48 }
 0x356   : > { %v1800_v41 = vadd.f32 %v1799_v44, %v1770_v33  ;;  %v9497_v50 = vpop.f32.mrf.mxu0 }
 0x358   : > { %v1815_v63 = vpack.c.bf16 %v1800_v41, %v1800_v41  ;;  %v9485_v40 = vpop.f32.mrf.mxu1 }
 0x359   : > { %v1918_v41 = vadd.f32 %v9485_v40, %v9472_v36 }
 0x35a   : > { %v2114_v60 = vunpack.c.l.b16 %v1815_v63  ;;  %2865 = vmatmul.bf16.gmra.mxu2 %v2049_v22  ;;  %v1908_v22 = vadd.f32 %v9448_v12, %v9423_v38 }
 0x35b   : > { %v2769_v21 = vpop.f32.mrf.mxu3 }
 0x35c   : > { %v2120_v17 = vpack.c.b16 %v2114_v60, %v2113_v47  ;;  %v1927_v57 = vpack.c.bf16 %v1908_v22, %v1908_v22 }
 0x35d   : > { %v1773_v53 = vpop.f32.mrf.mxu2 }
 0x35e   : > { %2947 = vmatmul.bf16.gmra.mxu1 %v2120_v17  ;;  %v1803_v43 = vadd.f32 %v1802_v42, %v1773_v53  ;;  %v2798_v44 = vpop.f32.mrf.mxu0  ;;  %v2135_v10 = vunpack.c.l.b16 %v1927_v57  ;;  %v1931_v17 = vpack.c.bf16 %v1918_v41, %v1918_v41 }
 0x360   : > { %v1919_v51 = vpop.f32.mrf.mxu1  ;;  %v1816_v46 = vpack.c.bf16 %v1803_v43, %v1803_v43  ;;  %v2143_v6 = vpack.c.b16 %v2136_v4, %v2135_v10 }
 0x361   : > { %v1920_v63 = vadd.f32 %v1919_v51, %v9483_v2 }
 0x362   : > { %v2115_v32 = vunpack.c.l.b16 %v1816_v46  ;;  %v2139_v46 = vunpack.c.l.b16 %v1931_v17 }
 0x363   : > { %v9510_v15 = vpop.f32.mrf.mxu3 }
 0x365   : > { %v1775_v26 = vpop.f32.mrf.mxu2 }
 0x366   : > { %v1805_v54 = vadd.f32 %v1804_v5, %v1775_v26  ;;  %v9515_v42 = vpop.f32.mrf.mxu0  ;;  %v2137_v5 = vunpack.c.l.b16 %v1929_v31 }
 0x368   : > { %v1817_v18 = vpack.c.bf16 %v1805_v54, %v1805_v54  ;;  %v9495_v0 = vpop.f32.mrf.mxu1  ;;  %v2144_v8 = vpack.c.b16 %v2138_v62, %v2137_v5 }
 0x369   : > { %v1923_v51 = vadd.f32 %v9495_v0, %v9493_v39 }
 0x36a   : > { %v2116_v61 = vunpack.c.l.b16 %v1817_v18  ;;  %2870 = vmatmul.bf16.gmra.mxu2 %v2050_v1 }
 0x36b   : > { %v2774_v14 = vpop.f32.mrf.mxu3 }
 0x36c   : > { %v2121_v25 = vpack.c.b16 %v2116_v61, %v2115_v32 }
 0x36d   : > { %v1778_v58 = vpop.f32.mrf.mxu2 }
 0x36e   : > { %2952 = vmatmul.bf16.gmra.mxu1 %v2121_v25  ;;  %v1808_v3 = vadd.f32 %v1807_v19, %v1778_v58  ;;  %v2803_v35 = vpop.f32.mrf.mxu0  ;;  %v1932_v19 = vpack.c.bf16 %v1920_v63, %v1920_v63  ;;  %v1933_v58 = vpack.c.bf16 %v1923_v51, %v1923_v51 }
 0x370   : > { %v1924_v27 = vpop.f32.mrf.mxu1  ;;  %v1818_v9 = vpack.c.bf16 %v1808_v3, %v1808_v3  ;;  %v2140_v54 = vunpack.c.l.b16 %v1932_v19 }
 0x371   : > { %v1925_v61 = vadd.f32 %v1924_v27, %v9497_v50 }
 0x372   : > { %v2117_v38 = vunpack.c.l.b16 %v1818_v9  ;;  %v2145_v36 = vpack.c.b16 %v2140_v54, %v2139_v46 }
 0x373   : > { %v9526_v60 = vpop.f32.mrf.mxu3  ;;  %v1934_v57 = vpack.c.bf16 %v1925_v61, %v1925_v61 }
 0x375   : > { %v1780_v59 = vpop.f32.mrf.mxu2  ;;  %v2142_v10 = vunpack.c.l.b16 %v1934_v57 }
 0x376   : > { %v1810_v56 = vadd.f32 %v1809_v49, %v1780_v59  ;;  %v9528_v43 = vpop.f32.mrf.mxu0 }
 0x378   : > { %v1819_v1 = vpack.c.bf16 %v1810_v56, %v1810_v56  ;;  %v2827_v29 = vpop.f32.mrf.mxu1 }
 0x37a   : > { %v2118_v12 = vunpack.c.l.b16 %v1819_v1  ;;  %2971 = vmatmul.bf16.vlgmr.msrb.gmra.mxu2 %v2143_v6 }
 0x37b   : > { %v2779_v2 = vpop.f32.mrf.mxu3 }
 0x37c   : > { %v2122_v28 = vpack.c.b16 %v2118_v12, %v2117_v38 }
 0x37d   : > { %v2740_v45 = vpop.f32.mrf.mxu2 }
 0x37e   : > { %v2741_v30 = vadd.f32 %v9508_v34, %v2740_v45  ;;  %2957 = vmatmul.bf16.gmra.mxu1 %v2122_v28  ;;  %v2808_v40 = vpop.f32.mrf.mxu0 }
 0x380   : > { %v2770_v13 = vadd.f32 %v2769_v21, %v2741_v30  ;;  %v9518_v55 = vpop.f32.mrf.mxu1 }
 0x382   : > { %v2799_v24 = vadd.f32 %v2798_v44, %v2770_v13  ;;  %v2141_v44 = vunpack.c.l.b16 %v1933_v58 }
 0x383   : > { %v9538_v3 = vpop.f32.mrf.mxu3 }
 0x384   : > { %v2828_v33 = vadd.f32 %v2827_v29, %v2799_v24  ;;  %v2146_v56 = vpack.c.b16 %v2142_v10, %v2141_v44 }
 0x385   : > { %v9520_v11 = vpop.f32.mrf.mxu2 }
 0x386   : > { %v9540_v59 = vpop.f32.mrf.mxu0 }
 0x388   : > { %v2832_v52 = vpop.f32.mrf.mxu1 }
 0x38a   : > { %2976 = vmatmul.bf16.gmra.mxu2 %v2144_v8 }
 0x38b   : > { %v2784_v0 = vpop.f32.mrf.mxu3 }
 0x38d   : > { %v2745_v16 = vpop.f32.mrf.mxu2 }
 0x38e   : > { %v2746_v47 = vadd.f32 %v9508_v34, %v2745_v16  ;;  %v2813_v6 = vpop.f32.mrf.mxu0 }
 0x390   : > { %v2775_v53 = vadd.f32 %v2774_v14, %v2746_v47  ;;  %v9530_v18 = vpop.f32.mrf.mxu1 }
 0x392   : > { %v2804_v26 = vadd.f32 %v2803_v35, %v2775_v53 }
 0x393   : > { %v2786_v7 = vpop.f32.mrf.mxu3 }
 0x394   : > { %v2833_v49 = vadd.f32 %v2832_v52, %v2804_v26 }
 0x395   : > { %v9532_v32 = vpop.f32.mrf.mxu2 }
 0x396   : > { %v2815_v28 = vpop.f32.mrf.mxu0 }
 0x398   : > { %v2837_v25 = vpop.f32.mrf.mxu1 }
 0x39a   : > { %2981 = vmatmul.bf16.gmra.mxu2 %v2145_v36 }
 0x39b   : > { %v2885_v31 = vpop.f32.mrf.mxu3 }
 0x39d   : > { %v2750_v22 = vpop.f32.mrf.mxu2 }
 0x39e   : > { %v2751_v37 = vadd.f32 %v9508_v34, %v2750_v22  ;;  %v2914_v13 = vpop.f32.mrf.mxu0 }
 0x3a0   : > { %v2780_v23 = vadd.f32 %v2779_v2, %v2751_v37  ;;  %v9542_v39 = vpop.f32.mrf.mxu1 }
 0x3a2   : > { %v2809_v21 = vadd.f32 %v2808_v40, %v2780_v23 }
 0x3a3   : > { %v9549_v53 = vpop.f32.mrf.mxu3 }
 0x3a4   : > { %v2838_v4 = vadd.f32 %v2837_v25, %v2809_v21 }
 0x3a5   : > { %v2752_v9 = vpop.f32.mrf.mxu2 }
 0x3a6   : > { %v2753_v10 = vadd.f32 %v9508_v34, %v2752_v9 }
 0x3a8   : > { %v2842_v38 = vpop.f32.mrf.mxu1 }
 0x3aa   : > { %2986 = vmatmul.bf16.gmra.mxu2 %v2146_v56 }
 0x3ab   : > { %v2890_v54 = vpop.f32.mrf.mxu3 }
 0x3ad   : > { %v2755_v50 = vpop.f32.mrf.mxu2 }
 0x3ae   : > { %v2756_v27 = vadd.f32 %v9508_v34, %v2755_v50 }
 0x3b0   : > { %v2785_v1 = vadd.f32 %v2784_v0, %v2756_v27  ;;  %v2844_v5 = vpop.f32.mrf.mxu1  ;;  %v2748_v27 = vadd.f32 %v9508_v34, %v9532_v32 }
 0x3b2   : > { %v2814_v29 = vadd.f32 %v2813_v6, %v2785_v1  ;;  %v2782_v6 = vadd.f32 %v9538_v3, %v2753_v10 }
 0x3b3   : > { %v2892_v51 = vpop.f32.mrf.mxu3 }
 0x3b4   : > { %v2843_v12 = vadd.f32 %v2842_v38, %v2814_v29  ;;  %v2743_v29 = vadd.f32 %v9508_v34, %v9520_v11 }
 0x3b5   : > { %v2757_v20 = vpop.f32.mrf.mxu2 }
 0x3bb   : > { %v2895_v58 = vpop.f32.mrf.mxu3 }
 0x3bd   : > { %v2856_v45 = vpop.f32.mrf.mxu2 }
 0x3be   : > { %v2857_v30 = vadd.f32 %v2856_v45, %v2828_v33  ;;  %v9551_v33 = vpop.f32.mrf.mxu0  ;;  %v2811_v45 = vadd.f32 %v9540_v59, %v2782_v6 }
 0x3c0   : > { %v2886_v48 = vadd.f32 %v2885_v31, %v2857_v30  ;;  %v2840_v32 = vadd.f32 %v9542_v39, %v2811_v45  ;;  %v7848_v45 = vld [vmem:[%s10776_s6 + $0x8] sm:$0xff] }
 0x3c2   : > { %v2915_v24 = vadd.f32 %v2914_v13, %v2886_v48 }
 0x3c3   : > { %v2897_v44 = vpop.f32.mrf.mxu3 }
 0x3c5   : > { %v9545_v62 = vpop.f32.mrf.mxu2 }
 0x3c6   : > { %v9555_v2 = vpop.f32.mrf.mxu0 }
 0x3cb   : > { %v2943_v14 = vpop.f32.mrf.mxu1  ;;  %v2900_v38 = vpop.f32.mrf.mxu3 }
 0x3cc   : > { %v2944_v35 = vadd.f32 %v2943_v14, %v2915_v24 }
 0x3cd   : > { %v2861_v8 = vpop.f32.mrf.mxu2 }
 0x3ce   : > { %v9547_v52 = vadd.f32 %v2861_v8, %v2833_v49  ;;  %v2921_v22 = vpop.f32.mrf.mxu0 }
 0x3d3   : > { %v9553_v26 = vpop.f32.mrf.mxu1  ;;  %v2902_v14 = vpop.f32.mrf.mxu3 }
 0x3d5   : > { %v2863_v41 = vpop.f32.mrf.mxu2 }
 0x3d6   : > { %v2924_v57 = vpop.f32.mrf.mxu0 }
 0x3db   : > { %v9559_v49 = vpop.f32.mrf.mxu1 }
 0x3dd   : > { %v2866_v63 = vpop.f32.mrf.mxu2 }
 0x3de   : > { %v2867_v16 = vadd.f32 %v2866_v63, %v2838_v4  ;;  %v2758_v4 = vadd.f32 %v9508_v34, %v2757_v20  ;;  %v2926_v56 = vpop.f32.mrf.mxu0  ;;  %v2772_v20 = vadd.f32 %v9510_v15, %v2743_v29 }
 0x3e0   : > { %v2787_v1 = vadd.f32 %v2786_v7, %v2758_v4  ;;  %v2801_v34 = vadd.f32 %v9515_v42, %v2772_v20  ;;  %v2896_v63 = vadd.f32 %v2895_v58, %v2867_v16  ;;  %v7849_v20 = vld [vmem:[%s10776_s6 + $0x10] sm:$0xff] }
 0x3e2   : > { %v2816_v9 = vadd.f32 %v2815_v28, %v2787_v1  ;;  %v2830_v15 = vadd.f32 %v9518_v55, %v2801_v34  ;;  %v7871_v34 = vld [vmem:[%s10777_s7 + $0x78] sm:$0xff] }
 0x3e3   : > { %v2950_v37 = vpop.f32.mrf.mxu1  ;;  %3895 = vmatpush.bf16.msra.mxu1 %v7871_v34  ;;  %v7914_v34 = vld [vmem:[%s10777_s7 + $0x1d0] sm:$0xff] }
 0x3e4   : > { %v2845_v3 = vadd.f32 %v2844_v5, %v2816_v9  ;;  %v7854_v9 = vld [vmem:[%s10776_s6 + $0x38] sm:$0xff] }
 0x3e5   : > { %v2868_v47 = vpop.f32.mrf.mxu2 }
 0x3e6   : > { %v2929_v31 = vpop.f32.mrf.mxu0  ;;  %v2869_v7 = vadd.f32 %v2868_v47, %v2840_v32  ;;  %v7851_v32 = vld [vmem:[%s10776_s6 + $0x20] sm:$0xff] }
 0x3eb   : > { %v2953_v23 = vpop.f32.mrf.mxu1 }
 0x3ed   : > { %v2871_v17 = vpop.f32.mrf.mxu2 }
 0x3ee   : > { %v2872_v19 = vadd.f32 %v2871_v17, %v2843_v12  ;;  %v2777_v12 = vadd.f32 %v9526_v60, %v2748_v27  ;;  %v2931_v39 = vpop.f32.mrf.mxu0 }
 0x3f0   : > { %v2806_v13 = vadd.f32 %v9528_v43, %v2777_v12  ;;  %v2901_v60 = vadd.f32 %v2900_v38, %v2872_v19  ;;  %v2859_v43 = vadd.f32 %v9545_v62, %v2830_v15  ;;  %v2925_v19 = vadd.f32 %v2924_v57, %v2896_v63  ;;  %v7869_v15 = vld [vmem:[%s10777_s7 + $0x68] sm:$0xff]  ;;  %v7884_v63 = vld [vmem:[%s10777_s7 + $0xe0] sm:$0xff] }
 0x3f2   : > { %v2835_v11 = vadd.f32 %v9530_v18, %v2806_v13  ;;  %v2930_v17 = vadd.f32 %v2929_v31, %v2901_v60  ;;  %v2891_v18 = vadd.f32 %v2890_v54, %v9547_v52  ;;  %v2954_v16 = vadd.f32 %v2953_v23, %v2925_v19  ;;  %v7863_v31 = vld [vmem:[%s10777_s7 + $0x38] sm:$0xff]  ;;  %v7861_v13 = vld [vmem:[%s10777_s7 + $0x28] sm:$0xff] }
 0x3f3   : > { %v2955_v0 = vpop.f32.mrf.mxu1  ;;  %v7859_v60 = vld [vmem:[%s10777_s7 + $0x18] sm:$0xff] }
 0x3f4   : > { %v2864_v28 = vadd.f32 %v2863_v41, %v2835_v11  ;;  %v2920_v62 = vadd.f32 %v9555_v2, %v2891_v18  ;;  %v7886_v11 = vld [vmem:[%s10777_s7 + $0xf0] sm:$0xff]  ;;  %v7875_v19 = vld [vmem:[%s10777_s7 + $0x98] sm:$0xff] }
 0x3f5   : > { %v2873_v46 = vpop.f32.mrf.mxu2  ;;  %v7866_v18 = vld [vmem:[%s10777_s7 + $0x50] sm:$0xff] }
 0x3f6   : > { %v2874_v24 = vadd.f32 %v2873_v46, %v2845_v3  ;;  %v2893_v47 = vadd.f32 %v2892_v51, %v2864_v28  ;;  %v2949_v52 = vadd.f32 %v9559_v49, %v2920_v62  ;;  %v7855_v3 = vld [vmem:[%s10776_s6 + $0x40] sm:$0xff]  ;;  %v7885_v28 = vld [vmem:[%s10777_s7 + $0xe8] sm:$0xff]  ;;  %v7903_v62 = vld [vmem:[%s10777_s7 + $0x178] sm:$0xff] }
 0x3f8   : > { %v2903_v8 = vadd.f32 %v2902_v14, %v2874_v24  ;;  %v2922_v55 = vadd.f32 %v2921_v22, %v2893_v47  ;;  %v7860_v24 = vld [vmem:[%s10777_s7 + $0x20] sm:$0xff]  ;;  %v7870_v14 = vld [vmem:[%s10777_s7 + $0x70] sm:$0xff] }
 0x3f9   : > { %3896 = vmatpush.bf16.msra.mxu1 %v7870_v14  ;;  %v7856_v47 = vld [vmem:[%s10777_s7] sm:$0xff] }
 0x3fa   : > { %v2932_v42 = vadd.f32 %v2931_v39, %v2903_v8  ;;  %v2951_v1 = vadd.f32 %v2950_v37, %v2922_v55  ;;  %v7858_v8 = vld [vmem:[%s10777_s7 + $0x10] sm:$0xff]  ;;  %v7877_v39 = vld [vmem:[%s10777_s7 + $0xa8] sm:$0xff]  ;;  %v7880_v55 = vld [vmem:[%s10777_s7 + $0xc0] sm:$0xff] }
 0x3fb   : > { %v2958_v48 = vpop.f32.mrf.mxu1 }
 0x3fd   : > { %v2972_v36 = vpop.f32.mrf.mxu2  ;;  %3897 = vmatpush.bf16.msra.mxu1 %v7869_v15  ;;  %v7897_v15 = vld [vmem:[%s10777_s7 + $0x148] sm:$0xff] }
 0x3fe   : > { %v9557_v40 = vadd.f32 %v2972_v36, %v2944_v35  ;;  %v2898_v35 = vadd.f32 %v2897_v44, %v2869_v7  ;;  %v2959_v36 = vadd.f32 %v2958_v48, %v2930_v17  ;;  %v2888_v44 = vadd.f32 %v9549_v53, %v2859_v43  ;;  %v7862_v48 = vld [vmem:[%s10777_s7 + $0x30] sm:$0xff]  ;;  %v7887_v7 = vld [vmem:[%s10777_s7 + $0xf8] sm:$0xff]  ;;  %v7857_v17 = vld [vmem:[%s10777_s7 + $0x8] sm:$0xff] }
 0x3ff   : > { %v7868_v43 = vld [vmem:[%s10777_s7 + $0x60] sm:$0xff] }
 0x400   : > { %v2927_v46 = vadd.f32 %v2926_v56, %v2898_v35  ;;  %v2917_v38 = vadd.f32 %v9551_v33, %v2888_v44  ;;  %v7878_v35 = vld [vmem:[%s10777_s7 + $0xb0] sm:$0xff] }
 0x401   : > { %3898 = vmatpush.bf16.msra.mxu1 %v7868_v43  ;;  %v7894_v44 = vld [vmem:[%s10777_s7 + $0x130] sm:$0xff]  ;;  %v7912_v43 = vld [vmem:[%s10777_s7 + $0x1c0] sm:$0xff] }
 0x402   : > { %v2956_v10 = vadd.f32 %v2955_v0, %v2927_v46  ;;  %v2946_v53 = vadd.f32 %v9553_v26, %v2917_v38  ;;  %v7876_v46 = vld [vmem:[%s10777_s7 + $0xa0] sm:$0xff] }
 0x403   : > { %v2960_v5 = vpop.f32.mrf.mxu1  ;;  %v7892_v38 = vld [vmem:[%s10777_s7 + $0x120] sm:$0xff] }
 0x404   : > { %v2961_v4 = vadd.f32 %v2960_v5, %v2932_v42  ;;  %v7883_v5 = vld [vmem:[%s10777_s7 + $0xd8] sm:$0xff]  ;;  %v7882_v42 = vld [vmem:[%s10777_s7 + $0xd0] sm:$0xff] }
 0x405   : > { %v9561_v61 = vpop.f32.mrf.mxu2 }
 0x406   : > { %v2975_v2 = vadd.f32 %v9561_v61, %v2946_v53  ;;  %v7853_v61 = vld [vmem:[%s10776_s6 + $0x30] sm:$0xff]  ;;  %v7917_v53 = vld [vmem:[%s10777_s7 + $0x1e8] sm:$0xff] }
 0x408   : > { %v2993_v33 = vmax.f32 %v2975_v2, 0.0 }
 0x40d   : > { %v9563_v25 = vpop.f32.mrf.mxu2 }
 0x40e   : > { %v2978_v22 = vadd.f32 %v9563_v25, %v2949_v52  ;;  %v7847_v25 = vld [vmem:[%s10776_s6] sm:$0xff]  ;;  %v7902_v52 = vld [vmem:[%s10777_s7 + $0x170] sm:$0xff] }
 0x410   : > { %v2994_v12 = vmax.f32 %v2978_v22, 0.0 }
 0x415   : > { %v2979_v21 = vpop.f32.mrf.mxu2 }
 0x416   : > { %v2980_v54 = vadd.f32 %v2979_v21, %v2951_v1  ;;  %v2992_v21 = vmax.f32 %v9557_v40, 0.0  ;;  %v7850_v40 = vld [vmem:[%s10776_s6 + $0x18] sm:$0xff]  ;;  %v7873_v1 = vld [vmem:[%s10777_s7 + $0x88] sm:$0xff] }
 0x418   : > { %v2995_v37 = vmax.f32 %v2980_v54, 0.0  ;;  %v3000_v26 = vpack.c.bf16 %v2993_v33, %v2992_v21  ;;  %v7916_v33 = vld [vmem:[%s10777_s7 + $0x1e0] sm:$0xff]  ;;  %v7890_v21 = vld [vmem:[%s10777_s7 + $0x110] sm:$0xff] }
 0x41a   : > { %v3001_v49 = vpack.c.bf16 %v2995_v37, %v2994_v12  ;;  %v7891_v37 = vld [vmem:[%s10777_s7 + $0x118] sm:$0xff] }
 0x41d   : > { %v2982_v50 = vpop.f32.mrf.mxu2 }
 0x41e   : > { %v2983_v51 = vadd.f32 %v2982_v50, %v2954_v16  ;;  %v7919_v16 = vld [vmem:[%s10777_s7 + $0x1f8] sm:$0xff] }
 0x420   : > { %v2996_v23 = vmax.f32 %v2983_v51, 0.0  ;;  %v7893_v51 = vld [vmem:[%s10777_s7 + $0x128] sm:$0xff] }
 0x425   : > { %v2984_v30 = vpop.f32.mrf.mxu2 }
 0x426   : > { %v2985_v58 = vadd.f32 %v2984_v30, %v2956_v10  ;;  %v7852_v30 = vld [vmem:[%s10776_s6 + $0x28] sm:$0xff]  ;;  %v7895_v10 = vld [vmem:[%s10777_s7 + $0x138] sm:$0xff] }
 0x428   : > { %v2997_v57 = vmax.f32 %v2985_v58, 0.0  ;;  %v7864_v58 = vld [vmem:[%s10777_s7 + $0x40] sm:$0xff] }
 0x42a   : > { %v3002_v50 = vpack.c.bf16 %v2997_v57, %v2996_v23  ;;  %v7911_v57 = vld [vmem:[%s10777_s7 + $0x1b8] sm:$0xff]  ;;  %v7901_v23 = vld [vmem:[%s10777_s7 + $0x168] sm:$0xff] }
 0x42d   : > { %v2987_v59 = vpop.f32.mrf.mxu2 }
 0x42e   : > { %v2988_v41 = vadd.f32 %v2987_v59, %v2959_v36  ;;  %v7879_v59 = vld [vmem:[%s10777_s7 + $0xb8] sm:$0xff] }
 0x42f   : > { %v7867_v36 = vld [vmem:[%s10777_s7 + $0x58] sm:$0xff] }
 0x430   : > { %v2998_v56 = vmax.f32 %v2988_v41, 0.0  ;;  %3899 = vmatpush.bf16.msra.mxu1 %v7867_v36  ;;  %v7874_v41 = vld [vmem:[%s10777_s7 + $0x90] sm:$0xff] }
 0x434   : > { %3900 = vmatpush.bf16.msra.mxu1 %v7866_v18  ;;  %v7925_v18 = vld [vmem:[%s10777_s7 + $0x228] sm:$0xff] }
 0x435   : > { %v2989_v27 = vpop.f32.mrf.mxu2 }
 0x436   : > { %v2990_v6 = vadd.f32 %v2989_v27, %v2961_v4  ;;  %v7881_v4 = vld [vmem:[%s10777_s7 + $0xc8] sm:$0xff] }
 0x437   : > { %v7865_v27 = vld [vmem:[%s10777_s7 + $0x48] sm:$0xff] }
 0x438   : > { %v2999_v29 = vmax.f32 %v2990_v6, 0.0  ;;  %3901 = vmatpush.bf16.msra.mxu1 %v7865_v27 }
 0x43a   : > { %v3003_v0 = vpack.c.bf16 %v2999_v29, %v2998_v56  ;;  %v7918_v56 = vld [vmem:[%s10777_s7 + $0x1f0] sm:$0xff]  ;;  %v7872_v29 = vld [vmem:[%s10777_s7 + $0x80] sm:$0xff] }
 0x43c   : > { %3019 = vmatpush.bf16.msrb.mxu3 %v3003_v0  ;;  %3100 = vmatpush.bf16.msrb.mxu0 %v3003_v0 }
 0x43d   : > { %3181 = vmatpush.bf16.msra.mxu2 %v3003_v0  ;;  %3902 = vmatpush.bf16.msra.mxu1 %v7864_v58  ;;  %v7924_v58 = vld [vmem:[%s10777_s7 + $0x220] sm:$0xff] }
 0x440   : > { %3020 = vmatpush.bf16.msrb.mxu3 %v3002_v50  ;;  %3101 = vmatpush.bf16.msrb.mxu0 %v3002_v50 }
 0x441   : > { %3182 = vmatpush.bf16.msra.mxu2 %v3002_v50  ;;  %3951 = vmatpush.bf16.msrb.mxu1 %v7903_v62 }
 0x444   : > { %3021 = vmatpush.bf16.msrb.mxu3 %v3001_v49  ;;  %3102 = vmatpush.bf16.msrb.mxu0 %v3001_v49 }
 0x445   : > { %3183 = vmatpush.bf16.msra.mxu2 %v3001_v49  ;;  %3952 = vmatpush.bf16.msrb.mxu1 %v7902_v52  ;;  %v7922_v52 = vld [vmem:[%s10777_s7 + $0x210] sm:$0xff] }
 0x448   : > { %3022 = vmatpush.bf16.msrb.mxu3 %v3000_v26  ;;  %3103 = vmatpush.bf16.msrb.mxu0 %v3000_v26 }
 0x449   : > { %3184 = vmatpush.bf16.msra.mxu2 %v3000_v26  ;;  %3953 = vmatpush.bf16.msrb.mxu1 %v7901_v23  ;;  %v7921_v23 = vld [vmem:[%s10777_s7 + $0x208] sm:$0xff] }
 0x44b   : > { %6585 = vmatmul.msk.bf16.vlgmr.msrb.gmra.mxu3 %vm3011_vm2, %v7847_v25  ;;  %6606 = vmatmul.msk.bf16.vlgmr.msrb.gmra.mxu0 %vm3011_vm2, %v7850_v40 }
 0x44c   : > { %3046 = vmatpush.bf16.msra.mxu3 %v3003_v0  ;;  %3154 = vmatpush.bf16.msra.mxu0 %v3003_v0 }
 0x44d   : > { %3208 = vmatpush.bf16.msrb.mxu2 %v3003_v0 }
 0x44e   : > { %6627 = vmatmul.msk.bf16.vlgmr.msra.gmra.mxu2 %vm3011_vm2, %v7853_v61  ;;  %v7900_v61 = vld [vmem:[%s10777_s7 + $0x160] sm:$0xff] }
 0x44f   : > { %3954 = vmatpush.bf16.msrb.mxu1 %v7900_v61 }
 0x450   : > { %3047 = vmatpush.bf16.msra.mxu3 %v3002_v50  ;;  %3155 = vmatpush.bf16.msra.mxu0 %v3002_v50 }
 0x451   : > { %3209 = vmatpush.bf16.msrb.mxu2 %v3002_v50 }
 0x454   : > { %3048 = vmatpush.bf16.msra.mxu3 %v3001_v49  ;;  %3156 = vmatpush.bf16.msra.mxu0 %v3001_v49 }
 0x455   : > { %3210 = vmatpush.bf16.msrb.mxu2 %v3001_v49 }
 0x458   : > { %3049 = vmatpush.bf16.msra.mxu3 %v3000_v26  ;;  %3157 = vmatpush.bf16.msra.mxu0 %v3000_v26 }
 0x459   : > { %3211 = vmatpush.bf16.msrb.mxu2 %v3000_v26 }
 0x45b   : > { %6592 = vmatmul.msk.bf16.vlgmr.msra.gmra.mxu3 %vm3011_vm2, %v7848_v45  ;;  %6620 = vmatmul.msk.bf16.vlgmr.msra.gmra.mxu0 %vm3011_vm2, %v7852_v30  ;;  %v7909_v30 = vld [vmem:[%s10777_s7 + $0x1a8] sm:$0xff] }
 0x45c   : > { %3073 = vmatpush.bf16.msrb.mxu3 %v3003_v0  ;;  %3881 = vmatpush.bf16.msrb.mxu0 %v7863_v31  ;;  %v7915_v31 = vld [vmem:[%s10777_s7 + $0x1d8] sm:$0xff] }
 0x45d   : > { %3909 = vmatpush.bf16.msra.mxu2 %v7879_v59  ;;  %v7907_v59 = vld [vmem:[%s10777_s7 + $0x198] sm:$0xff] }
 0x45e   : > { %6634 = vmatmul.msk.bf16.vlgmr.msrb.gmra.mxu2 %vm3011_vm2, %v7854_v9 }
 0x460   : > { %3074 = vmatpush.bf16.msrb.mxu3 %v3002_v50  ;;  %3882 = vmatpush.bf16.msrb.mxu0 %v7862_v48 }
 0x461   : > { %3910 = vmatpush.bf16.msra.mxu2 %v7878_v35 }
 0x464   : > { %3075 = vmatpush.bf16.msrb.mxu3 %v3001_v49  ;;  %3883 = vmatpush.bf16.msrb.mxu0 %v7861_v13 }
 0x465   : > { %3911 = vmatpush.bf16.msra.mxu2 %v7877_v39 }
 0x468   : > { %3076 = vmatpush.bf16.msrb.mxu3 %v3000_v26  ;;  %3884 = vmatpush.bf16.msrb.mxu0 %v7860_v24  ;;  %v7908_v24 = vld [vmem:[%s10777_s7 + $0x1a0] sm:$0xff] }
 0x469   : > { %3912 = vmatpush.bf16.msra.mxu2 %v7876_v46 }
 0x46b   : > { %6599 = vmatmul.msk.bf16.vlgmr.msrb.gmra.mxu3 %vm3011_vm2, %v7849_v20 }
 0x46c   : > { %3127 = vmatpush.bf16.msra.mxu3 %v3003_v0  ;;  %3885 = vmatpush.bf16.msrb.mxu0 %v7859_v60  ;;  %v7888_v60 = vld [vmem:[%s10777_s7 + $0x100] sm:$0xff] }
 0x46d   : > { %3913 = vmatpush.bf16.msra.mxu2 %v7875_v19 }
 0x470   : > { %3128 = vmatpush.bf16.msra.mxu3 %v3002_v50  ;;  %3886 = vmatpush.bf16.msrb.mxu0 %v7858_v8  ;;  %v7913_v8 = vld [vmem:[%s10777_s7 + $0x1c8] sm:$0xff] }
 0x471   : > { %3914 = vmatpush.bf16.msra.mxu2 %v7874_v41 }
 0x474   : > { %3129 = vmatpush.bf16.msra.mxu3 %v3001_v49  ;;  %3887 = vmatpush.bf16.msrb.mxu0 %v7857_v17  ;;  %v7926_v17 = vld [vmem:[%s10777_s7 + $0x230] sm:$0xff] }
 0x475   : > { %3915 = vmatpush.bf16.msra.mxu2 %v7873_v1 }
 0x478   : > { %3130 = vmatpush.bf16.msra.mxu3 %v3000_v26  ;;  %3888 = vmatpush.bf16.msrb.mxu0 %v7856_v47  ;;  %v7896_v47 = vld [vmem:[%s10777_s7 + $0x140] sm:$0xff] }
 0x479   : > { %3916 = vmatpush.bf16.msra.mxu2 %v7872_v29 }
 0x47b   : > { %6613 = vmatmul.msk.bf16.vlgmr.msra.gmra.mxu3 %vm3011_vm2, %v7851_v32  ;;  %v7899_v32 = vld [vmem:[%s10777_s7 + $0x158] sm:$0xff] }
 0x47c   : > { %3235 = vmatpush.bf16.msrb.mxu3 %v3003_v0  ;;  %3937 = vmatpush.bf16.msra.mxu0 %v7895_v10 }
 0x47d   : > { %3965 = vmatpush.bf16.msrb.mxu2 %v7911_v57  ;;  %3955 = vmatpush.bf16.msrb.mxu1 %v7899_v32 }
 0x480   : > { %3236 = vmatpush.bf16.msrb.mxu3 %v3002_v50  ;;  %3938 = vmatpush.bf16.msra.mxu0 %v7894_v44  ;;  %v7910_v50 = vld [vmem:[%s10777_s7 + $0x1b0] sm:$0xff] }
 0x481   : > { %3966 = vmatpush.bf16.msrb.mxu2 %v7910_v50 }
 0x484   : > { %3237 = vmatpush.bf16.msrb.mxu3 %v3001_v49  ;;  %3939 = vmatpush.bf16.msra.mxu0 %v7893_v51 }
 0x485   : > { %3967 = vmatpush.bf16.msrb.mxu2 %v7909_v30 }
 0x488   : > { %3238 = vmatpush.bf16.msrb.mxu3 %v3000_v26  ;;  %3940 = vmatpush.bf16.msra.mxu0 %v7892_v38 }
 0x489   : > { %3968 = vmatpush.bf16.msrb.mxu2 %v7908_v24 }
 0x48b   : > { %6641 = vmatmul.msk.bf16.vlgmr.msrb.gmra.mxu3 %vm3011_vm2, %v7855_v3  ;;  %v7889_v3 = vld [vmem:[%s10777_s7 + $0x108] sm:$0xff] }
 0x48c   : > { %3923 = vmatpush.bf16.msra.mxu3 %v7887_v7  ;;  %3941 = vmatpush.bf16.msra.mxu0 %v7891_v37 }
 0x48d   : > { %3969 = vmatpush.bf16.msrb.mxu2 %v7907_v59 }
 0x490   : > { %3924 = vmatpush.bf16.msra.mxu3 %v7886_v11  ;;  %3942 = vmatpush.bf16.msra.mxu0 %v7890_v21  ;;  %v7898_v11 = vld [vmem:[%s10777_s7 + $0x150] sm:$0xff] }
 0x491   : > { %3956 = vmatpush.bf16.msrb.mxu1 %v7898_v11 }
 0x494   : > { %3925 = vmatpush.bf16.msra.mxu3 %v7885_v28  ;;  %3943 = vmatpush.bf16.msra.mxu0 %v7889_v3  ;;  %v7927_v28 = vld [vmem:[%s10777_s7 + $0x238] sm:$0xff] }
 0x495   : > { %3957 = vmatpush.bf16.msrb.mxu1 %v7897_v15 }
 0x498   : > { %3926 = vmatpush.bf16.msra.mxu3 %v7884_v63  ;;  %3944 = vmatpush.bf16.msra.mxu0 %v7888_v60  ;;  %v7906_v63 = vld [vmem:[%s10777_s7 + $0x190] sm:$0xff] }
 0x499   : > { %3970 = vmatpush.bf16.msrb.mxu2 %v7906_v63  ;;  %3958 = vmatpush.bf16.msrb.mxu1 %v7896_v47 }
 0x49c   : > { %3927 = vmatpush.bf16.msra.mxu3 %v7883_v5 }
 0x4a0   : > { %3928 = vmatpush.bf16.msra.mxu3 %v7882_v42  ;;  %v7905_v42 = vld [vmem:[%s10777_s7 + $0x188] sm:$0xff] }
 0x4a1   : > { %3971 = vmatpush.bf16.msrb.mxu2 %v7905_v42 }
 0x4a4   : > { %3929 = vmatpush.bf16.msra.mxu3 %v7881_v4 }
 0x4a8   : > { %3930 = vmatpush.bf16.msra.mxu3 %v7880_v55 }
 0x4ac   : > { %3979 = vmatpush.bf16.msrb.mxu3 %v7919_v16  ;;  %v7904_v16 = vld [vmem:[%s10777_s7 + $0x180] sm:$0xff] }
 0x4ad   : > { %3972 = vmatpush.bf16.msrb.mxu2 %v7904_v16 }
 0x4b0   : > { %3980 = vmatpush.bf16.msrb.mxu3 %v7918_v56  ;;  %v7923_v56 = vld [vmem:[%s10777_s7 + $0x218] sm:$0xff] }
 0x4b4   : > { %3981 = vmatpush.bf16.msrb.mxu3 %v7917_v53 }
 0x4b8   : > { %3982 = vmatpush.bf16.msrb.mxu3 %v7916_v33  ;;  %v7920_v33 = vld [vmem:[%s10777_s7 + $0x200] sm:$0xff] }
 0x4bc   : > { %3983 = vmatpush.bf16.msrb.mxu3 %v7915_v31 }
 0x4c0   : > { %3984 = vmatpush.bf16.msrb.mxu3 %v7914_v34 }
 0x4c4   : > { %3985 = vmatpush.bf16.msrb.mxu3 %v7913_v8  ;;  %v8122_v8 = vld [vmem:[%s10778_s8] ss:$0 sm:$0xff] }
 0x4c8   : > { %v3105_v6 = vpop.f32.mrf.mxu0  ;;  %3986 = vmatpush.bf16.msrb.mxu3 %v7912_v43 }
 0x4c9   : > { %v3110_v2 = vpack.c.bf16 %v3105_v6, %v3105_v6 }
 0x4cb   : > { %v3267_v49 = vunpack.c.l.b16 %v3110_v2 }
 0x4ce   : > { %v3024_v54 = vpop.f32.mrf.mxu3 }
 0x4cf   : > { %v3029_v25 = vpack.c.bf16 %v3024_v54, %v3024_v54 }
 0x4d0   : > { %v3107_v22 = vpop.f32.mrf.mxu0 }
 0x4d1   : > { %v9749_v0 = vpop.f32.mrf.mxu2  ;;  %v3111_v12 = vpack.c.bf16 %v3107_v22, %v3107_v22  ;;  %v3249_v48 = vunpack.c.l.b16 %v3029_v25 }
 0x4d3   : > { %v3268_v26 = vunpack.c.l.b16 %v3111_v12 }
 0x4d5   : > { %v3269_v45 = vpack.c.b16 %v3268_v26, %v3267_v49  ;;  %v3191_v26 = vpack.c.bf16 %v9749_v0, %v9749_v0 }
 0x4d6   : > { %v3026_v40 = vpop.f32.mrf.mxu3 }
 0x4d7   : > { %v3030_v9 = vpack.c.bf16 %v3026_v40, %v3026_v40  ;;  %3931 = vmatmul.bf16.vlgmr.msra.gmra.mxu3 %v3269_v45  ;;  %v3285_v45 = vunpack.c.l.b16 %v3191_v26  ;;  %v7935_v26 = vld [vmem:[%s10780_s10 + $0x38] sm:$0xff] }
 0x4d8   : > { %v3159_v5 = vpop.f32.mrf.mxu0 }
 0x4d9   : > { %v9775_v20 = vpop.f32.mrf.mxu2  ;;  %v3250_v13 = vunpack.c.l.b16 %v3030_v9  ;;  %v3164_v29 = vpack.c.bf16 %v3159_v5, %v3159_v5 }
 0x4da   : > { %v3192_v25 = vpack.c.bf16 %v9775_v20, %v9775_v20 }
 0x4db   : > { %v3251_v7 = vpack.c.b16 %v3250_v13, %v3249_v48  ;;  %v3279_v57 = vunpack.c.l.b16 %v3164_v29 }
 0x4dc   : > { %v3286_v9 = vunpack.c.l.b16 %v3192_v25  ;;  %v7959_v25 = vld [vmem:[%s10780_s10 + $0xf8] sm:$0xff] }
 0x4dd   : > { %3889 = vmatmul.bf16.vlgmr.msrb.gmra.mxu0 %v3251_v7 }
 0x4de   : > { %v3051_v14 = vpop.f32.mrf.mxu3  ;;  %3993 = vmatpush.bf16.msrb.mxu0 %v7927_v28  ;;  %v3287_v13 = vpack.c.b16 %v3286_v9, %v3285_v45  ;;  %v7958_v45 = vld [vmem:[%s10780_s10 + $0xf0] sm:$0xff] }
 0x4df   : > { %v3056_v46 = vpack.c.bf16 %v3051_v14, %v3051_v14  ;;  %v7942_v9 = vld [vmem:[%s10780_s10 + $0x70] sm:$0xff] }
 0x4e0   : > { %v3161_v51 = vpop.f32.mrf.mxu0 }
 0x4e1   : > { %v3213_v35 = vpop.f32.mrf.mxu2  ;;  %v3255_v44 = vunpack.c.l.b16 %v3056_v46  ;;  %v3165_v38 = vpack.c.bf16 %v3161_v51, %v3161_v51 }
 0x4e2   : > { %v3218_v39 = vpack.c.bf16 %v3213_v35, %v3213_v35  ;;  %3994 = vmatpush.bf16.msrb.mxu0 %v7926_v17 }
 0x4e3   : > { %v3280_v53 = vunpack.c.l.b16 %v3165_v38 }
 0x4e4   : > { %v3291_v4 = vunpack.c.l.b16 %v3218_v39 }
 0x4e5   : > { %v3281_v12 = vpack.c.b16 %v3280_v53, %v3279_v57 }
 0x4e6   : > { %v3053_v36 = vpop.f32.mrf.mxu3  ;;  %3995 = vmatpush.bf16.msrb.mxu0 %v7925_v18 }
 0x4e7   : > { %v3057_v10 = vpack.c.bf16 %v3053_v36, %v3053_v36 }
 0x4e9   : > { %v3215_v19 = vpop.f32.mrf.mxu2  ;;  %v3256_v27 = vunpack.c.l.b16 %v3057_v10 }
 0x4ea   : > { %v3219_v41 = vpack.c.bf16 %v3215_v19, %v3215_v19  ;;  %3996 = vmatpush.bf16.msrb.mxu0 %v7924_v58 }
 0x4eb   : > { %v3257_v6 = vpack.c.b16 %v3256_v27, %v3255_v44 }
 0x4ec   : > { %v3292_v55 = vunpack.c.l.b16 %v3219_v41 }
 0x4ed   : > { %3903 = vmatmul.bf16.vlgmr.msra.gmra.mxu1 %v3257_v6 }
 0x4ee   : > { %v3293_v62 = vpack.c.b16 %v3292_v55, %v3291_v4  ;;  %v3078_v1 = vpop.f32.mrf.mxu3  ;;  %3997 = vmatpush.bf16.msrb.mxu0 %v7923_v56 }
 0x4ef   : > { %v3083_v54 = vpack.c.bf16 %v3078_v1, %v3078_v1 }
 0x4f0   : > { %3987 = vmatmul.bf16.vlgmr.msrb.gmra.mxu3 %v3293_v62 }
 0x4f1   : > { %v3261_v37 = vunpack.c.l.b16 %v3083_v54 }
 0x4f2   : > { %3998 = vmatpush.bf16.msrb.mxu0 %v7922_v52 }
 0x4f6   : > { %v3080_v22 = vpop.f32.mrf.mxu3  ;;  %3999 = vmatpush.bf16.msrb.mxu0 %v7921_v23 }
 0x4f7   : > { %v3084_v2 = vpack.c.bf16 %v3080_v22, %v3080_v22 }
 0x4f9   : > { %v3262_v50 = vunpack.c.l.b16 %v3084_v2 }
 0x4fa   : > { %4000 = vmatpush.bf16.msrb.mxu0 %v7920_v33  ;;  %v6935_v33 = vld [vmem:[%s10779_s9 + $0x6] sm:$0x3] }
 0x4fb   : > { %v3263_v49 = vpack.c.b16 %v3262_v50, %v3261_v37  ;;  %v4010_v37 = vld [vmem:[%s10779_s9] sm:$0x3]  ;;  %v6931_v50 = vld [vmem:[%s10779_s9 + $0x2] sm:$0x3] }
 0x4fd   : > { %3917 = vmatmul.bf16.vlgmr.msra.gmra.mxu2 %v3263_v49  ;;  %3959 = vmatmul.bf16.vlgmr.msrb.gmra.mxu1 %v3281_v12  ;;  %v6933_v12 = vld [vmem:[%s10779_s9 + $0x4] sm:$0x3]  ;;  %v6937_v49 = vld [vmem:[%s10779_s9 + $0x8] sm:$0x3] }
 0x4fe   : > { %v3132_v21 = vpop.f32.mrf.mxu3 }
 0x4ff   : > { %v3137_v61 = vpack.c.bf16 %v3132_v21, %v3132_v21  ;;  %v6939_v21 = vld [vmem:[%s10779_s9 + $0xa] sm:$0x3] }
 0x501   : > { %v3273_v31 = vunpack.c.l.b16 %v3137_v61  ;;  %v7934_v61 = vld [vmem:[%s10780_s10 + $0x30] sm:$0xff] }
 0x506   : > { %v3134_v40 = vpop.f32.mrf.mxu3 }
 0x507   : > { %v3138_v30 = vpack.c.bf16 %v3134_v40, %v3134_v40  ;;  %v7943_v40 = vld [vmem:[%s10780_s10 + $0x78] sm:$0xff] }
 0x509   : > { %v3274_v48 = vunpack.c.l.b16 %v3138_v30  ;;  %v7933_v30 = vld [vmem:[%s10780_s10 + $0x28] sm:$0xff] }
 0x50b   : > { %v3275_v32 = vpack.c.b16 %v3274_v48, %v3273_v31  ;;  %v7957_v31 = vld [vmem:[%s10780_s10 + $0xe8] sm:$0xff]  ;;  %v7932_v48 = vld [vmem:[%s10780_s10 + $0x20] sm:$0xff] }
 0x50d   : > { %3945 = vmatmul.bf16.vlgmr.msra.gmra.mxu0 %v3275_v32  ;;  %3973 = vmatmul.bf16.vlgmr.msrb.gmra.mxu2 %v3287_v13  ;;  %v6941_v13 = vld [vmem:[%s10779_s9 + $0xc] sm:$0x3]  ;;  %v6945_v32 = vld [vmem:[%s10779_s9 + $0x10] sm:$0x3] }
 0x50e   : > { %v3240_v3 = vpop.f32.mrf.mxu3  ;;  %4774 = vmatpush.bf16.msra.mxu0 %v7943_v40  ;;  %v7998_v40 = vld [vmem:[%s10780_s10 + $0x230] sm:$0xff] }
 0x50f   : > { %v3245_v7 = vpack.c.bf16 %v3240_v3, %v3240_v3  ;;  %v7951_v3 = vld [vmem:[%s10780_s10 + $0xb8] sm:$0xff] }
 0x511   : > { %v3297_v11 = vunpack.c.l.b16 %v3245_v7  ;;  %v7931_v7 = vld [vmem:[%s10780_s10 + $0x18] sm:$0xff] }
 0x512   : > { %4775 = vmatpush.bf16.msra.mxu0 %v7942_v9 }
 0x516   : > { %v3242_v24 = vpop.f32.mrf.mxu3 }
 0x517   : > { %v3246_v34 = vpack.c.bf16 %v3242_v24, %v3242_v24  ;;  %v7950_v24 = vld [vmem:[%s10780_s10 + $0xb0] sm:$0xff] }
 0x519   : > { %v3298_v0 = vunpack.c.l.b16 %v3246_v34  ;;  %v7930_v34 = vld [vmem:[%s10780_s10 + $0x10] sm:$0xff] }
 0x51b   : > { %v3299_v60 = vpack.c.b16 %v3298_v0, %v3297_v11  ;;  %v7929_v11 = vld [vmem:[%s10780_s10 + $0x8] sm:$0xff]  ;;  %v7928_v0 = vld [vmem:[%s10780_s10] sm:$0xff] }
 0x51d   : > { %4001 = vmatmul.bf16.vlgmr.msrb.gmra.mxu0 %v3299_v60  ;;  %v7967_v60 = vld [vmem:[%s10780_s10 + $0x138] sm:$0xff] }
 0x55a   : > { %v3890_v20 = vpop.f32.mrf.mxu0  ;;  %v3932_v35 = vpop.f32.mrf.mxu3 }
 0x55b   : > { %v3891_v43 = vadd.f32 %v8122_v8, %v3890_v20  ;;  %v6943_v20 = vld [vmem:[%s10779_s9 + $0xe] sm:$0x3] }
 0x562   : > { %v3892_v28 = vpop.f32.mrf.mxu0  ;;  %v3934_v39 = vpop.f32.mrf.mxu3 }
 0x563   : > { %v3893_v47 = vadd.f32 %v8122_v8, %v3892_v28  ;;  %v7949_v28 = vld [vmem:[%s10780_s10 + $0xa8] sm:$0xff]  ;;  %v7948_v8 = vld [vmem:[%s10780_s10 + $0xa0] sm:$0xff] }
 0x56a   : > { %v3904_v14 = vpop.f32.mrf.mxu1 }
 0x56b   : > { %v3905_v5 = vadd.f32 %v3904_v14, %v3891_v43  ;;  %v7966_v14 = vld [vmem:[%s10780_s10 + $0x130] sm:$0xff] }
 0x56c   : > { %v7938_v43 = vld [vmem:[%s10780_s10 + $0x50] sm:$0xff] }
 0x572   : > { %v3906_v15 = vpop.f32.mrf.mxu1 }
 0x573   : > { %v3907_v46 = vadd.f32 %v3906_v15, %v3893_v47  ;;  %v3988_v27 = vpop.f32.mrf.mxu3  ;;  %v7939_v15 = vld [vmem:[%s10780_s10 + $0x58] sm:$0xff]  ;;  %v7937_v47 = vld [vmem:[%s10780_s10 + $0x48] sm:$0xff] }
 0x57a   : > { %v3960_v42 = vpop.f32.mrf.mxu1 }
 0x57b   : > { %v3990_v38 = vpop.f32.mrf.mxu3 }
 0x580   : > { %v3918_v59 = vpop.f32.mrf.mxu2 }
 0x581   : > { %v3919_v36 = vadd.f32 %v3918_v59, %v3905_v5  ;;  %v7941_v59 = vld [vmem:[%s10780_s10 + $0x68] sm:$0xff]  ;;  %v7964_v5 = vld [vmem:[%s10780_s10 + $0x120] sm:$0xff] }
 0x582   : > { %v3962_v58 = vpop.f32.mrf.mxu1  ;;  %4776 = vmatpush.bf16.msra.mxu0 %v7941_v59 }
 0x583   : > { %v3933_v4 = vadd.f32 %v3932_v35, %v3919_v36  ;;  %v7940_v35 = vld [vmem:[%s10780_s10 + $0x60] sm:$0xff] }
 0x584   : > { %v7956_v36 = vld [vmem:[%s10780_s10 + $0xe0] sm:$0xff] }
 0x586   : > { %4777 = vmatpush.bf16.msra.mxu0 %v7940_v35  ;;  %v7993_v35 = vld [vmem:[%s10780_s10 + $0x208] sm:$0xff] }
 0x588   : > { %v3920_v63 = vpop.f32.mrf.mxu2 }
 0x589   : > { %v3921_v19 = vadd.f32 %v3920_v63, %v3907_v46  ;;  %v7947_v63 = vld [vmem:[%s10780_s10 + $0x98] sm:$0xff]  ;;  %v7945_v46 = vld [vmem:[%s10780_s10 + $0x88] sm:$0xff] }
 0x58a   : > { %v3946_v17 = vpop.f32.mrf.mxu0  ;;  %4778 = vmatpush.bf16.msra.mxu0 %v7939_v15 }
 0x58b   : > { %v3935_v41 = vadd.f32 %v3934_v39, %v3921_v19  ;;  %v3947_v44 = vadd.f32 %v3946_v17, %v3933_v4  ;;  %v7965_v17 = vld [vmem:[%s10780_s10 + $0x128] sm:$0xff]  ;;  %v7946_v39 = vld [vmem:[%s10780_s10 + $0x90] sm:$0xff]  ;;  %v7955_v19 = vld [vmem:[%s10780_s10 + $0xd8] sm:$0xff] }
 0x58c   : > { %v7944_v4 = vld [vmem:[%s10780_s10 + $0x80] sm:$0xff] }
 0x58d   : > { %v3961_v16 = vadd.f32 %v3960_v42, %v3947_v44  ;;  %v7963_v42 = vld [vmem:[%s10780_s10 + $0x118] sm:$0xff]  ;;  %v7962_v44 = vld [vmem:[%s10780_s10 + $0x110] sm:$0xff] }
 0x58e   : > { %4779 = vmatpush.bf16.msra.mxu0 %v7938_v43  ;;  %v7357_v43 = vld [vmem:[%s10782_s12 + $0xf0] sm:$0xf] }
 0x590   : > { %v3974_v18 = vpop.f32.mrf.mxu2 }
 0x591   : > { %v3975_v1 = vadd.f32 %v3974_v18, %v3961_v16  ;;  %v7936_v18 = vld [vmem:[%s10780_s10 + $0x40] sm:$0xff]  ;;  %v7982_v16 = vld [vmem:[%s10780_s10 + $0x1b0] sm:$0xff] }
 0x592   : > { %v3948_v10 = vpop.f32.mrf.mxu0  ;;  %4780 = vmatpush.bf16.msra.mxu0 %v7937_v47  ;;  %v8031_v47 = vld [vmem:[%s10782_s12 + $0xf4] sm:$0xf0] }
 0x593   : > { %v3949_v55 = vadd.f32 %v3948_v10, %v3935_v41  ;;  %v3989_v29 = vadd.f32 %v3988_v27, %v3975_v1  ;;  %v7975_v10 = vld [vmem:[%s10780_s10 + $0x178] sm:$0xff]  ;;  %v7974_v27 = vld [vmem:[%s10780_s10 + $0x170] sm:$0xff]  ;;  %v7981_v1 = vld [vmem:[%s10780_s10 + $0x1a8] sm:$0xff] }
 0x594   : > { %v7983_v41 = vld [vmem:[%s10780_s10 + $0x1b8] sm:$0xff] }
 0x595   : > { %v3963_v51 = vadd.f32 %v3962_v58, %v3949_v55  ;;  %v7954_v55 = vld [vmem:[%s10780_s10 + $0xd0] sm:$0xff]  ;;  %v7961_v58 = vld [vmem:[%s10780_s10 + $0x108] sm:$0xff] }
 0x596   : > { %4781 = vmatpush.bf16.msra.mxu0 %v7936_v18 }
 0x598   : > { %v3976_v6 = vpop.f32.mrf.mxu2 }
 0x599   : > { %v3977_v56 = vadd.f32 %v3976_v6, %v3963_v51  ;;  %v7953_v6 = vld [vmem:[%s10780_s10 + $0xc8] sm:$0xff]  ;;  %v7960_v51 = vld [vmem:[%s10780_s10 + $0x100] sm:$0xff] }
 0x59a   : > { %v4002_v62 = vpop.f32.mrf.mxu0  ;;  %4826 = vmatpush.bf16.msrb.mxu0 %v7975_v10  ;;  %v8063_v10 = vld [vmem:[%s10782_s12 + $0x1f4] sm:$0xf0] }
 0x59b   : > { %v3991_v52 = vadd.f32 %v3990_v38, %v3977_v56  ;;  %v4003_v54 = vadd.f32 %v4002_v62, %v3989_v29  ;;  %v7973_v62 = vld [vmem:[%s10780_s10 + $0x168] sm:$0xff]  ;;  %v7972_v56 = vld [vmem:[%s10780_s10 + $0x160] sm:$0xff] }
 0x59c   : > { %v7952_v29 = vld [vmem:[%s10780_s10 + $0xc0] sm:$0xff] }
 0x59d   : > { %v4007_v22 = vmax.f32 %v4003_v54, 0.0  ;;  %v7980_v38 = vld [vmem:[%s10780_s10 + $0x1a0] sm:$0xff]  ;;  %v7971_v54 = vld [vmem:[%s10780_s10 + $0x158] sm:$0xff] }
 0x59e   : > { %4827 = vmatpush.bf16.msrb.mxu0 %v7974_v27 }
 0x5a2   : > { %v4004_v57 = vpop.f32.mrf.mxu0  ;;  %4828 = vmatpush.bf16.msrb.mxu0 %v7973_v62 }
 0x5a3   : > { %v4005_v53 = vadd.f32 %v4004_v57, %v3991_v52  ;;  %v7991_v52 = vld [vmem:[%s10780_s10 + $0x1f8] sm:$0xff] }
 0x5a4   : > { %v7979_v57 = vld [vmem:[%s10780_s10 + $0x198] sm:$0xff] }
 0x5a5   : > { %v4008_v23 = vmax.f32 %v4005_v53, 0.0  ;;  %v7970_v53 = vld [vmem:[%s10780_s10 + $0x150] sm:$0xff] }
 0x5a6   : > { %4829 = vmatpush.bf16.msrb.mxu0 %v7972_v56 }
 0x5a7   : > { %v4009_v2 = vpack.c.bf16 %v4008_v23, %v4007_v22  ;;  %v7990_v22 = vld [vmem:[%s10780_s10 + $0x1f0] sm:$0xff] }
 0x5a8   : > { %v7978_v23 = vld [vmem:[%s10780_s10 + $0x190] sm:$0xff] }
 0x5a9   : > { %4022 = vmatpush.bf16.msra.mxu1 %v4009_v2  ;;  %4041 = vmatpush.bf16.msra.mxu2 %v4009_v2 }
 0x5aa   : > { %4060 = vmatpush.bf16.msra.mxu3 %v4009_v2  ;;  %4830 = vmatpush.bf16.msrb.mxu0 %v7971_v54 }
 0x5ac   : > { %6930 = vmatmul.msk.bf16.vlgmr.msra.gmra.mxu1 %vm4011_vm3, %v4010_v37  ;;  %6932 = vmatmul.msk.bf16.vlgmr.msra.gmra.mxu2 %vm4011_vm3, %v6931_v50  ;;  %v7969_v37 = vld [vmem:[%s10780_s10 + $0x148] sm:$0xff] }
 0x5ad   : > { %4079 = vmatpush.bf16.msrb.mxu1 %v4009_v2  ;;  %4098 = vmatpush.bf16.msrb.mxu2 %v4009_v2  ;;  %v7977_v50 = vld [vmem:[%s10780_s10 + $0x188] sm:$0xff] }
 0x5ae   : > { %4117 = vmatpush.bf16.msrb.mxu3 %v4009_v2  ;;  %4831 = vmatpush.bf16.msrb.mxu0 %v7970_v53  ;;  %v8029_v53 = vld [vmem:[%s10782_s12 + $0xe4] sm:$0xf0] }
 0x5af   : > { %6934 = vmatmul.msk.bf16.vlgmr.msra.gmra.mxu3 %vm4011_vm3, %v6933_v12  ;;  %v7968_v12 = vld [vmem:[%s10780_s10 + $0x140] sm:$0xff] }
 0x5b1   : > { %4136 = vmatpush.bf16.msra.mxu1 %v4009_v2  ;;  %4174 = vmatpush.bf16.msra.mxu2 %v4009_v2 }
 0x5b2   : > { %4761 = vmatpush.bf16.msra.mxu3 %v7935_v26  ;;  %4832 = vmatpush.bf16.msrb.mxu0 %v7969_v37  ;;  %v7976_v26 = vld [vmem:[%s10780_s10 + $0x180] sm:$0xff] }
 0x5b3   : > { %v7477_v37 = vld [vmem:[%s10782_s12 + $0x1e0] sm:$0xf] }
 0x5b6   : > { %4762 = vmatpush.bf16.msra.mxu3 %v7934_v61  ;;  %4833 = vmatpush.bf16.msrb.mxu0 %v7968_v12  ;;  %v7987_v61 = vld [vmem:[%s10780_s10 + $0x1d8] sm:$0xff] }
 0x5ba   : > { %4763 = vmatpush.bf16.msra.mxu3 %v7933_v30 }
 0x5bc   : > { %6936 = vmatmul.msk.bf16.vlgmr.msrb.gmra.mxu1 %vm4011_vm3, %v6935_v33  ;;  %6938 = vmatmul.msk.bf16.vlgmr.msrb.gmra.mxu2 %vm4011_vm3, %v6937_v49  ;;  %v7999_v49 = vld [vmem:[%s10780_s10 + $0x238] sm:$0xff] }
 0x5bd   : > { %4155 = vmatpush.bf16.msrb.mxu1 %v4009_v2  ;;  %4800 = vmatpush.bf16.msrb.mxu2 %v7959_v25  ;;  %v7989_v2 = vld [vmem:[%s10780_s10 + $0x1e8] sm:$0xff] }
 0x5be   : > { %4764 = vmatpush.bf16.msra.mxu3 %v7932_v48 }
 0x5bf   : > { %6940 = vmatmul.msk.bf16.vlgmr.msrb.gmra.mxu3 %vm4011_vm3, %v6939_v21  ;;  %v7988_v21 = vld [vmem:[%s10780_s10 + $0x1e0] sm:$0xff] }
 0x5c1   : > { %4801 = vmatpush.bf16.msrb.mxu2 %v7958_v45 }
 0x5c2   : > { %4765 = vmatpush.bf16.msra.mxu3 %v7931_v7  ;;  %v7996_v7 = vld [vmem:[%s10780_s10 + $0x220] sm:$0xff] }
 0x5c5   : > { %4802 = vmatpush.bf16.msrb.mxu2 %v7957_v31  ;;  %v7997_v31 = vld [vmem:[%s10780_s10 + $0x228] sm:$0xff] }
 0x5c6   : > { %4766 = vmatpush.bf16.msra.mxu3 %v7930_v34 }
 0x5c9   : > { %4803 = vmatpush.bf16.msrb.mxu2 %v7956_v36  ;;  %v8047_v36 = vld [vmem:[%s10782_s12 + $0x174] sm:$0xf0] }
 0x5ca   : > { %4767 = vmatpush.bf16.msra.mxu3 %v7929_v11  ;;  %v7995_v11 = vld [vmem:[%s10780_s10 + $0x218] sm:$0xff] }
 0x5cc   : > { %6942 = vmatmul.msk.bf16.vlgmr.msra.gmra.mxu1 %vm4011_vm3, %v6941_v13  ;;  %6946 = vmatmul.msk.bf16.vlgmr.msra.gmra.mxu2 %vm4011_vm3, %v6945_v32  ;;  %v7986_v13 = vld [vmem:[%s10780_s10 + $0x1d0] sm:$0xff] }
 0x5cd   : > { %4787 = vmatpush.bf16.msra.mxu1 %v7951_v3  ;;  %4804 = vmatpush.bf16.msrb.mxu2 %v7955_v19  ;;  %v7985_v3 = vld [vmem:[%s10780_s10 + $0x1c8] sm:$0xff]  ;;  %v7485_v19 = vld [vmem:[%s10782_s12 + $0x1f0] sm:$0xf] }
 0x5ce   : > { %4768 = vmatpush.bf16.msra.mxu3 %v7928_v0 }
 0x5d1   : > { %4788 = vmatpush.bf16.msra.mxu1 %v7950_v24  ;;  %4805 = vmatpush.bf16.msrb.mxu2 %v7954_v55  ;;  %v7486_v55 = vor.u32 %v8063_v10, %v7485_v19  ;;  %v8005_v19 = vld [vmem:[%s10782_s12 + $0x24] sm:$0xf0] }
 0x5d2   : > { %4813 = vmatpush.bf16.msrb.mxu3 %v7967_v60  ;;  %v7984_v60 = vld [vmem:[%s10780_s10 + $0x1c0] sm:$0xff] }
 0x5d5   : > { %4789 = vmatpush.bf16.msra.mxu1 %v7949_v28  ;;  %4806 = vmatpush.bf16.msrb.mxu2 %v7953_v6 }
 0x5d6   : > { %4814 = vmatpush.bf16.msrb.mxu3 %v7966_v14  ;;  %v7994_v14 = vld [vmem:[%s10780_s10 + $0x210] sm:$0xff] }
 0x5d9   : > { %4790 = vmatpush.bf16.msra.mxu1 %v7948_v8  ;;  %4807 = vmatpush.bf16.msrb.mxu2 %v7952_v29 }
 0x5da   : > { %4815 = vmatpush.bf16.msrb.mxu3 %v7965_v17  ;;  %v8015_v17 = vld [vmem:[%s10782_s12 + $0x74] sm:$0xf0] }
 0x5dc   : > { %6944 = vmatmul.msk.bf16.vlgmr.msrb.gmra.mxu1 %vm4011_vm3, %v6943_v20 }
 0x5dd   : > { %4791 = vmatpush.bf16.msra.mxu1 %v7947_v63  ;;  %4852 = vmatpush.bf16.msra.mxu2 %v7991_v52  ;;  %v7293_v63 = vld [vmem:[%s10782_s12 + $0x70] sm:$0xf] }
 0x5de   : > { %4816 = vmatpush.bf16.msrb.mxu3 %v7964_v5  ;;  %v7294_v5 = vor.u32 %v8015_v17, %v7293_v63  ;;  %v8023_v17 = vld [vmem:[%s10782_s12 + $0xb4] sm:$0xf0] }
 0x5e1   : > { %4792 = vmatpush.bf16.msra.mxu1 %v7946_v39  ;;  %4853 = vmatpush.bf16.msra.mxu2 %v7990_v22  ;;  %v7413_v22 = vld [vmem:[%s10782_s12 + $0x160] sm:$0xf] }
 0x5e2   : > { %4817 = vmatpush.bf16.msrb.mxu3 %v7963_v42  ;;  %v7358_v42 = vor.u32 %v8031_v47, %v7357_v43  ;;  %v7389_v43 = vld [vmem:[%s10782_s12 + $0x130] sm:$0xf] }
 0x5e3   : > { %v7453_v47 = vld [vmem:[%s10782_s12 + $0x1b0] sm:$0xf] }
 0x5e5   : > { %4793 = vmatpush.bf16.msra.mxu1 %v7945_v46  ;;  %4854 = vmatpush.bf16.msra.mxu2 %v7989_v2  ;;  %v7421_v46 = vld [vmem:[%s10782_s12 + $0x170] sm:$0xf]  ;;  %v8045_v2 = vld [vmem:[%s10782_s12 + $0x164] sm:$0xf0] }
 0x5e6   : > { %4818 = vmatpush.bf16.msrb.mxu3 %v7962_v44  ;;  %v7422_v18 = vor.u32 %v8047_v36, %v7421_v46  ;;  %v7992_v44 = vld [vmem:[%s10780_s10 + $0x200] sm:$0xff]  ;;  %v7414_v12 = vor.u32 %v8045_v2, %v7413_v22  ;;  %v8055_v46 = vld [vmem:[%s10782_s12 + $0x1b4] sm:$0xf0]  ;;  %v7437_v22 = vld [vmem:[%s10782_s12 + $0x190] sm:$0xf] }
 0x5e7   : > { %v7237_v2 = vld [vmem:[%s10782_s12] sm:$0xf] }
 0x5e9   : > { %4794 = vmatpush.bf16.msra.mxu1 %v7944_v4  ;;  %4855 = vmatpush.bf16.msra.mxu2 %v7988_v21  ;;  %v7285_v4 = vld [vmem:[%s10782_s12 + $0x60] sm:$0xf]  ;;  %v8011_v21 = vld [vmem:[%s10782_s12 + $0x54] sm:$0xf0] }
 0x5ea   : > { %4819 = vmatpush.bf16.msrb.mxu3 %v7961_v58 }
 0x5ed   : > { %4839 = vmatpush.bf16.msrb.mxu1 %v7983_v41  ;;  %4856 = vmatpush.bf16.msra.mxu2 %v7987_v61  ;;  %v8013_v41 = vld [vmem:[%s10782_s12 + $0x64] sm:$0xf0]  ;;  %v8027_v61 = vld [vmem:[%s10782_s12 + $0xd4] sm:$0xf0] }
 0x5ee   : > { %4820 = vmatpush.bf16.msrb.mxu3 %v7960_v51  ;;  %v7286_v27 = vor.u32 %v8013_v41, %v7285_v4  ;;  %v7317_v4 = vld [vmem:[%s10782_s12 + $0xa0] sm:$0xf]  ;;  %v8021_v41 = vld [vmem:[%s10782_s12 + $0xa4] sm:$0xf0] }
 0x5f1   : > { %4840 = vmatpush.bf16.msrb.mxu1 %v7982_v16  ;;  %4857 = vmatpush.bf16.msra.mxu2 %v7986_v13  ;;  %v7269_v13 = vld [vmem:[%s10782_s12 + $0x40] sm:$0xf] }
 0x5f5   : > { %4841 = vmatpush.bf16.msrb.mxu1 %v7981_v1  ;;  %4858 = vmatpush.bf16.msra.mxu2 %v7985_v3  ;;  %v8009_v3 = vld [vmem:[%s10782_s12 + $0x44] sm:$0xf0] }
 0x5f9   : > { %4842 = vmatpush.bf16.msrb.mxu1 %v7980_v38  ;;  %4859 = vmatpush.bf16.msra.mxu2 %v7984_v60  ;;  %v8041_v60 = vld [vmem:[%s10782_s12 + $0x144] sm:$0xf0] }
 0x5fd   : > { %4843 = vmatpush.bf16.msrb.mxu1 %v7979_v57  ;;  %v7349_v57 = vld [vmem:[%s10782_s12 + $0xe0] sm:$0xf] }
 0x601   : > { %4844 = vmatpush.bf16.msrb.mxu1 %v7978_v23  ;;  %v7350_v23 = vor.u32 %v8029_v53, %v7349_v57 }
 0x605   : > { %4845 = vmatpush.bf16.msrb.mxu1 %v7977_v50  ;;  %v8061_v50 = vld [vmem:[%s10782_s12 + $0x1e4] sm:$0xf0] }
 0x609   : > { %4846 = vmatpush.bf16.msrb.mxu1 %v7976_v26  ;;  %v7341_v26 = vld [vmem:[%s10782_s12 + $0xd0] sm:$0xf] }
 0x629   : > { %v4024_v33 = vpop.f32.mrf.mxu1 }
 0x62a   : > { %v4028_v25 = vpack.c.bf16 %v4024_v33, %v4024_v33  ;;  %v7478_v33 = vor.u32 %v8061_v50, %v7477_v37  ;;  %v8001_v50 = vld [vmem:[%s10782_s12 + $0x4] sm:$0xf0] }
 0x62c   : > { %4769 = vmatmul.bf16.vlgmr.msra.gmra.mxu3 %v4028_v25 }
 0x62d   : > { %4865 = vmatpush.bf16.msra.mxu3 %v7999_v49  ;;  %v7277_v49 = vld [vmem:[%s10782_s12 + $0x50] sm:$0xf] }
 0x62e   : > { %v7278_v25 = vor.u32 %v8011_v21, %v7277_v49  ;;  %v7295_v49 = vld [vmem:[%s10782_s12 + $0x78] sm:$0xf0]  ;;  %v7301_v21 = vld [vmem:[%s10782_s12 + $0x80] sm:$0xf] }
 0x62f   : > { %v4043_v45 = vpop.f32.mrf.mxu2 }
 0x630   : > { %v4047_v9 = vpack.c.bf16 %v4043_v45, %v4043_v45  ;;  %v8043_v45 = vld [vmem:[%s10782_s12 + $0x154] sm:$0xf0] }
 0x631   : > { %v4026_v30 = vpop.f32.mrf.mxu1  ;;  %4866 = vmatpush.bf16.msra.mxu3 %v7998_v40  ;;  %v7405_v40 = vld [vmem:[%s10782_s12 + $0x150] sm:$0xf] }
 0x632   : > { %v4062_v48 = vpop.f32.mrf.mxu3  ;;  %4782 = vmatmul.bf16.vlgmr.msra.gmra.mxu0 %v4047_v9  ;;  %v7342_v9 = vor.u32 %v8027_v61, %v7341_v26  ;;  %v7406_v30 = vor.u32 %v8043_v45, %v7405_v40  ;;  %v7365_v61 = vld [vmem:[%s10782_s12 + $0x100] sm:$0xf]  ;;  %v8033_v40 = vld [vmem:[%s10782_s12 + $0x104] sm:$0xf0] }
 0x633   : > { %v4066_v32 = vpack.c.bf16 %v4062_v48, %v4062_v48  ;;  %5280 = vmatpush.bf16.msra.mxu0 %v7294_v5  ;;  %v8059_v48 = vld [vmem:[%s10782_s12 + $0x1d4] sm:$0xf0] }
 0x635   : > { %4795 = vmatmul.bf16.vlgmr.msra.gmra.mxu1 %v4066_v32  ;;  %4867 = vmatpush.bf16.msra.mxu3 %v7997_v31  ;;  %v7469_v31 = vld [vmem:[%s10782_s12 + $0x1d0] sm:$0xf] }
 0x636   : > { %5293 = vmatpush.bf16.msra.mxu1 %v7358_v42  ;;  %v7470_v32 = vor.u32 %v8059_v48, %v7469_v31  ;;  %v7454_v42 = vor.u32 %v8055_v46, %v7453_v47  ;;  %v7366_v31 = vor.u32 %v8033_v40, %v7365_v61  ;;  %v7429_v48 = vld [vmem:[%s10782_s12 + $0x180] sm:$0xf]  ;;  %v7263_v61 = vld [vmem:[%s10782_s12 + $0x38] sm:$0xf0] }
 0x637   : > { %v4045_v24 = vpop.f32.mrf.mxu2  ;;  %5281 = vmatpush.bf16.msra.mxu0 %v7286_v27  ;;  %v7318_v27 = vor.u32 %v8021_v41, %v7317_v4  ;;  %v8010_v4 = vld [vmem:[%s10782_s12 + $0x54] sm:$0xf]  ;;  %v7279_v41 = vld [vmem:[%s10782_s12 + $0x58] sm:$0xf0] }
 0x638   : > { %v7333_v24 = vld [vmem:[%s10782_s12 + $0xc0] sm:$0xf] }
 0x639   : > { %v4081_v34 = vpop.f32.mrf.mxu1  ;;  %4868 = vmatpush.bf16.msra.mxu3 %v7996_v7  ;;  %v7270_v7 = vor.u32 %v8009_v3, %v7269_v13  ;;  %v8049_v13 = vld [vmem:[%s10782_s12 + $0x184] sm:$0xf0] }
 0x63a   : > { %v4064_v0 = vpop.f32.mrf.mxu3  ;;  %v4085_v20 = vpack.c.bf16 %v4081_v34, %v4081_v34  ;;  %5294 = vmatpush.bf16.msra.mxu1 %v7350_v23  ;;  %v8025_v34 = vld [vmem:[%s10782_s12 + $0xc4] sm:$0xf0]  ;;  %v8051_v23 = vld [vmem:[%s10782_s12 + $0x194] sm:$0xf0]  ;;  %v7430_v3 = vor.u32 %v8049_v13, %v7429_v48  ;;  %v8022_v13 = vld [vmem:[%s10782_s12 + $0xb4] sm:$0xf] }
 0x63b   : > { %5282 = vmatpush.bf16.msra.mxu0 %v7278_v25  ;;  %v7334_v0 = vor.u32 %v8025_v34, %v7333_v24  ;;  %v7438_v37 = vor.u32 %v8051_v23, %v7437_v22  ;;  %v8017_v25 = vld [vmem:[%s10782_s12 + $0x84] sm:$0xf0]  ;;  %v8046_v24 = vld [vmem:[%s10782_s12 + $0x174] sm:$0xf]  ;;  %v7423_v34 = vld [vmem:[%s10782_s12 + $0x178] sm:$0xf0] }
 0x63c   : > { %4808 = vmatmul.bf16.vlgmr.msrb.gmra.mxu2 %v4085_v20  ;;  %v7461_v20 = vld [vmem:[%s10782_s12 + $0x1c0] sm:$0xf]  ;;  %v8024_v22 = vld [vmem:[%s10782_s12 + $0xc4] sm:$0xf]  ;;  %v7335_v23 = vld [vmem:[%s10782_s12 + $0xc8] sm:$0xf0] }
 0x63d   : > { %4869 = vmatpush.bf16.msra.mxu3 %v7995_v11  ;;  %5306 = vmatpush.bf16.msrb.mxu2 %v7422_v18  ;;  %v7397_v11 = vld [vmem:[%s10782_s12 + $0x140] sm:$0xf] }
 0x63e   : > { %5295 = vmatpush.bf16.msra.mxu1 %v7342_v9  ;;  %v7253_v18 = vld [vmem:[%s10782_s12 + $0x20] sm:$0xf] }
 0x63f   : > { %v4100_v59 = vpop.f32.mrf.mxu2  ;;  %5283 = vmatpush.bf16.msra.mxu0 %v7270_v7  ;;  %v7254_v10 = vor.u32 %v8005_v19, %v7253_v18  ;;  %v7359_v7 = vld [vmem:[%s10782_s12 + $0xf8] sm:$0xf0]  ;;  %v7479_v18 = vld [vmem:[%s10782_s12 + $0x1e8] sm:$0xf0] }
 0x640   : > { %v4104_v28 = vpack.c.bf16 %v4100_v59, %v4100_v59  ;;  %v7398_v59 = vor.u32 %v8041_v60, %v7397_v11  ;;  %v7426_v60 = vor.u32 %v8046_v24, %v7423_v34  ;;  %v8054_v24 = vld [vmem:[%s10782_s12 + $0x1b4] sm:$0xf]  ;;  %v7455_v34 = vld [vmem:[%s10782_s12 + $0x1b8] sm:$0xf0] }
 0x641   : > { %v4083_v8 = vpop.f32.mrf.mxu1  ;;  %4870 = vmatpush.bf16.msra.mxu3 %v7994_v14  ;;  %5307 = vmatpush.bf16.msrb.mxu2 %v7414_v12  ;;  %v8057_v14 = vld [vmem:[%s10782_s12 + $0x1c4] sm:$0xf0]  ;;  %v7238_v12 = vor.u32 %v8001_v50, %v7237_v2  ;;  %v8040_v2 = vld [vmem:[%s10782_s12 + $0x144] sm:$0xf]  ;;  %v7338_v50 = vor.u32 %v8024_v22, %v7335_v23  ;;  %v7431_v22 = vld [vmem:[%s10782_s12 + $0x188] sm:$0xf0] }
 0x642   : > { %v4119_v15 = vpop.f32.mrf.mxu3  ;;  %4821 = vmatmul.bf16.vlgmr.msrb.gmra.mxu3 %v4104_v28  ;;  %v7462_v28 = vor.u32 %v8057_v14, %v7461_v20  ;;  %v8007_v8 = vld [vmem:[%s10782_s12 + $0x34] sm:$0xf0]  ;;  %5296 = vmatpush.bf16.msra.mxu1 %v7334_v0  ;;  %v8062_v20 = vld [vmem:[%s10782_s12 + $0x1f4] sm:$0xf]  ;;  %v7487_v14 = vld [vmem:[%s10782_s12 + $0x1f8] sm:$0xf0] }
 0x643   : > { %v4123_v39 = vpack.c.bf16 %v4119_v15, %v4119_v15  ;;  %v7325_v15 = vld [vmem:[%s10782_s12 + $0xb0] sm:$0xf] }
 0x644   : > { %v7326_v5 = vor.u32 %v8023_v17, %v7325_v15 }
 0x645   : > { %4834 = vmatmul.bf16.vlgmr.msrb.gmra.mxu0 %v4123_v39  ;;  %4871 = vmatpush.bf16.msra.mxu3 %v7993_v35  ;;  %v7261_v35 = vld [vmem:[%s10782_s12 + $0x30] sm:$0xf]  ;;  %v8039_v39 = vld [vmem:[%s10782_s12 + $0x134] sm:$0xf0] }
 0x646   : > { %5308 = vmatpush.bf16.msrb.mxu2 %v7406_v30  ;;  %v7262_v63 = vor.u32 %v8007_v8, %v7261_v35  ;;  %v7390_v36 = vor.u32 %v8039_v39, %v7389_v43  ;;  %5297 = vmatpush.bf16.msra.mxu1 %v7326_v5  ;;  %v7302_v30 = vor.u32 %v8017_v25, %v7301_v21  ;;  %v7287_v35 = vld [vmem:[%s10782_s12 + $0x68] sm:$0xf0]  ;;  %v8028_v43 = vld [vmem:[%s10782_s12 + $0xe4] sm:$0xf]  ;;  %v8006_v25 = vld [vmem:[%s10782_s12 + $0x34] sm:$0xf] }
 0x647   : > { %v4102_v16 = vpop.f32.mrf.mxu2  ;;  %v7351_v39 = vld [vmem:[%s10782_s12 + $0xe8] sm:$0xf0]  ;;  %v8044_v5 = vld [vmem:[%s10782_s12 + $0x164] sm:$0xf] }
 0x648   : > { %5284 = vmatpush.bf16.msra.mxu0 %v7262_v63  ;;  %v7445_v16 = vld [vmem:[%s10782_s12 + $0x1a0] sm:$0xf]  ;;  %v7354_v46 = vor.u32 %v8028_v43, %v7351_v39 }
 0x649   : > { %v4138_v58 = vpop.f32.mrf.mxu1  ;;  %4872 = vmatpush.bf16.msra.mxu3 %v7992_v44  ;;  %v7381_v44 = vld [vmem:[%s10782_s12 + $0x120] sm:$0xf] }
 0x64a   : > { %v4121_v6 = vpop.f32.mrf.mxu3  ;;  %v4142_v62 = vpack.c.bf16 %v4138_v58, %v4138_v58  ;;  %5309 = vmatpush.bf16.msrb.mxu2 %v7398_v59  ;;  %v8053_v58 = vld [vmem:[%s10782_s12 + $0x1a4] sm:$0xf0]  ;;  %5298 = vmatpush.bf16.msra.mxu1 %v7318_v27  ;;  %v8012_v59 = vld [vmem:[%s10782_s12 + $0x64] sm:$0xf]  ;;  %v7282_v27 = vor.u32 %v8010_v4, %v7279_v41  ;;  %v8034_v4 = vld [vmem:[%s10782_s12 + $0x114] sm:$0xf] }
 0x64b   : > { %v7290_v8 = vor.u32 %v8012_v59, %v7287_v35  ;;  %v8020_v59 = vld [vmem:[%s10782_s12 + $0xa4] sm:$0xf]  ;;  %v7375_v41 = vld [vmem:[%s10782_s12 + $0x118] sm:$0xf0] }
 0x64c   : > { %4847 = vmatmul.bf16.vlgmr.msrb.gmra.mxu1 %v4142_v62  ;;  %5285 = vmatpush.bf16.msra.mxu0 %v7254_v10  ;;  %v7446_v62 = vor.u32 %v8053_v58, %v7445_v16  ;;  %v7343_v16 = vld [vmem:[%s10782_s12 + $0xd8] sm:$0xf0]  ;;  %v8042_v58 = vld [vmem:[%s10782_s12 + $0x154] sm:$0xf] }
 0x64d   : > { %5319 = vmatpush.bf16.msrb.mxu3 %v7486_v55  ;;  %v8037_v55 = vld [vmem:[%s10782_s12 + $0x124] sm:$0xf0] }
 0x64e   : > { %5310 = vmatpush.bf16.msrb.mxu2 %v7390_v36  ;;  %v7382_v6 = vor.u32 %v8037_v55, %v7381_v44  ;;  %v7415_v36 = vld [vmem:[%s10782_s12 + $0x168] sm:$0xf0]  ;;  %v8026_v55 = vld [vmem:[%s10782_s12 + $0xd4] sm:$0xf] }
 0x64f   : > { %v4176_v1 = vpop.f32.mrf.mxu2  ;;  %v7418_v19 = vor.u32 %v8044_v5, %v7415_v36  ;;  %v8052_v5 = vld [vmem:[%s10782_s12 + $0x1a4] sm:$0xf]  ;;  %v8002_v36 = vld [vmem:[%s10782_s12 + $0x14] sm:$0xf] }
 0x650   : > { %v4180_v51 = vpack.c.bf16 %v4176_v1, %v4176_v1  ;;  %v7245_v1 = vld [vmem:[%s10782_s12 + $0x10] sm:$0xf] }
 0x651   : > { %v4140_v56 = vpop.f32.mrf.mxu1  ;;  %5320 = vmatpush.bf16.msrb.mxu3 %v7478_v33  ;;  %v8014_v33 = vld [vmem:[%s10782_s12 + $0x74] sm:$0xf] }
 0x652   : > { %4873 = vmatmul.bf16.vlgmr.msra.gmra.mxu3 %v4180_v51  ;;  %v8003_v51 = vld [vmem:[%s10782_s12 + $0x14] sm:$0xf0]  ;;  %v7309_v56 = vld [vmem:[%s10782_s12 + $0x90] sm:$0xf]  ;;  %5311 = vmatpush.bf16.msrb.mxu2 %v7382_v6  ;;  %v7298_v26 = vor.u32 %v8014_v33, %v7295_v49  ;;  %v7346_v6 = vor.u32 %v8026_v55, %v7343_v16  ;;  %v8056_v33 = vld [vmem:[%s10782_s12 + $0x1c4] sm:$0xf] }
 0x653   : > { %v7463_v49 = vld [vmem:[%s10782_s12 + $0x1c8] sm:$0xf0]  ;;  %v7439_v16 = vld [vmem:[%s10782_s12 + $0x198] sm:$0xf0] }
 0x655   : > { %5321 = vmatpush.bf16.msrb.mxu3 %v7470_v32  ;;  %v8030_v32 = vld [vmem:[%s10782_s12 + $0xf4] sm:$0xf] }
 0x656   : > { %v7362_v0 = vor.u32 %v8030_v32, %v7359_v7  ;;  %v7327_v32 = vld [vmem:[%s10782_s12 + $0xb8] sm:$0xf0] }
 0x657   : > { %v4178_v29 = vpop.f32.mrf.mxu2  ;;  %v7330_v7 = vor.u32 %v8022_v13, %v7327_v32  ;;  %v7541_v13 = vld [vmem:[%s10784_s14 + $0x60] sm:$0xf] }
 0x658   : > { %v7246_v29 = vor.u32 %v8003_v51, %v7245_v1  ;;  %v8058_v1 = vld [vmem:[%s10782_s12 + $0x1d4] sm:$0xf]  ;;  %v7471_v51 = vld [vmem:[%s10782_s12 + $0x1d8] sm:$0xf0] }
 0x659   : > { %v4157_v38 = vpop.f32.mrf.mxu1  ;;  %5322 = vmatpush.bf16.msrb.mxu3 %v7462_v28  ;;  %v7490_v28 = vor.u32 %v8062_v20, %v7487_v14  ;;  %v8004_v20 = vld [vmem:[%s10782_s12 + $0x24] sm:$0xf]  ;;  %v7255_v14 = vld [vmem:[%s10782_s12 + $0x28] sm:$0xf0] }
 0x65a   : > { %v4161_v52 = vpack.c.bf16 %v4157_v38, %v4157_v38  ;;  %v8019_v38 = vld [vmem:[%s10782_s12 + $0x94] sm:$0xf0]  ;;  %5286 = vmatpush.bf16.msra.mxu0 %v7246_v29  ;;  %v7474_v29 = vor.u32 %v8058_v1, %v7471_v51  ;;  %v7258_v35 = vor.u32 %v8004_v20, %v7255_v14  ;;  %v7378_v51 = vor.u32 %v8034_v4, %v7375_v41  ;;  %v8094_v41 = vld [vmem:[%s10784_s14 + $0xf4] sm:$0xf] }
 0x65b   : > { %v7310_v57 = vor.u32 %v8019_v38, %v7309_v56  ;;  %v8008_v38 = vld [vmem:[%s10782_s12 + $0x44] sm:$0xf]  ;;  %v8095_v4 = vld [vmem:[%s10784_s14 + $0xf4] sm:$0xf0] }
 0x65c   : > { %4860 = vmatmul.bf16.vlgmr.msra.gmra.mxu2 %v4161_v52  ;;  %v7373_v52 = vld [vmem:[%s10782_s12 + $0x110] sm:$0xf] }
 0x65d   : > { %5323 = vmatpush.bf16.msrb.mxu3 %v7454_v42  ;;  %5299 = vmatpush.bf16.msra.mxu1 %v7310_v57  ;;  %v8060_v42 = vld [vmem:[%s10782_s12 + $0x1e4] sm:$0xf] }
 0x65e   : > { %5287 = vmatpush.bf16.msra.mxu0 %v7238_v12  ;;  %v7482_v10 = vor.u32 %v8060_v42, %v7479_v18  ;;  %v7399_v12 = vld [vmem:[%s10782_s12 + $0x148] sm:$0xf0]  ;;  %v8018_v18 = vld [vmem:[%s10782_s12 + $0x94] sm:$0xf] }
 0x65f   : > { %v7402_v21 = vor.u32 %v8040_v2, %v7399_v12 }
 0x661   : > { %v4159_v54 = vpop.f32.mrf.mxu1  ;;  %5324 = vmatpush.bf16.msrb.mxu3 %v7446_v62  ;;  %5300 = vmatpush.bf16.msra.mxu1 %v7302_v30  ;;  %v7407_v62 = vld [vmem:[%s10782_s12 + $0x158] sm:$0xf0]  ;;  %v7266_v30 = vor.u32 %v8006_v25, %v7263_v61 }
 0x662   : > { %v8035_v54 = vld [vmem:[%s10782_s12 + $0x114] sm:$0xf0]  ;;  %5332 = vmatpush.bf16.msrb.mxu0 %v7298_v26  ;;  %v7410_v56 = vor.u32 %v8042_v58, %v7407_v62  ;;  %v7466_v26 = vor.u32 %v8056_v33, %v7463_v49  ;;  %v8000_v58 = vld [vmem:[%s10782_s12 + $0x4] sm:$0xf] }
 0x663   : > { %v7374_v53 = vor.u32 %v8035_v54, %v7373_v52  ;;  %v7271_v52 = vld [vmem:[%s10782_s12 + $0x48] sm:$0xf0]  ;;  %v8123_v54 = vld [vmem:[%s10781_s11] ss:$0 sm:$0xff] }
 0x665   : > { %5312 = vmatpush.bf16.msrb.mxu2 %v7374_v53  ;;  %5325 = vmatpush.bf16.msrb.mxu3 %v7438_v37  ;;  %v7274_v53 = vor.u32 %v8008_v38, %v7271_v52  ;;  %v7303_v38 = vld [vmem:[%s10782_s12 + $0x88] sm:$0xf0]  ;;  %v8032_v52 = vld [vmem:[%s10782_s12 + $0x104] sm:$0xf] }
 0x666   : > { %5345 = vmatpush.bf16.msrb.mxu1 %v7362_v0  ;;  %5333 = vmatpush.bf16.msrb.mxu0 %v7290_v8  ;;  %v7319_v8 = vld [vmem:[%s10782_s12 + $0xa8] sm:$0xf0] }
 0x667   : > { %v7322_v43 = vor.u32 %v8020_v59, %v7319_v8  ;;  %v8076_v59 = vld [vmem:[%s10784_s14 + $0x64] sm:$0xf]  ;;  %v7533_v8 = vld [vmem:[%s10784_s14 + $0x50] sm:$0xf] }
 0x669   : > { %5313 = vmatpush.bf16.msrb.mxu2 %v7366_v31  ;;  %5326 = vmatpush.bf16.msrb.mxu3 %v7430_v3  ;;  %v8038_v3 = vld [vmem:[%s10782_s12 + $0x134] sm:$0xf] }
 0x66a   : > { %5346 = vmatpush.bf16.msrb.mxu1 %v7354_v46  ;;  %5334 = vmatpush.bf16.msrb.mxu0 %v7282_v27  ;;  %v7447_v46 = vld [vmem:[%s10782_s12 + $0x1a8] sm:$0xf0]  ;;  %v8050_v27 = vld [vmem:[%s10782_s12 + $0x194] sm:$0xf] }
 0x66b   : > { %v7450_v42 = vor.u32 %v8052_v5, %v7447_v46  ;;  %v7525_v46 = vld [vmem:[%s10784_s14 + $0x40] sm:$0xf] }
 0x66d   : > { %5358 = vmatpush.bf16.msra.mxu2 %v7426_v60  ;;  %5371 = vmatpush.bf16.msra.mxu3 %v7490_v28  ;;  %v7458_v60 = vor.u32 %v8054_v24, %v7455_v34  ;;  %v8077_v24 = vld [vmem:[%s10784_s14 + $0x64] sm:$0xf0] }
 0x66e   : > { %5347 = vmatpush.bf16.msrb.mxu1 %v7346_v6  ;;  %5335 = vmatpush.bf16.msrb.mxu0 %v7274_v53  ;;  %v7239_v6 = vld [vmem:[%s10782_s12 + $0x8] sm:$0xf0]  ;;  %v8048_v53 = vld [vmem:[%s10782_s12 + $0x184] sm:$0xf] }
 0x66f   : > { %v7434_v33 = vor.u32 %v8048_v53, %v7431_v22  ;;  %v7509_v22 = vld [vmem:[%s10784_s14 + $0x20] sm:$0xf] }
 0x671   : > { %5359 = vmatpush.bf16.msra.mxu2 %v7418_v19  ;;  %5372 = vmatpush.bf16.msra.mxu3 %v7482_v10  ;;  %v7311_v19 = vld [vmem:[%s10782_s12 + $0x98] sm:$0xf0] }
 0x672   : > { %5348 = vmatpush.bf16.msrb.mxu1 %v7338_v50  ;;  %5336 = vmatpush.bf16.msrb.mxu0 %v7266_v30  ;;  %v7314_v55 = vor.u32 %v8018_v18, %v7311_v19  ;;  %v8079_v30 = vld [vmem:[%s10784_s14 + $0x74] sm:$0xf0]  ;;  %v7527_v18 = vld [vmem:[%s10784_s14 + $0x48] sm:$0xf0] }
 0x675   : > { %5360 = vmatpush.bf16.msra.mxu2 %v7410_v56  ;;  %5373 = vmatpush.bf16.msra.mxu3 %v7474_v29  ;;  %v7442_v56 = vor.u32 %v8050_v27, %v7439_v16  ;;  %v8016_v29 = vld [vmem:[%s10782_s12 + $0x84] sm:$0xf]  ;;  %v7517_v16 = vld [vmem:[%s10784_s14 + $0x30] sm:$0xf] }
 0x676   : > { %5349 = vmatpush.bf16.msrb.mxu1 %v7330_v7  ;;  %5337 = vmatpush.bf16.msrb.mxu0 %v7258_v35  ;;  %v7542_v35 = vor.u32 %v8077_v24, %v7541_v13  ;;  %v8089_v13 = vld [vmem:[%s10784_s14 + $0xc4] sm:$0xf0] }
 0x677   : > { %v8065_v24 = vld [vmem:[%s10784_s14 + $0x4] sm:$0xf0] }
 0x679   : > { %5361 = vmatpush.bf16.msra.mxu2 %v7402_v21  ;;  %5374 = vmatpush.bf16.msra.mxu3 %v7466_v26 }
 0x67a   : > { %5350 = vmatpush.bf16.msrb.mxu1 %v7322_v43  ;;  %v7535_v43 = vld [vmem:[%s10784_s14 + $0x58] sm:$0xf0] }
 0x67d   : > { %5375 = vmatpush.bf16.msra.mxu3 %v7458_v60 }
 0x67e   : > { %5351 = vmatpush.bf16.msrb.mxu1 %v7314_v55  ;;  %v7615_v55 = vld [vmem:[%s10784_s14 + $0xf8] sm:$0xf0] }
 0x681   : > { %5376 = vmatpush.bf16.msra.mxu3 %v7450_v42  ;;  %v8072_v42 = vld [vmem:[%s10784_s14 + $0x44] sm:$0xf] }
 0x682   : > { %v7530_v19 = vor.u32 %v8072_v42, %v7527_v18  ;;  %v7565_v42 = vld [vmem:[%s10784_s14 + $0x90] sm:$0xf]  ;;  %v8082_v18 = vld [vmem:[%s10784_s14 + $0x94] sm:$0xf] }
 0x685   : > { %5377 = vmatpush.bf16.msra.mxu3 %v7442_v56  ;;  %v7605_v56 = vld [vmem:[%s10784_s14 + $0xe0] sm:$0xf] }
 0x689   : > { %5378 = vmatpush.bf16.msra.mxu3 %v7434_v33  ;;  %v7597_v33 = vld [vmem:[%s10784_s14 + $0xd0] sm:$0xf] }
 0x6af   : > { %v10297_v45 = vpop.f32.mrf.mxu3  ;;  %v10299_v9 = vpop.f32.mrf.mxu0 }
 0x6b0   : > { %v4771_v48 = vadd.f32 %v8123_v54, %v10297_v45  ;;  %v7391_v45 = vld [vmem:[%s10782_s12 + $0x138] sm:$0xf0]  ;;  %v7242_v54 = vor.u32 %v8000_v58, %v7239_v6  ;;  %v8071_v58 = vld [vmem:[%s10784_s14 + $0x34] sm:$0xf0]  ;;  %v7618_v6 = vor.u32 %v8094_v41, %v7615_v55  ;;  %v4954_v41 = vld [vmem:[%s10783_s13] sm:$0x3] }
 0x6b1   : > { %v7394_v0 = vor.u32 %v8038_v3, %v7391_v45  ;;  %v8081_v55 = vld [vmem:[%s10784_s14 + $0x84] sm:$0xf0] }
 0x6b2   : > { %v10319_v11 = vpop.f32.mrf.mxu1 }
 0x6b3   : > { %5362 = vmatpush.bf16.msra.mxu2 %v7394_v0 }
 0x6b7   : > { %v4772_v15 = vpop.f32.mrf.mxu3  ;;  %v4785_v63 = vpop.f32.mrf.mxu0 }
 0x6b8   : > { %v8036_v15 = vld [vmem:[%s10782_s12 + $0x124] sm:$0xf]  ;;  %v7383_v63 = vld [vmem:[%s10782_s12 + $0x128] sm:$0xf0] }
 0x6b9   : > { %v7386_v39 = vor.u32 %v8036_v15, %v7383_v63  ;;  %v8075_v15 = vld [vmem:[%s10784_s14 + $0x54] sm:$0xf0] }
 0x6ba   : > { %v4798_v17 = vpop.f32.mrf.mxu1 }
 0x6bb   : > { %v4784_v17 = vadd.f32 %v10299_v9, %v4771_v48  ;;  %v7247_v9 = vld [vmem:[%s10782_s12 + $0x18] sm:$0xf0]  ;;  %5363 = vmatpush.bf16.msra.mxu2 %v7386_v39  ;;  %v7534_v39 = vor.u32 %v8075_v15, %v7533_v8  ;;  %v8086_v8 = vld [vmem:[%s10784_s14 + $0xb4] sm:$0xf] }
 0x6bc   : > { %v7250_v10 = vor.u32 %v8002_v36, %v7247_v9  ;;  %v8073_v36 = vld [vmem:[%s10784_s14 + $0x44] sm:$0xf0]  ;;  %v7583_v15 = vld [vmem:[%s10784_s14 + $0xb8] sm:$0xf0] }
 0x6bd   : > { %v4797_v1 = vadd.f32 %v10319_v11, %v4784_v17  ;;  %v7367_v11 = vld [vmem:[%s10782_s12 + $0x108] sm:$0xf0]  ;;  %v8074_v17 = vld [vmem:[%s10784_s14 + $0x54] sm:$0xf]  ;;  %v7526_v9 = vor.u32 %v8073_v36, %v7525_v46 }
 0x6be   : > { %5338 = vmatpush.bf16.msrb.mxu0 %v7250_v10  ;;  %v7370_v12 = vor.u32 %v8032_v52, %v7367_v11  ;;  %v7538_v5 = vor.u32 %v8074_v17, %v7535_v43  ;;  %v7613_v10 = vld [vmem:[%s10784_s14 + $0xf0] sm:$0xf]  ;;  %v8092_v52 = vld [vmem:[%s10784_s14 + $0xe4] sm:$0xf]  ;;  %v7573_v17 = vld [vmem:[%s10784_s14 + $0xa0] sm:$0xf] }
 0x6bf   : > { %v10342_v47 = vpop.f32.mrf.mxu2  ;;  %5364 = vmatpush.bf16.msra.mxu2 %v7378_v51  ;;  %v7614_v27 = vor.u32 %v8095_v4, %v7613_v10  ;;  %v7519_v51 = vld [vmem:[%s10784_s14 + $0x38] sm:$0xf0]  ;;  %v8085_v43 = vld [vmem:[%s10784_s14 + $0xa4] sm:$0xf0]  ;;  %v7575_v46 = vld [vmem:[%s10784_s14 + $0xa8] sm:$0xf0] }
 0x6c0   : > { %v4810_v23 = vadd.f32 %v10342_v47, %v4797_v1  ;;  %v8070_v1 = vld [vmem:[%s10784_s14 + $0x34] sm:$0xf]  ;;  %v7567_v10 = vld [vmem:[%s10784_s14 + $0x98] sm:$0xf0] }
 0x6c1   : > { %v7570_v4 = vor.u32 %v8082_v18, %v7567_v10 }
 0x6c2   : > { %v10359_v44 = vpop.f32.mrf.mxu0  ;;  %5339 = vmatpush.bf16.msrb.mxu0 %v7242_v54  ;;  %v7607_v54 = vld [vmem:[%s10784_s14 + $0xe8] sm:$0xf0] }
 0x6c3   : > { %5365 = vmatpush.bf16.msra.mxu2 %v7370_v12  ;;  %v7610_v53 = vor.u32 %v8092_v52, %v7607_v54  ;;  %v8102_v54 = vld [vmem:[%s10786_s16 + $0x30] sm:$0xff] }
 0x6c5   : > { %v10388_v57 = vpop.f32.mrf.mxu3 }
 0x6c6   : > { %v4823_v50 = vadd.f32 %v10388_v57, %v4810_v23  ;;  %v7549_v57 = vld [vmem:[%s10784_s14 + $0x70] sm:$0xf]  ;;  %v8069_v23 = vld [vmem:[%s10784_s14 + $0x24] sm:$0xf0] }
 0x6c7   : > { %v4811_v37 = vpop.f32.mrf.mxu2  ;;  %v7550_v48 = vor.u32 %v8079_v30, %v7549_v57 }
 0x6c8   : > { %v7306_v37 = vor.u32 %v8016_v29, %v7303_v38  ;;  %v4836_v49 = vadd.f32 %v10359_v44, %v4823_v50  ;;  %v8078_v44 = vld [vmem:[%s10784_s14 + $0x74] sm:$0xf]  ;;  %v7522_v29 = vor.u32 %v8070_v1, %v7519_v51  ;;  %v8093_v38 = vld [vmem:[%s10784_s14 + $0xe4] sm:$0xf0]  ;;  %v7511_v50 = vld [vmem:[%s10784_s14 + $0x28] sm:$0xf0] }
 0x6c9   : > { %v10414_v40 = vpop.f32.mrf.mxu1  ;;  %v7606_v11 = vor.u32 %v8093_v38, %v7605_v56  ;;  %v8103_v56 = vld [vmem:[%s10786_s16 + $0x38] sm:$0xff] }
 0x6ca   : > { %v4837_v31 = vpop.f32.mrf.mxu0  ;;  %5352 = vmatpush.bf16.msrb.mxu1 %v7306_v37  ;;  %v4849_v26 = vadd.f32 %v10414_v40, %v4836_v49  ;;  %v7551_v40 = vld [vmem:[%s10784_s14 + $0x78] sm:$0xf0]  ;;  %v7510_v37 = vor.u32 %v8069_v23, %v7509_v22  ;;  %v8091_v49 = vld [vmem:[%s10784_s14 + $0xd4] sm:$0xf0]  ;;  %v8101_v22 = vld [vmem:[%s10786_s16 + $0x28] sm:$0xff] }
 0x6cb   : > { %v7554_v0 = vor.u32 %v8078_v44, %v7551_v40  ;;  %v7503_v44 = vld [vmem:[%s10784_s14 + $0x18] sm:$0xf0] }
 0x6cd   : > { %v4824_v28 = vpop.f32.mrf.mxu3 }
 0x6ce   : > { %v7543_v28 = vld [vmem:[%s10784_s14 + $0x68] sm:$0xf0] }
 0x6cf   : > { %v7546_v63 = vor.u32 %v8076_v59, %v7543_v28  ;;  %v7581_v59 = vld [vmem:[%s10784_s14 + $0xb0] sm:$0xf]  ;;  %v8087_v28 = vld [vmem:[%s10784_s14 + $0xb4] sm:$0xf0] }
 0x6d1   : > { %v4850_v62 = vpop.f32.mrf.mxu1 }
 0x6d2   : > { %v7518_v62 = vor.u32 %v8071_v58, %v7517_v16  ;;  %v8080_v16 = vld [vmem:[%s10784_s14 + $0x84] sm:$0xf] }
 0x6d5   : > { %v4874_v2 = vpop.f32.mrf.mxu3 }
 0x6dd   : > { %v4876_v21 = vpop.f32.mrf.mxu3 }
 0x6de   : > { %v8090_v21 = vld [vmem:[%s10784_s14 + $0xd4] sm:$0xf] }
 0x6df   : > { %v4861_v25 = vpop.f32.mrf.mxu2 }
 0x6e0   : > { %v4862_v47 = vadd.f32 %v4861_v25, %v4849_v26  ;;  %v7598_v26 = vor.u32 %v8091_v49, %v7597_v33  ;;  %v7599_v25 = vld [vmem:[%s10784_s14 + $0xd8] sm:$0xf0] }
 0x6e1   : > { %v7602_v57 = vor.u32 %v8090_v21, %v7599_v25 }
 0x6e2   : > { %v4875_v61 = vadd.f32 %v4874_v2, %v4862_v47  ;;  %v8068_v2 = vld [vmem:[%s10784_s14 + $0x24] sm:$0xf]  ;;  %v7501_v47 = vld [vmem:[%s10784_s14 + $0x10] sm:$0xf] }
 0x6e3   : > { %v7514_v12 = vor.u32 %v8068_v2, %v7511_v50 }
 0x6e4   : > { %v4878_v31 = vmax.f32 %v4875_v61, 0.0  ;;  %v8067_v61 = vld [vmem:[%s10784_s14 + $0x14] sm:$0xf0] }
 0x6e5   : > { %v7502_v30 = vor.u32 %v8067_v61, %v7501_v47 }
 0x6e6   : > { %v4880_v32 = vrot.slane %v4878_v31, 1  ;;  %v4882_v3 = vrot.slane %v4878_v31, 2  ;;  %v4884_v7 = vrot.slane %v4878_v31, 3  ;;  %v4886_v45 = vpack.c.bf16 %v4878_v31, %v4878_v31  ;;  %v8066_v31 = vld [vmem:[%s10784_s14 + $0x14] sm:$0xf] }
 0x6e7   : > { %v4863_v34 = vpop.f32.mrf.mxu2  ;;  %v7506_v40 = vor.u32 %v8066_v31, %v7503_v44 }
 0x6e8   : > { %v4887_v60 = vpack.c.bf16 %v4880_v32, %v4880_v32  ;;  %v4888_v20 = vpack.c.bf16 %v4882_v3, %v4882_v3  ;;  %v4889_v14 = vpack.c.bf16 %v4884_v7, %v4884_v7  ;;  %5288 = vmatmul.bf16.vlgmr.msra.gmra.mxu0 %v4886_v45  ;;  %v8088_v32 = vld [vmem:[%s10784_s14 + $0xc4] sm:$0xf]  ;;  %v7591_v7 = vld [vmem:[%s10784_s14 + $0xc8] sm:$0xf0] }
 0x6e9   : > { %5586 = vmatpush.bf16.msra.mxu0 %v7550_v48  ;;  %v7589_v48 = vld [vmem:[%s10784_s14 + $0xc0] sm:$0xf]  ;;  %v7594_v34 = vor.u32 %v8088_v32, %v7591_v7 }
 0x6ea   : > { %5301 = vmatmul.bf16.vlgmr.msra.gmra.mxu1 %v4887_v60  ;;  %5314 = vmatmul.bf16.vlgmr.msrb.gmra.mxu2 %v4888_v20  ;;  %v7590_v3 = vor.u32 %v8089_v13, %v7589_v48 }
 0x6eb   : > { %5327 = vmatmul.bf16.vlgmr.msrb.gmra.mxu3 %v4889_v14  ;;  %5612 = vmatpush.bf16.msrb.mxu2 %v7554_v0 }
 0x6ec   : > { %5599 = vmatpush.bf16.msra.mxu1 %v7614_v27  ;;  %5625 = vmatpush.bf16.msrb.mxu3 %v7618_v6  ;;  %v7557_v27 = vld [vmem:[%s10784_s14 + $0x80] sm:$0xf]  ;;  %v7559_v6 = vld [vmem:[%s10784_s14 + $0x88] sm:$0xf0] }
 0x6ed   : > { %5587 = vmatpush.bf16.msra.mxu0 %v7542_v35  ;;  %v7582_v35 = vor.u32 %v8087_v28, %v7581_v59  ;;  %v7558_v58 = vor.u32 %v8081_v55, %v7557_v27  ;;  %v7562_v1 = vor.u32 %v8080_v16, %v7559_v6  ;;  %v8098_v59 = vld [vmem:[%s10786_s16 + $0x10] sm:$0xff]  ;;  %v8107_v28 = vld [vmem:[%s10786_s16 + $0x58] sm:$0xff] }
 0x6ef   : > { %5613 = vmatpush.bf16.msrb.mxu2 %v7546_v63  ;;  %v7586_v63 = vor.u32 %v8086_v8, %v7583_v15  ;;  %v8106_v8 = vld [vmem:[%s10786_s16 + $0x50] sm:$0xff]  ;;  %v8096_v15 = vld [vmem:[%s10786_s16] sm:$0xff] }
 0x6f0   : > { %5600 = vmatpush.bf16.msra.mxu1 %v7606_v11  ;;  %5626 = vmatpush.bf16.msrb.mxu3 %v7610_v53  ;;  %v8110_v11 = vld [vmem:[%s10786_s16 + $0x70] sm:$0xff] }
 0x6f1   : > { %5588 = vmatpush.bf16.msra.mxu0 %v7534_v39  ;;  %v8084_v39 = vld [vmem:[%s10784_s14 + $0xa4] sm:$0xf] }
 0x6f2   : > { %v7578_v36 = vor.u32 %v8084_v39, %v7575_v46 }
 0x6f3   : > { %5614 = vmatpush.bf16.msrb.mxu2 %v7538_v5  ;;  %v7574_v5 = vor.u32 %v8085_v43, %v7573_v17  ;;  %v8104_v17 = vld [vmem:[%s10786_s16 + $0x40] sm:$0xff] }
 0x6f4   : > { %5601 = vmatpush.bf16.msra.mxu1 %v7598_v26  ;;  %5627 = vmatpush.bf16.msrb.mxu3 %v7602_v57  ;;  %v5277_v26 = vperm.slane %v4954_v41, 1 }
 0x6f5   : > { %5589 = vmatpush.bf16.msra.mxu0 %v7526_v9  ;;  %v8083_v9 = vld [vmem:[%s10784_s14 + $0x94] sm:$0xf0] }
 0x6f7   : > { %5615 = vmatpush.bf16.msrb.mxu2 %v7530_v19  ;;  %v7566_v19 = vor.u32 %v8083_v9, %v7565_v42 }
 0x6f8   : > { %5340 = vmatmul.bf16.vlgmr.msrb.gmra.mxu0 %v4886_v45  ;;  %v7493_v45 = vld [vmem:[%s10784_s14] sm:$0xf]  ;;  %5602 = vmatpush.bf16.msra.mxu1 %v7590_v3 }
 0x6f9   : > { %5590 = vmatpush.bf16.msra.mxu0 %v7518_v62  ;;  %v7494_v0 = vor.u32 %v8065_v24, %v7493_v45  ;;  %5628 = vmatpush.bf16.msrb.mxu3 %v7594_v34  ;;  %v5276_v62 = vperm.slane %v4954_v41, 0 }
 0x6fa   : > { %5353 = vmatmul.bf16.vlgmr.msrb.gmra.mxu1 %v4887_v60  ;;  %5366 = vmatmul.bf16.vlgmr.msra.gmra.mxu2 %v4888_v20  ;;  %v8064_v60 = vld [vmem:[%s10784_s14 + $0x4] sm:$0xf]  ;;  %v7495_v20 = vld [vmem:[%s10784_s14 + $0x8] sm:$0xf0] }
 0x6fb   : > { %5379 = vmatmul.bf16.vlgmr.msra.gmra.mxu3 %v4889_v14  ;;  %5616 = vmatpush.bf16.msrb.mxu2 %v7522_v29  ;;  %v7498_v14 = vor.u32 %v8064_v60, %v7495_v20  ;;  %v8111_v29 = vld [vmem:[%s10786_s16 + $0x78] sm:$0xff]  ;;  %v8109_v60 = vld [vmem:[%s10786_s16 + $0x68] sm:$0xff] }
 0x6fc   : > { %5603 = vmatpush.bf16.msra.mxu1 %v7582_v35  ;;  %v8099_v20 = vld [vmem:[%s10786_s16 + $0x18] sm:$0xff]  ;;  %v8097_v35 = vld [vmem:[%s10786_s16 + $0x8] sm:$0xff] }
 0x6fd   : > { %5591 = vmatpush.bf16.msra.mxu0 %v7510_v37  ;;  %5629 = vmatpush.bf16.msrb.mxu3 %v7586_v63  ;;  %v8105_v63 = vld [vmem:[%s10786_s16 + $0x48] sm:$0xff] }
 0x6ff   : > { %5617 = vmatpush.bf16.msrb.mxu2 %v7514_v12 }
 0x700   : > { %5604 = vmatpush.bf16.msra.mxu1 %v7574_v5  ;;  %v5420_v5 = vld [vmem:[%s10785_s15] sm:$0x3] }
 0x701   : > { %5592 = vmatpush.bf16.msra.mxu0 %v7502_v30  ;;  %5630 = vmatpush.bf16.msrb.mxu3 %v7578_v36  ;;  %v5582_v36 = vperm.slane %v5420_v5, 0 }
 0x703   : > { %5618 = vmatpush.bf16.msrb.mxu2 %v7506_v40 }
 0x704   : > { %5605 = vmatpush.bf16.msra.mxu1 %v7566_v19  ;;  %v5583_v19 = vperm.slane %v5420_v5, 1 }
 0x705   : > { %5593 = vmatpush.bf16.msra.mxu0 %v7494_v0  ;;  %5631 = vmatpush.bf16.msrb.mxu3 %v7570_v4  ;;  %v8100_v0 = vld [vmem:[%s10786_s16 + $0x20] sm:$0xff] }
 0x707   : > { %5619 = vmatpush.bf16.msrb.mxu2 %v7498_v14  ;;  %v8108_v14 = vld [vmem:[%s10786_s16 + $0x60] sm:$0xff] }
 0x708   : > { %5606 = vmatpush.bf16.msra.mxu1 %v7558_v58 }
 0x709   : > { %5632 = vmatpush.bf16.msrb.mxu3 %v7562_v1  ;;  %5771 = vmatpush.bf16.msrb.mxu0 %v8103_v56  ;;  %v5674_v56 = vld [vmem:[%s10787_s17] sm:$0x1] }
 0x70c   : > { %5784 = vmatpush.bf16.msrb.mxu1 %v8111_v29 }
 0x70d   : > { %5772 = vmatpush.bf16.msrb.mxu0 %v8102_v54 }
 0x710   : > { %5785 = vmatpush.bf16.msrb.mxu1 %v8110_v11 }
 0x711   : > { %5773 = vmatpush.bf16.msrb.mxu0 %v8101_v22 }
 0x714   : > { %5786 = vmatpush.bf16.msrb.mxu1 %v8109_v60 }
 0x715   : > { %5774 = vmatpush.bf16.msrb.mxu0 %v8100_v0 }
 0x718   : > { %5787 = vmatpush.bf16.msrb.mxu1 %v8108_v14 }
 0x719   : > { %5775 = vmatpush.bf16.msrb.mxu0 %v8099_v20 }
 0x71c   : > { %5788 = vmatpush.bf16.msrb.mxu1 %v8107_v28 }
 0x71d   : > { %5776 = vmatpush.bf16.msrb.mxu0 %v8098_v59 }
 0x720   : > { %5789 = vmatpush.bf16.msrb.mxu1 %v8106_v8 }
 0x721   : > { %5777 = vmatpush.bf16.msrb.mxu0 %v8097_v35 }
 0x724   : > { %5790 = vmatpush.bf16.msrb.mxu1 %v8105_v63 }
 0x725   : > { %5778 = vmatpush.bf16.msrb.mxu0 %v8096_v15 }
 0x728   : > { %5791 = vmatpush.bf16.msrb.mxu1 %v8104_v17 }
 0x765   : > { %v5289_v51 = vpop.f32.mrf.mxu0 }
 0x766   : > { %v5290_v52 = vadd.f32 %v5289_v51, %v5276_v62 }
 0x767   : > { %v5302_v38 = vpop.f32.mrf.mxu1 }
 0x768   : > { %v5303_v53 = vadd.f32 %v5302_v38, %v5290_v52 }
 0x76d   : > { %v5291_v23 = vpop.f32.mrf.mxu0  ;;  %v5315_v2 = vpop.f32.mrf.mxu2 }
 0x76e   : > { %v5316_v37 = vadd.f32 %v5315_v2, %v5303_v53  ;;  %v5328_v50 = vpop.f32.mrf.mxu3 }
 0x76f   : > { %v5304_v12 = vpop.f32.mrf.mxu1 }
 0x770   : > { %v5329_v33 = vadd.f32 %v5328_v50, %v5316_v37 }
 0x772   : > { %v5384_v49 = vmax.f32 %v5329_v33, 0.0 }
 0x774   : > { %v5386_v21 = vpack.c.bf16 %v5384_v49, %v5384_v49 }
 0x775   : > { %v5317_v25 = vpop.f32.mrf.mxu2  ;;  %v5341_v47 = vpop.f32.mrf.mxu0 }
 0x776   : > { %v5330_v61 = vpop.f32.mrf.mxu3  ;;  %5594 = vmatmul.bf16.vlgmr.msra.gmra.mxu0 %v5386_v21  ;;  %5620 = vmatmul.bf16.vlgmr.msrb.gmra.mxu2 %v5386_v21  ;;  %v5342_v30 = vadd.f32 %v5341_v47, %v5277_v26 }
 0x777   : > { %v5354_v57 = vpop.f32.mrf.mxu1 }
 0x778   : > { %v5355_v31 = vadd.f32 %v5354_v57, %v5342_v30 }
 0x77d   : > { %v5343_v44 = vpop.f32.mrf.mxu0  ;;  %v5367_v40 = vpop.f32.mrf.mxu2 }
 0x77e   : > { %v5368_v48 = vadd.f32 %v5367_v40, %v5355_v31  ;;  %v5380_v13 = vpop.f32.mrf.mxu3 }
 0x77f   : > { %v5356_v32 = vpop.f32.mrf.mxu1 }
 0x780   : > { %v5381_v3 = vadd.f32 %v5380_v13, %v5368_v48 }
 0x782   : > { %v5385_v7 = vmax.f32 %v5381_v3, 0.0 }
 0x784   : > { %v5387_v45 = vpack.c.bf16 %v5385_v7, %v5385_v7 }
 0x785   : > { %v5369_v24 = vpop.f32.mrf.mxu2 }
 0x786   : > { %v5382_v34 = vpop.f32.mrf.mxu3  ;;  %5607 = vmatmul.bf16.vlgmr.msra.gmra.mxu1 %v5387_v45  ;;  %5633 = vmatmul.bf16.vlgmr.msrb.gmra.mxu3 %v5387_v45 }
 0x7f3   : > { %v5595_v43 = vpop.f32.mrf.mxu0 }
 0x7f4   : > { %v5596_v9 = vadd.f32 %v5595_v43, %v5582_v36 }
 0x7f9   : > { %v5621_v39 = vpop.f32.mrf.mxu2 }
 0x7fa   : > { %v5622_v41 = vadd.f32 %v5621_v39, %v5583_v19 }
 0x7fb   : > { %v5597_v46 = vpop.f32.mrf.mxu0 }
 0x801   : > { %v5623_v42 = vpop.f32.mrf.mxu2 }
 0x803   : > { %v5608_v18 = vpop.f32.mrf.mxu1 }
 0x804   : > { %v5609_v10 = vadd.f32 %v5608_v18, %v5596_v9 }
 0x806   : > { %v5638_v4 = vmax.f32 %v5609_v10, 0.0 }
 0x808   : > { %v5640_v27 = vpack.c.bf16 %v5638_v4, %v5638_v4 }
 0x809   : > { %v5634_v55 = vpop.f32.mrf.mxu3 }
 0x80a   : > { %v5635_v16 = vadd.f32 %v5634_v55, %v5622_v41  ;;  %5779 = vmatmul.bf16.vlgmr.msrb.gmra.mxu0 %v5640_v27 }
 0x80b   : > { %v5610_v58 = vpop.f32.mrf.mxu1 }
 0x80c   : > { %v5639_v6 = vmax.f32 %v5635_v16, 0.0 }
 0x80e   : > { %v5641_v62 = vpack.c.bf16 %v5639_v6, %v5639_v6 }
 0x810   : > { %5792 = vmatmul.bf16.vlgmr.msrb.gmra.mxu1 %v5641_v62 }
 0x811   : > { %v5636_v1 = vpop.f32.mrf.mxu3 }
 0x887   : > { %v5780_v51 = vpop.f32.mrf.mxu0 }
 0x888   : > { %v5781_v29 = vadd.f32 %v5780_v51, %v5674_v56 }
 0x88d   : > { %v5793_v38 = vpop.f32.mrf.mxu1 }
 0x88e   : > { %v5794_v52 = vadd.f32 %v5793_v38, %v5781_v29 }
 0x88f   : > { %v5782_v54 = vpop.f32.mrf.mxu0 }
 0x890   : > { %5798 = vst.msk [vmem:[%s573_s30] sm:$0x1] %vm5797_vm4, %v5794_v52 }
 0x895   : > { %v5795_v11 = vpop.f32.mrf.mxu1 }
 0x896 PF: > { %s28_s27 = sadd.s32 1, %s8130_s27  }
 0x897   : > { %p25_p5 = scmp.ge.s32.totalorder %s28_s27, 4  }
 0x899   :  { %27 = sbr.rel (!%p25_p5) target bundleno = 4 (0x4), region = 146 }

</bundles_post_ra>
